<compile_context>
chip_gen: v7x
topology: tpu7x:2x2x1
jax: 0.10.0
libtpu: 0.0.40
codegen_flags: <defaults>
</compile_context>

<pallas_src>
import functools

import jax
import jax.numpy as jnp
import numpy as np
from jax import lax
from jax.experimental import pallas as pl
from jax.experimental.pallas import tpu as pltpu

B_PAD = 8  # batch rows padded to one full sublane tile


# ----------------------------------------------------------------------------
# Fused Pallas kernel: 2-layer LSTM stack (interleaved) + folded head
# ----------------------------------------------------------------------------
def _bach_fused_kernel(mask_ref, x_ref,
                       wih0_ref, whh0_ref, b0_ref,
                       wih1_ref, whh1_ref, b1_ref,
                       whead_ref, bhead_ref,
                       out_ref,
                       pre0_scr, h1_scr,
                       *, hidden, output_size, seq_len):
    """Whole BACH_Net forward, time-major, batch padded to 8.

    mask_ref : [T*8, H]  f32 validity mask (1 for valid (t,b), else 0),
               already lane-broadcast to H in the wrapper.
    x_ref    : [T*8, Din] time-major input.
    out_ref  : [T*8, 3*(O-1)+3] time-major head output (notes | change).
    pre0_scr : VMEM [T*8, 4H]  hoisted layer-0 input projection.
    h1_scr   : VMEM [T*8, H]   layer-1 per-step (masked) outputs.
    """
    H = hidden
    T = seq_len
    om1 = output_size - 1

    # ---- hoisted layer-0 input projection: one MXU pass for the whole seq ---
    pre0_scr[...] = (jnp.dot(x_ref[...], wih0_ref[...],
                             preferred_element_type=jnp.float32)
                     + b0_ref[...])

    # Weights loaded / broadcasts hoisted once (outside the unrolled loop).
    whh0 = whh0_ref[...]
    wih1 = wih1_ref[...]
    whh1 = whh1_ref[...]
    b1 = jnp.broadcast_to(b1_ref[...], (B_PAD, 4 * H))

    h0 = jnp.zeros((B_PAD, H), jnp.float32)
    c0 = jnp.zeros((B_PAD, H), jnp.float32)
    h1 = jnp.zeros((B_PAD, H), jnp.float32)
    c1 = jnp.zeros((B_PAD, H), jnp.float32)

    def lstm_cell(gates, c_prev):
        # Whole-vreg sigmoid over the 4H gate vector (EUP slot); i,f,g,o order
        # matches torch.nn.LSTM.
        sg = jax.nn.sigmoid(gates)
        i_g = sg[:, 0:H]
        f_g = sg[:, H:2 * H]
        o_g = sg[:, 3 * H:4 * H]
        g_g = jnp.tanh(gates[:, 2 * H:3 * H])
        c_new = f_g * c_prev + i_g * g_g
        h_new = o_g * jnp.tanh(c_new)
        return h_new, c_new

    # ---- interleaved 2-layer recurrence (critical path ~ T+1 step latencies)
    for t in range(T):                                      # fully unrolled
        idx = pl.ds(t * B_PAD, B_PAD)                       # aligned [8, *] tile
        m = mask_ref[idx, :]                                # [8, H]
        om = 1.0 - m

        # layer 0, step t
        g0 = pre0_scr[idx, :] + jnp.dot(h0, whh0,
                                        preferred_element_type=jnp.float32)
        h0n, c0n = lstm_cell(g0, c0)
        h0_out = m * h0n                                    # padded steps -> 0
        h0 = h0_out + om * h0                               # state frozen when padded
        c0 = m * c0n + om * c0

        # layer 1, step t (depends only on h0_out of the same step)
        g1 = (jnp.dot(h0_out, wih1, preferred_element_type=jnp.float32)
              + jnp.dot(h1, whh1, preferred_element_type=jnp.float32) + b1)
        h1n, c1n = lstm_cell(g1, c1)
        h1_out = m * h1n
        h1_scr[idx, :] = h1_out                             # aligned [8, H] store
        h1 = h1_out + om * h1
        c1 = m * c1n + om * c1

    # ---- head: folded (Linearmiddle . [Linearnote | Linearchangenote]) ------
    head = (jnp.dot(h1_scr[...], whead_ref[...],
                    preferred_element_type=jnp.float32)
            + bhead_ref[...])                               # [T*8, 3*om1 + 3]

    sms = []
    for g in range(3):
        lg = head[:, g * om1:(g + 1) * om1]
        lg = lg - jnp.max(lg, axis=-1, keepdims=True)
        e = jnp.exp(lg)
        sms.append(e * pl.reciprocal(jnp.sum(e, axis=-1, keepdims=True),
                                     approx=True))
    # De-interleaved output layout: contiguous notes block, then change block.
    out_ref[:, 0:3 * om1] = jnp.concatenate(sms, axis=1)
    out_ref[:, 3 * om1:3 * om1 + 3] = jax.nn.sigmoid(head[:, 3 * om1:3 * om1 + 3])


# ----------------------------------------------------------------------------
# Wrapper
# ----------------------------------------------------------------------------
def bach_net_forward(x, lengths, params, *, hidden_size, output_size, max_length):
    """x: [5, max_length, input_size]; lengths: [5] int
    returns [5, max_length, 3, output_size] (same as the PyTorch module)."""
    B, T, din = x.shape
    assert B == 5 and T == max_length
    H = hidden_size
    om1 = output_size - 1
    n_out = 3 * om1 + 3
    assert len(params["lstm"]) == 2, "kernel is specialized for num_layers=2"

    # Fold Linearmiddle into the fused head (exact: no activation in between).
    w_head = params["wm"] @ params["wh"]                    # [H, 3*om1+3]
    b_head = params["bm"] @ params["wh"] + params["bh"]     # [1, 3*om1+3]

    # Wrapper-side layout: pad batch to 8, go time-major, flatten to 2-D.
    xp = jnp.zeros((B_PAD, T, din), jnp.float32).at[:B].set(x.astype(jnp.float32))
    x_tm = jnp.transpose(xp, (1, 0, 2)).reshape(T * B_PAD, din)

    # Validity mask, lane-broadcast to H so the kernel never broadcasts it.
    lens_p = jnp.zeros((B_PAD,), jnp.int32).at[:B].set(lengths.astype(jnp.int32))
    mask = (jnp.arange(T)[:, None] < lens_p[None, :]).astype(jnp.float32)  # [T, 8]
    mask_tm = jnp.broadcast_to(mask.reshape(T * B_PAD, 1), (T * B_PAD, H))

    wih0, whh0, b0 = params["lstm"][0]
    wih1, whh1, b1 = params["lstm"][1]

    kernel = functools.partial(_bach_fused_kernel, hidden=H,
                               output_size=output_size, seq_len=T)

    def full2d(shape):
        return pl.BlockSpec(shape, lambda i: (0, 0))

    out_tm = pl.pallas_call(
        kernel,
        out_shape=jax.ShapeDtypeStruct((T * B_PAD, n_out), jnp.float32),
        grid_spec=pltpu.PrefetchScalarGridSpec(
            num_scalar_prefetch=0,
            grid=(1,),
            in_specs=[full2d((T * B_PAD, H)),                 # mask
                      full2d((T * B_PAD, din)),               # x (time-major)
                      full2d((din, 4 * H)),                   # wih0
                      full2d((H, 4 * H)),                     # whh0
                      full2d((1, 4 * H)),                     # b0
                      full2d((H, 4 * H)),                     # wih1
                      full2d((H, 4 * H)),                     # whh1
                      full2d((1, 4 * H)),                     # b1
                      full2d((H, n_out)),                     # folded head W
                      full2d((1, n_out))],                    # folded head b
            out_specs=full2d((T * B_PAD, n_out)),
            scratch_shapes=[pltpu.VMEM((T * B_PAD, 4 * H), jnp.float32),
                            pltpu.VMEM((T * B_PAD, H), jnp.float32)]),
        compiler_params=pltpu.CompilerParams(
            dimension_semantics=("arbitrary",)),
    )(mask_tm, x_tm, wih0, whh0, b0, wih1, whh1, b1, w_head, b_head)

    # Back to batch-first [5, T, 3, O] (pure XLA layout plumbing, tiny).
    out = out_tm.reshape(T, B_PAD, n_out)[:, :B, :]
    out = jnp.transpose(out, (1, 0, 2))                     # [5, T, 3*om1+3]
    notes = out[:, :, :3 * om1].reshape(B, T, 3, om1)
    change = out[:, :, 3 * om1:].reshape(B, T, 3, 1)
    return jnp.concatenate([notes, change], axis=3)


# ----------------------------------------------------------------------------
# Deterministic parameter initialization (PyTorch-style uniform ranges)
# ----------------------------------------------------------------------------
def init_params(key, input_size, hidden_size, output_size, num_layers):
    H = hidden_size
    om1 = output_size - 1
    params = {"lstm": []}
    keys = jax.random.split(key, 4 * num_layers + 6)
    idx = 0
    k_lstm = 1.0 / np.sqrt(H)
    din = input_size
    for _ in range(num_layers):
        wih = jax.random.uniform(keys[idx], (din, 4 * H), jnp.float32, -k_lstm, k_lstm); idx += 1
        whh = jax.random.uniform(keys[idx], (H, 4 * H), jnp.float32, -k_lstm, k_lstm); idx += 1
        bih = jax.random.uniform(keys[idx], (1, 4 * H), jnp.float32, -k_lstm, k_lstm); idx += 1
        bhh = jax.random.uniform(keys[idx], (1, 4 * H), jnp.float32, -k_lstm, k_lstm); idx += 1
        params["lstm"].append((wih, whh, bih + bhh))
        din = H
    k_lin = 1.0 / np.sqrt(H)
    params["wm"] = jax.random.uniform(keys[idx], (H, H), jnp.float32, -k_lin, k_lin); idx += 1
    params["bm"] = jax.random.uniform(keys[idx], (1, H), jnp.float32, -k_lin, k_lin); idx += 1
    wn = jax.random.uniform(keys[idx], (H, 3 * om1), jnp.float32, -k_lin, k_lin); idx += 1
    bn = jax.random.uniform(keys[idx], (1, 3 * om1), jnp.float32, -k_lin, k_lin); idx += 1
    wc = jax.random.uniform(keys[idx], (H, 3), jnp.float32, -k_lin, k_lin); idx += 1
    bc = jax.random.uniform(keys[idx], (1, 3), jnp.float32, -k_lin, k_lin); idx += 1
    # Fused head weight/bias: [Linearnote | Linearchangenote]
    params["wh"] = jnp.concatenate([wn, wc], axis=1)        # [H, 3*(O-1)+3]
    params["bh"] = jnp.concatenate([bn, bc], axis=1)        # [1, 3*(O-1)+3]
    return params


# ----------------------------------------------------------------------------
# Pure-JAX reference (mirrors the PyTorch forward) for a sanity check
# ----------------------------------------------------------------------------
def reference_forward(x, lengths, params, *, hidden_size, output_size, max_length):
    B, T, _ = x.shape
    H = hidden_size
    om1 = output_size - 1
    mask = (jnp.arange(T)[:, None] < lengths[None, :]).astype(jnp.float32)[:, :, None]
    h_seq = jnp.transpose(x, (1, 0, 2)).astype(jnp.float32)
    for wih, whh, bias in params["lstm"]:
        def step(carry, inp):
            h, c = carry
            xt, m = inp
            gates = xt @ wih + h @ whh + bias
            i = jax.nn.sigmoid(gates[:, :H])
            f = jax.nn.sigmoid(gates[:, H:2 * H])
            g = jnp.tanh(gates[:, 2 * H:3 * H])
            o = jax.nn.sigmoid(gates[:, 3 * H:])
            c_new = f * c + i * g
            h_new = o * jnp.tanh(c_new)
            return (m * h_new + (1 - m) * h, m * c_new + (1 - m) * c), m * h_new
        (_, _), h_seq = lax.scan(step, (jnp.zeros((B, H)), jnp.zeros((B, H))),
                                 (h_seq, mask))
    h_flat = jnp.transpose(h_seq, (1, 0, 2)).reshape(B * T, H)
    hm = h_flat @ params["wm"] + params["bm"]
    head = hm @ params["wh"] + params["bh"]
    notes = jax.nn.softmax(head[:, :3 * om1].reshape(B, T, 3, om1), axis=-1)
    change = jax.nn.sigmoid(head[:, 3 * om1:].reshape(B, T, 3, 1))
    return jnp.concatenate([notes, change], axis=3)


# ----------------------------------------------------------------------------
if __name__ == "__main__":
    input_size = 16
    hidden_size = 32
    output_size = 9          # notes head: 3*(output_size-1)=24, change head: 3
    num_layers = 2
    max_length = 12
    batch = 5                # fixed by the original module's reshapes

    key = jax.random.PRNGKey(0)
    k_x, k_p = jax.random.split(key)
    x = 0.5 * jax.random.normal(k_x, (batch, max_length, input_size), jnp.float32)
    lengths = jnp.array([10, 7, 10, 4, 9], dtype=jnp.int32)   # max < max_length -> zero-pad path
    params = init_params(k_p, input_size, hidden_size, output_size, num_layers)

    fwd = jax.jit(functools.partial(bach_net_forward,
                                    hidden_size=hidden_size,
                                    output_size=output_size,
                                    max_length=max_length))
    out = jax.block_until_ready(fwd(x, lengths, params))

    assert out.shape == (batch, max_length, 3, output_size), out.shape
    assert bool(jnp.all(jnp.isfinite(out)))

    ref = jax.block_until_ready(
        reference_forward(x, lengths, params,
                          hidden_size=hidden_size,
                          output_size=output_size,
                          max_length=max_length))
    np.testing.assert_allclose(np.asarray(out), np.asarray(ref), rtol=2e-2, atol=2e-2)

    print("KERNEL_OK")
</pallas_src>

<mosaic_0001>
module attributes {stable_mosaic.version = 11 : i64} {
  func.func @_bach_fused_kernel(%arg0: i32, %arg1: memref<96x32xf32, #tpu.memory_space<vmem>>, %arg2: memref<96x16xf32, #tpu.memory_space<vmem>>, %arg3: memref<16x128xf32, #tpu.memory_space<vmem>>, %arg4: memref<32x128xf32, #tpu.memory_space<vmem>>, %arg5: memref<1x128xf32, #tpu.memory_space<vmem>>, %arg6: memref<32x128xf32, #tpu.memory_space<vmem>>, %arg7: memref<32x128xf32, #tpu.memory_space<vmem>>, %arg8: memref<1x128xf32, #tpu.memory_space<vmem>>, %arg9: memref<32x27xf32, #tpu.memory_space<vmem>>, %arg10: memref<1x27xf32, #tpu.memory_space<vmem>>, %arg11: memref<96x27xf32, #tpu.memory_space<vmem>>, %arg12: memref<96x128xf32, #tpu.memory_space<vmem>>, %arg13: memref<96x32xf32, #tpu.memory_space<vmem>>) attributes {dimension_semantics = [#tpu.dimension_semantics<arbitrary>], iteration_bounds = array<i64: 1>, scalar_prefetch = 0 : i64, scratch_operands = 2 : i64, tpu.core_type = #tpu.core_type<tc>, window_params = [{pipeline_mode = #tpu.pipeline_mode<synchronous>, transform_indices = @transform_0, window_bounds = array<i64: 96, 32>}, {pipeline_mode = #tpu.pipeline_mode<synchronous>, transform_indices = @transform_1, window_bounds = array<i64: 96, 16>}, {pipeline_mode = #tpu.pipeline_mode<synchronous>, transform_indices = @transform_2, window_bounds = array<i64: 16, 128>}, {pipeline_mode = #tpu.pipeline_mode<synchronous>, transform_indices = @transform_3, window_bounds = array<i64: 32, 128>}, {pipeline_mode = #tpu.pipeline_mode<synchronous>, transform_indices = @transform_4, window_bounds = array<i64: 1, 128>}, {pipeline_mode = #tpu.pipeline_mode<synchronous>, transform_indices = @transform_5, window_bounds = array<i64: 32, 128>}, {pipeline_mode = #tpu.pipeline_mode<synchronous>, transform_indices = @transform_6, window_bounds = array<i64: 32, 128>}, {pipeline_mode = #tpu.pipeline_mode<synchronous>, transform_indices = @transform_7, window_bounds = array<i64: 1, 128>}, {pipeline_mode = #tpu.pipeline_mode<synchronous>, transform_indices = @transform_8, window_bounds = array<i64: 32, 27>}, {pipeline_mode = #tpu.pipeline_mode<synchronous>, transform_indices = @transform_9, window_bounds = array<i64: 1, 27>}, {pipeline_mode = #tpu.pipeline_mode<synchronous>, transform_indices = @transform_10, window_bounds = array<i64: 96, 27>}]} {
    %c0 = arith.constant 0 : index
    %c0_0 = arith.constant 0 : index
    %0 = vector.load %arg2[%c0, %c0_0] : memref<96x16xf32, #tpu.memory_space<vmem>>, vector<96x16xf32>
    %c0_1 = arith.constant 0 : index
    %c0_2 = arith.constant 0 : index
    %1 = vector.load %arg3[%c0_1, %c0_2] : memref<16x128xf32, #tpu.memory_space<vmem>>, vector<16x128xf32>
    %cst = arith.constant dense<0.000000e+00> : vector<96x128xf32>
    %2 = tpu.matmul %0, %1, %cst {dimension_numbers = #tpu.dot_dimension_numbers<[1], [0], [0], [1], [0, 0, 1, 1], [], []>} : vector<96x16xf32>, vector<16x128xf32>, vector<96x128xf32> -> vector<96x128xf32>
    %c0_3 = arith.constant 0 : index
    %c0_4 = arith.constant 0 : index
    %3 = vector.load %arg5[%c0_3, %c0_4] : memref<1x128xf32, #tpu.memory_space<vmem>>, vector<1x128xf32>
    %4 = vector.broadcast %3 : vector<1x128xf32> to vector<96x128xf32>
    %5 = arith.addf %2, %4 : vector<96x128xf32>
    %c0_5 = arith.constant 0 : index
    %c0_6 = arith.constant 0 : index
    %6 = vector.load %arg12[%c0_5, %c0_6] : memref<96x128xf32, #tpu.memory_space<vmem>>, vector<96x128xf32>
    tpu.vector_store %arg12[%c0_5, %c0_6], %5 {strides = array<i32>} : memref<96x128xf32, #tpu.memory_space<vmem>>, vector<96x128xf32>,
    %c0_7 = arith.constant 0 : index
    %c0_8 = arith.constant 0 : index
    %7 = vector.load %arg4[%c0_7, %c0_8] : memref<32x128xf32, #tpu.memory_space<vmem>>, vector<32x128xf32>
    %c0_9 = arith.constant 0 : index
    %c0_10 = arith.constant 0 : index
    %8 = vector.load %arg6[%c0_9, %c0_10] : memref<32x128xf32, #tpu.memory_space<vmem>>, vector<32x128xf32>
    %c0_11 = arith.constant 0 : index
    %c0_12 = arith.constant 0 : index
    %9 = vector.load %arg7[%c0_11, %c0_12] : memref<32x128xf32, #tpu.memory_space<vmem>>, vector<32x128xf32>
    %c0_13 = arith.constant 0 : index
    %c0_14 = arith.constant 0 : index
    %10 = vector.load %arg8[%c0_13, %c0_14] : memref<1x128xf32, #tpu.memory_space<vmem>>, vector<1x128xf32>
    %11 = vector.shape_cast %10 : vector<1x128xf32> to vector<1x128xf32>
    %12 = vector.broadcast %11 : vector<1x128xf32> to vector<8x128xf32>
    %cst_15 = arith.constant 0.000000e+00 : f32
    %13 = vector.broadcast %cst_15 : f32 to vector<8x32xf32>
    %cst_16 = arith.constant 0.000000e+00 : f32
    %14 = vector.broadcast %cst_16 : f32 to vector<8x32xf32>
    %cst_17 = arith.constant 0.000000e+00 : f32
    %15 = vector.broadcast %cst_17 : f32 to vector<8x32xf32>
    %cst_18 = arith.constant 0.000000e+00 : f32
    %16 = vector.broadcast %cst_18 : f32 to vector<8x32xf32>
    %c0_19 = arith.constant 0 : index
    %c0_20 = arith.constant 0 : index
    %17 = vector.load %arg1[%c0_19, %c0_20] : memref<96x32xf32, #tpu.memory_space<vmem>>, vector<8x32xf32>
    %cst_21 = arith.constant 1.000000e+00 : f32
    %18 = vector.broadcast %cst_21 : f32 to vector<8x32xf32>
    %19 = arith.subf %18, %17 : vector<8x32xf32>
    %c0_22 = arith.constant 0 : index
    %c0_23 = arith.constant 0 : index
    %20 = vector.load %arg12[%c0_22, %c0_23] : memref<96x128xf32, #tpu.memory_space<vmem>>, vector<8x128xf32>
    %cst_24 = arith.constant dense<0.000000e+00> : vector<8x128xf32>
    %21 = tpu.matmul %13, %7, %cst_24 {dimension_numbers = #tpu.dot_dimension_numbers<[1], [0], [0], [1], [0, 0, 1, 1], [], []>} : vector<8x32xf32>, vector<32x128xf32>, vector<8x128xf32> -> vector<8x128xf32>
    %22 = arith.addf %20, %21 : vector<8x128xf32>
    %23 = arith.negf %22 : vector<8x128xf32>
    %24 = math.exp %23 : vector<8x128xf32>
    %cst_25 = arith.constant 1.000000e+00 : f32
    %25 = vector.broadcast %cst_25 : f32 to vector<8x128xf32>
    %26 = arith.addf %25, %24 : vector<8x128xf32>
    %27 = arith.divf %25, %26 : vector<8x128xf32>
    %28 = vector.extract_strided_slice %27 {offsets = [0, 0], sizes = [8, 32], strides = [1, 1]} : vector<8x128xf32> to vector<8x32xf32>
    %29 = vector.extract_strided_slice %27 {offsets = [0, 32], sizes = [8, 32], strides = [1, 1]} : vector<8x128xf32> to vector<8x32xf32>
    %30 = vector.extract_strided_slice %27 {offsets = [0, 96], sizes = [8, 32], strides = [1, 1]} : vector<8x128xf32> to vector<8x32xf32>
    %31 = vector.extract_strided_slice %22 {offsets = [0, 64], sizes = [8, 32], strides = [1, 1]} : vector<8x128xf32> to vector<8x32xf32>
    %32 = math.tanh %31 : vector<8x32xf32>
    %33 = arith.mulf %29, %14 : vector<8x32xf32>
    %34 = arith.mulf %28, %32 : vector<8x32xf32>
    %35 = arith.addf %33, %34 : vector<8x32xf32>
    %36 = math.tanh %35 : vector<8x32xf32>
    %37 = arith.mulf %30, %36 : vector<8x32xf32>
    %38 = arith.mulf %17, %37 : vector<8x32xf32>
    %39 = arith.mulf %19, %13 : vector<8x32xf32>
    %40 = arith.addf %38, %39 : vector<8x32xf32>
    %41 = arith.mulf %17, %35 : vector<8x32xf32>
    %42 = arith.mulf %19, %14 : vector<8x32xf32>
    %43 = arith.addf %41, %42 : vector<8x32xf32>
    %cst_26 = arith.constant dense<0.000000e+00> : vector<8x128xf32>
    %44 = tpu.matmul %38, %8, %cst_26 {dimension_numbers = #tpu.dot_dimension_numbers<[1], [0], [0], [1], [0, 0, 1, 1], [], []>} : vector<8x32xf32>, vector<32x128xf32>, vector<8x128xf32> -> vector<8x128xf32>
    %cst_27 = arith.constant dense<0.000000e+00> : vector<8x128xf32>
    %45 = tpu.matmul %15, %9, %cst_27 {dimension_numbers = #tpu.dot_dimension_numbers<[1], [0], [0], [1], [0, 0, 1, 1], [], []>} : vector<8x32xf32>, vector<32x128xf32>, vector<8x128xf32> -> vector<8x128xf32>
    %46 = arith.addf %44, %45 : vector<8x128xf32>
    %47 = arith.addf %46, %12 : vector<8x128xf32>
    %48 = arith.negf %47 : vector<8x128xf32>
    %49 = math.exp %48 : vector<8x128xf32>
    %cst_28 = arith.constant 1.000000e+00 : f32
    %50 = vector.broadcast %cst_28 : f32 to vector<8x128xf32>
    %51 = arith.addf %50, %49 : vector<8x128xf32>
    %52 = arith.divf %50, %51 : vector<8x128xf32>
    %53 = vector.extract_strided_slice %52 {offsets = [0, 0], sizes = [8, 32], strides = [1, 1]} : vector<8x128xf32> to vector<8x32xf32>
    %54 = vector.extract_strided_slice %52 {offsets = [0, 32], sizes = [8, 32], strides = [1, 1]} : vector<8x128xf32> to vector<8x32xf32>
    %55 = vector.extract_strided_slice %52 {offsets = [0, 96], sizes = [8, 32], strides = [1, 1]} : vector<8x128xf32> to vector<8x32xf32>
    %56 = vector.extract_strided_slice %47 {offsets = [0, 64], sizes = [8, 32], strides = [1, 1]} : vector<8x128xf32> to vector<8x32xf32>
    %57 = math.tanh %56 : vector<8x32xf32>
    %58 = arith.mulf %54, %16 : vector<8x32xf32>
    %59 = arith.mulf %53, %57 : vector<8x32xf32>
    %60 = arith.addf %58, %59 : vector<8x32xf32>
    %61 = math.tanh %60 : vector<8x32xf32>
    %62 = arith.mulf %55, %61 : vector<8x32xf32>
    %63 = arith.mulf %17, %62 : vector<8x32xf32>
    %c0_29 = arith.constant 0 : index
    %c0_30 = arith.constant 0 : index
    %64 = vector.load %arg13[%c0_29, %c0_30] : memref<96x32xf32, #tpu.memory_space<vmem>>, vector<8x32xf32>
    tpu.vector_store %arg13[%c0_29, %c0_30], %63 {strides = array<i32>} : memref<96x32xf32, #tpu.memory_space<vmem>>, vector<8x32xf32>,
    %65 = arith.mulf %19, %15 : vector<8x32xf32>
    %66 = arith.addf %63, %65 : vector<8x32xf32>
    %67 = arith.mulf %17, %60 : vector<8x32xf32>
    %68 = arith.mulf %19, %16 : vector<8x32xf32>
    %69 = arith.addf %67, %68 : vector<8x32xf32>
    %c8 = arith.constant 8 : index
    %c0_31 = arith.constant 0 : index
    %70 = vector.load %arg1[%c8, %c0_31] : memref<96x32xf32, #tpu.memory_space<vmem>>, vector<8x32xf32>
    %cst_32 = arith.constant 1.000000e+00 : f32
    %71 = vector.broadcast %cst_32 : f32 to vector<8x32xf32>
    %72 = arith.subf %71, %70 : vector<8x32xf32>
    %c8_33 = arith.constant 8 : index
    %c0_34 = arith.constant 0 : index
    %73 = vector.load %arg12[%c8_33, %c0_34] : memref<96x128xf32, #tpu.memory_space<vmem>>, vector<8x128xf32>
    %cst_35 = arith.constant dense<0.000000e+00> : vector<8x128xf32>
    %74 = tpu.matmul %40, %7, %cst_35 {dimension_numbers = #tpu.dot_dimension_numbers<[1], [0], [0], [1], [0, 0, 1, 1], [], []>} : vector<8x32xf32>, vector<32x128xf32>, vector<8x128xf32> -> vector<8x128xf32>
    %75 = arith.addf %73, %74 : vector<8x128xf32>
    %76 = arith.negf %75 : vector<8x128xf32>
    %77 = math.exp %76 : vector<8x128xf32>
    %cst_36 = arith.constant 1.000000e+00 : f32
    %78 = vector.broadcast %cst_36 : f32 to vector<8x128xf32>
    %79 = arith.addf %78, %77 : vector<8x128xf32>
    %80 = arith.divf %78, %79 : vector<8x128xf32>
    %81 = vector.extract_strided_slice %80 {offsets = [0, 0], sizes = [8, 32], strides = [1, 1]} : vector<8x128xf32> to vector<8x32xf32>
    %82 = vector.extract_strided_slice %80 {offsets = [0, 32], sizes = [8, 32], strides = [1, 1]} : vector<8x128xf32> to vector<8x32xf32>
    %83 = vector.extract_strided_slice %80 {offsets = [0, 96], sizes = [8, 32], strides = [1, 1]} : vector<8x128xf32> to vector<8x32xf32>
    %84 = vector.extract_strided_slice %75 {offsets = [0, 64], sizes = [8, 32], strides = [1, 1]} : vector<8x128xf32> to vector<8x32xf32>
    %85 = math.tanh %84 : vector<8x32xf32>
    %86 = arith.mulf %82, %43 : vector<8x32xf32>
    %87 = arith.mulf %81, %85 : vector<8x32xf32>
    %88 = arith.addf %86, %87 : vector<8x32xf32>
    %89 = math.tanh %88 : vector<8x32xf32>
    %90 = arith.mulf %83, %89 : vector<8x32xf32>
    %91 = arith.mulf %70, %90 : vector<8x32xf32>
    %92 = arith.mulf %72, %40 : vector<8x32xf32>
    %93 = arith.addf %91, %92 : vector<8x32xf32>
    %94 = arith.mulf %70, %88 : vector<8x32xf32>
    %95 = arith.mulf %72, %43 : vector<8x32xf32>
    %96 = arith.addf %94, %95 : vector<8x32xf32>
    %cst_37 = arith.constant dense<0.000000e+00> : vector<8x128xf32>
    %97 = tpu.matmul %91, %8, %cst_37 {dimension_numbers = #tpu.dot_dimension_numbers<[1], [0], [0], [1], [0, 0, 1, 1], [], []>} : vector<8x32xf32>, vector<32x128xf32>, vector<8x128xf32> -> vector<8x128xf32>
    %cst_38 = arith.constant dense<0.000000e+00> : vector<8x128xf32>
    %98 = tpu.matmul %66, %9, %cst_38 {dimension_numbers = #tpu.dot_dimension_numbers<[1], [0], [0], [1], [0, 0, 1, 1], [], []>} : vector<8x32xf32>, vector<32x128xf32>, vector<8x128xf32> -> vector<8x128xf32>
    %99 = arith.addf %97, %98 : vector<8x128xf32>
    %100 = arith.addf %99, %12 : vector<8x128xf32>
    %101 = arith.negf %100 : vector<8x128xf32>
    %102 = math.exp %101 : vector<8x128xf32>
    %cst_39 = arith.constant 1.000000e+00 : f32
    %103 = vector.broadcast %cst_39 : f32 to vector<8x128xf32>
    %104 = arith.addf %103, %102 : vector<8x128xf32>
    %105 = arith.divf %103, %104 : vector<8x128xf32>
    %106 = vector.extract_strided_slice %105 {offsets = [0, 0], sizes = [8, 32], strides = [1, 1]} : vector<8x128xf32> to vector<8x32xf32>
    %107 = vector.extract_strided_slice %105 {offsets = [0, 32], sizes = [8, 32], strides = [1, 1]} : vector<8x128xf32> to vector<8x32xf32>
    %108 = vector.extract_strided_slice %105 {offsets = [0, 96], sizes = [8, 32], strides = [1, 1]} : vector<8x128xf32> to vector<8x32xf32>
    %109 = vector.extract_strided_slice %100 {offsets = [0, 64], sizes = [8, 32], strides = [1, 1]} : vector<8x128xf32> to vector<8x32xf32>
    %110 = math.tanh %109 : vector<8x32xf32>
    %111 = arith.mulf %107, %69 : vector<8x32xf32>
    %112 = arith.mulf %106, %110 : vector<8x32xf32>
    %113 = arith.addf %111, %112 : vector<8x32xf32>
    %114 = math.tanh %113 : vector<8x32xf32>
    %115 = arith.mulf %108, %114 : vector<8x32xf32>
    %116 = arith.mulf %70, %115 : vector<8x32xf32>
    %c8_40 = arith.constant 8 : index
    %c0_41 = arith.constant 0 : index
    %117 = vector.load %arg13[%c8_40, %c0_41] : memref<96x32xf32, #tpu.memory_space<vmem>>, vector<8x32xf32>
    tpu.vector_store %arg13[%c8_40, %c0_41], %116 {strides = array<i32>} : memref<96x32xf32, #tpu.memory_space<vmem>>, vector<8x32xf32>,
    %118 = arith.mulf %72, %66 : vector<8x32xf32>
    %119 = arith.addf %116, %118 : vector<8x32xf32>
    %120 = arith.mulf %70, %113 : vector<8x32xf32>
    %121 = arith.mulf %72, %69 : vector<8x32xf32>
    %122 = arith.addf %120, %121 : vector<8x32xf32>
    %c16 = arith.constant 16 : index
    %c0_42 = arith.constant 0 : index
    %123 = vector.load %arg1[%c16, %c0_42] : memref<96x32xf32, #tpu.memory_space<vmem>>, vector<8x32xf32>
    %cst_43 = arith.constant 1.000000e+00 : f32
    %124 = vector.broadcast %cst_43 : f32 to vector<8x32xf32>
    %125 = arith.subf %124, %123 : vector<8x32xf32>
    %c16_44 = arith.constant 16 : index
    %c0_45 = arith.constant 0 : index
    %126 = vector.load %arg12[%c16_44, %c0_45] : memref<96x128xf32, #tpu.memory_space<vmem>>, vector<8x128xf32>
    %cst_46 = arith.constant dense<0.000000e+00> : vector<8x128xf32>
    %127 = tpu.matmul %93, %7, %cst_46 {dimension_numbers = #tpu.dot_dimension_numbers<[1], [0], [0], [1], [0, 0, 1, 1], [], []>} : vector<8x32xf32>, vector<32x128xf32>, vector<8x128xf32> -> vector<8x128xf32>
    %128 = arith.addf %126, %127 : vector<8x128xf32>
    %129 = arith.negf %128 : vector<8x128xf32>
    %130 = math.exp %129 : vector<8x128xf32>
    %cst_47 = arith.constant 1.000000e+00 : f32
    %131 = vector.broadcast %cst_47 : f32 to vector<8x128xf32>
    %132 = arith.addf %131, %130 : vector<8x128xf32>
    %133 = arith.divf %131, %132 : vector<8x128xf32>
    %134 = vector.extract_strided_slice %133 {offsets = [0, 0], sizes = [8, 32], strides = [1, 1]} : vector<8x128xf32> to vector<8x32xf32>
    %135 = vector.extract_strided_slice %133 {offsets = [0, 32], sizes = [8, 32], strides = [1, 1]} : vector<8x128xf32> to vector<8x32xf32>
    %136 = vector.extract_strided_slice %133 {offsets = [0, 96], sizes = [8, 32], strides = [1, 1]} : vector<8x128xf32> to vector<8x32xf32>
    %137 = vector.extract_strided_slice %128 {offsets = [0, 64], sizes = [8, 32], strides = [1, 1]} : vector<8x128xf32> to vector<8x32xf32>
    %138 = math.tanh %137 : vector<8x32xf32>
    %139 = arith.mulf %135, %96 : vector<8x32xf32>
    %140 = arith.mulf %134, %138 : vector<8x32xf32>
    %141 = arith.addf %139, %140 : vector<8x32xf32>
    %142 = math.tanh %141 : vector<8x32xf32>
    %143 = arith.mulf %136, %142 : vector<8x32xf32>
    %144 = arith.mulf %123, %143 : vector<8x32xf32>
    %145 = arith.mulf %125, %93 : vector<8x32xf32>
    %146 = arith.addf %144, %145 : vector<8x32xf32>
    %147 = arith.mulf %123, %141 : vector<8x32xf32>
    %148 = arith.mulf %125, %96 : vector<8x32xf32>
    %149 = arith.addf %147, %148 : vector<8x32xf32>
    %cst_48 = arith.constant dense<0.000000e+00> : vector<8x128xf32>
    %150 = tpu.matmul %144, %8, %cst_48 {dimension_numbers = #tpu.dot_dimension_numbers<[1], [0], [0], [1], [0, 0, 1, 1], [], []>} : vector<8x32xf32>, vector<32x128xf32>, vector<8x128xf32> -> vector<8x128xf32>
    %cst_49 = arith.constant dense<0.000000e+00> : vector<8x128xf32>
    %151 = tpu.matmul %119, %9, %cst_49 {dimension_numbers = #tpu.dot_dimension_numbers<[1], [0], [0], [1], [0, 0, 1, 1], [], []>} : vector<8x32xf32>, vector<32x128xf32>, vector<8x128xf32> -> vector<8x128xf32>
    %152 = arith.addf %150, %151 : vector<8x128xf32>
    %153 = arith.addf %152, %12 : vector<8x128xf32>
    %154 = arith.negf %153 : vector<8x128xf32>
    %155 = math.exp %154 : vector<8x128xf32>
    %cst_50 = arith.constant 1.000000e+00 : f32
    %156 = vector.broadcast %cst_50 : f32 to vector<8x128xf32>
    %157 = arith.addf %156, %155 : vector<8x128xf32>
    %158 = arith.divf %156, %157 : vector<8x128xf32>
    %159 = vector.extract_strided_slice %158 {offsets = [0, 0], sizes = [8, 32], strides = [1, 1]} : vector<8x128xf32> to vector<8x32xf32>
    %160 = vector.extract_strided_slice %158 {offsets = [0, 32], sizes = [8, 32], strides = [1, 1]} : vector<8x128xf32> to vector<8x32xf32>
    %161 = vector.extract_strided_slice %158 {offsets = [0, 96], sizes = [8, 32], strides = [1, 1]} : vector<8x128xf32> to vector<8x32xf32>
    %162 = vector.extract_strided_slice %153 {offsets = [0, 64], sizes = [8, 32], strides = [1, 1]} : vector<8x128xf32> to vector<8x32xf32>
    %163 = math.tanh %162 : vector<8x32xf32>
    %164 = arith.mulf %160, %122 : vector<8x32xf32>
    %165 = arith.mulf %159, %163 : vector<8x32xf32>
    %166 = arith.addf %164, %165 : vector<8x32xf32>
    %167 = math.tanh %166 : vector<8x32xf32>
    %168 = arith.mulf %161, %167 : vector<8x32xf32>
    %169 = arith.mulf %123, %168 : vector<8x32xf32>
    %c16_51 = arith.constant 16 : index
    %c0_52 = arith.constant 0 : index
    %170 = vector.load %arg13[%c16_51, %c0_52] : memref<96x32xf32, #tpu.memory_space<vmem>>, vector<8x32xf32>
    tpu.vector_store %arg13[%c16_51, %c0_52], %169 {strides = array<i32>} : memref<96x32xf32, #tpu.memory_space<vmem>>, vector<8x32xf32>,
    %171 = arith.mulf %125, %119 : vector<8x32xf32>
    %172 = arith.addf %169, %171 : vector<8x32xf32>
    %173 = arith.mulf %123, %166 : vector<8x32xf32>
    %174 = arith.mulf %125, %122 : vector<8x32xf32>
    %175 = arith.addf %173, %174 : vector<8x32xf32>
    %c24 = arith.constant 24 : index
    %c0_53 = arith.constant 0 : index
    %176 = vector.load %arg1[%c24, %c0_53] : memref<96x32xf32, #tpu.memory_space<vmem>>, vector<8x32xf32>
    %cst_54 = arith.constant 1.000000e+00 : f32
    %177 = vector.broadcast %cst_54 : f32 to vector<8x32xf32>
    %178 = arith.subf %177, %176 : vector<8x32xf32>
    %c24_55 = arith.constant 24 : index
    %c0_56 = arith.constant 0 : index
    %179 = vector.load %arg12[%c24_55, %c0_56] : memref<96x128xf32, #tpu.memory_space<vmem>>, vector<8x128xf32>
    %cst_57 = arith.constant dense<0.000000e+00> : vector<8x128xf32>
    %180 = tpu.matmul %146, %7, %cst_57 {dimension_numbers = #tpu.dot_dimension_numbers<[1], [0], [0], [1], [0, 0, 1, 1], [], []>} : vector<8x32xf32>, vector<32x128xf32>, vector<8x128xf32> -> vector<8x128xf32>
    %181 = arith.addf %179, %180 : vector<8x128xf32>
    %182 = arith.negf %181 : vector<8x128xf32>
    %183 = math.exp %182 : vector<8x128xf32>
    %cst_58 = arith.constant 1.000000e+00 : f32
    %184 = vector.broadcast %cst_58 : f32 to vector<8x128xf32>
    %185 = arith.addf %184, %183 : vector<8x128xf32>
    %186 = arith.divf %184, %185 : vector<8x128xf32>
    %187 = vector.extract_strided_slice %186 {offsets = [0, 0], sizes = [8, 32], strides = [1, 1]} : vector<8x128xf32> to vector<8x32xf32>
    %188 = vector.extract_strided_slice %186 {offsets = [0, 32], sizes = [8, 32], strides = [1, 1]} : vector<8x128xf32> to vector<8x32xf32>
    %189 = vector.extract_strided_slice %186 {offsets = [0, 96], sizes = [8, 32], strides = [1, 1]} : vector<8x128xf32> to vector<8x32xf32>
    %190 = vector.extract_strided_slice %181 {offsets = [0, 64], sizes = [8, 32], strides = [1, 1]} : vector<8x128xf32> to vector<8x32xf32>
    %191 = math.tanh %190 : vector<8x32xf32>
    %192 = arith.mulf %188, %149 : vector<8x32xf32>
    %193 = arith.mulf %187, %191 : vector<8x32xf32>
    %194 = arith.addf %192, %193 : vector<8x32xf32>
    %195 = math.tanh %194 : vector<8x32xf32>
    %196 = arith.mulf %189, %195 : vector<8x32xf32>
    %197 = arith.mulf %176, %196 : vector<8x32xf32>
    %198 = arith.mulf %178, %146 : vector<8x32xf32>
    %199 = arith.addf %197, %198 : vector<8x32xf32>
    %200 = arith.mulf %176, %194 : vector<8x32xf32>
    %201 = arith.mulf %178, %149 : vector<8x32xf32>
    %202 = arith.addf %200, %201 : vector<8x32xf32>
    %cst_59 = arith.constant dense<0.000000e+00> : vector<8x128xf32>
    %203 = tpu.matmul %197, %8, %cst_59 {dimension_numbers = #tpu.dot_dimension_numbers<[1], [0], [0], [1], [0, 0, 1, 1], [], []>} : vector<8x32xf32>, vector<32x128xf32>, vector<8x128xf32> -> vector<8x128xf32>
    %cst_60 = arith.constant dense<0.000000e+00> : vector<8x128xf32>
    %204 = tpu.matmul %172, %9, %cst_60 {dimension_numbers = #tpu.dot_dimension_numbers<[1], [0], [0], [1], [0, 0, 1, 1], [], []>} : vector<8x32xf32>, vector<32x128xf32>, vector<8x128xf32> -> vector<8x128xf32>
    %205 = arith.addf %203, %204 : vector<8x128xf32>
    %206 = arith.addf %205, %12 : vector<8x128xf32>
    %207 = arith.negf %206 : vector<8x128xf32>
    %208 = math.exp %207 : vector<8x128xf32>
    %cst_61 = arith.constant 1.000000e+00 : f32
    %209 = vector.broadcast %cst_61 : f32 to vector<8x128xf32>
    %210 = arith.addf %209, %208 : vector<8x128xf32>
    %211 = arith.divf %209, %210 : vector<8x128xf32>
    %212 = vector.extract_strided_slice %211 {offsets = [0, 0], sizes = [8, 32], strides = [1, 1]} : vector<8x128xf32> to vector<8x32xf32>
    %213 = vector.extract_strided_slice %211 {offsets = [0, 32], sizes = [8, 32], strides = [1, 1]} : vector<8x128xf32> to vector<8x32xf32>
    %214 = vector.extract_strided_slice %211 {offsets = [0, 96], sizes = [8, 32], strides = [1, 1]} : vector<8x128xf32> to vector<8x32xf32>
    %215 = vector.extract_strided_slice %206 {offsets = [0, 64], sizes = [8, 32], strides = [1, 1]} : vector<8x128xf32> to vector<8x32xf32>
    %216 = math.tanh %215 : vector<8x32xf32>
    %217 = arith.mulf %213, %175 : vector<8x32xf32>
    %218 = arith.mulf %212, %216 : vector<8x32xf32>
    %219 = arith.addf %217, %218 : vector<8x32xf32>
    %220 = math.tanh %219 : vector<8x32xf32>
    %221 = arith.mulf %214, %220 : vector<8x32xf32>
    %222 = arith.mulf %176, %221 : vector<8x32xf32>
    %c24_62 = arith.constant 24 : index
    %c0_63 = arith.constant 0 : index
    %223 = vector.load %arg13[%c24_62, %c0_63] : memref<96x32xf32, #tpu.memory_space<vmem>>, vector<8x32xf32>
    tpu.vector_store %arg13[%c24_62, %c0_63], %222 {strides = array<i32>} : memref<96x32xf32, #tpu.memory_space<vmem>>, vector<8x32xf32>,
    %224 = arith.mulf %178, %172 : vector<8x32xf32>
    %225 = arith.addf %222, %224 : vector<8x32xf32>
    %226 = arith.mulf %176, %219 : vector<8x32xf32>
    %227 = arith.mulf %178, %175 : vector<8x32xf32>
    %228 = arith.addf %226, %227 : vector<8x32xf32>
    %c32 = arith.constant 32 : index
    %c0_64 = arith.constant 0 : index
    %229 = vector.load %arg1[%c32, %c0_64] : memref<96x32xf32, #tpu.memory_space<vmem>>, vector<8x32xf32>
    %cst_65 = arith.constant 1.000000e+00 : f32
    %230 = vector.broadcast %cst_65 : f32 to vector<8x32xf32>
    %231 = arith.subf %230, %229 : vector<8x32xf32>
    %c32_66 = arith.constant 32 : index
    %c0_67 = arith.constant 0 : index
    %232 = vector.load %arg12[%c32_66, %c0_67] : memref<96x128xf32, #tpu.memory_space<vmem>>, vector<8x128xf32>
    %cst_68 = arith.constant dense<0.000000e+00> : vector<8x128xf32>
    %233 = tpu.matmul %199, %7, %cst_68 {dimension_numbers = #tpu.dot_dimension_numbers<[1], [0], [0], [1], [0, 0, 1, 1], [], []>} : vector<8x32xf32>, vector<32x128xf32>, vector<8x128xf32> -> vector<8x128xf32>
    %234 = arith.addf %232, %233 : vector<8x128xf32>
    %235 = arith.negf %234 : vector<8x128xf32>
    %236 = math.exp %235 : vector<8x128xf32>
    %cst_69 = arith.constant 1.000000e+00 : f32
    %237 = vector.broadcast %cst_69 : f32 to vector<8x128xf32>
    %238 = arith.addf %237, %236 : vector<8x128xf32>
    %239 = arith.divf %237, %238 : vector<8x128xf32>
    %240 = vector.extract_strided_slice %239 {offsets = [0, 0], sizes = [8, 32], strides = [1, 1]} : vector<8x128xf32> to vector<8x32xf32>
    %241 = vector.extract_strided_slice %239 {offsets = [0, 32], sizes = [8, 32], strides = [1, 1]} : vector<8x128xf32> to vector<8x32xf32>
    %242 = vector.extract_strided_slice %239 {offsets = [0, 96], sizes = [8, 32], strides = [1, 1]} : vector<8x128xf32> to vector<8x32xf32>
    %243 = vector.extract_strided_slice %234 {offsets = [0, 64], sizes = [8, 32], strides = [1, 1]} : vector<8x128xf32> to vector<8x32xf32>
    %244 = math.tanh %243 : vector<8x32xf32>
    %245 = arith.mulf %241, %202 : vector<8x32xf32>
    %246 = arith.mulf %240, %244 : vector<8x32xf32>
    %247 = arith.addf %245, %246 : vector<8x32xf32>
    %248 = math.tanh %247 : vector<8x32xf32>
    %249 = arith.mulf %242, %248 : vector<8x32xf32>
    %250 = arith.mulf %229, %249 : vector<8x32xf32>
    %251 = arith.mulf %231, %199 : vector<8x32xf32>
    %252 = arith.addf %250, %251 : vector<8x32xf32>
    %253 = arith.mulf %229, %247 : vector<8x32xf32>
    %254 = arith.mulf %231, %202 : vector<8x32xf32>
    %255 = arith.addf %253, %254 : vector<8x32xf32>
    %cst_70 = arith.constant dense<0.000000e+00> : vector<8x128xf32>
    %256 = tpu.matmul %250, %8, %cst_70 {dimension_numbers = #tpu.dot_dimension_numbers<[1], [0], [0], [1], [0, 0, 1, 1], [], []>} : vector<8x32xf32>, vector<32x128xf32>, vector<8x128xf32> -> vector<8x128xf32>
    %cst_71 = arith.constant dense<0.000000e+00> : vector<8x128xf32>
    %257 = tpu.matmul %225, %9, %cst_71 {dimension_numbers = #tpu.dot_dimension_numbers<[1], [0], [0], [1], [0, 0, 1, 1], [], []>} : vector<8x32xf32>, vector<32x128xf32>, vector<8x128xf32> -> vector<8x128xf32>
    %258 = arith.addf %256, %257 : vector<8x128xf32>
    %259 = arith.addf %258, %12 : vector<8x128xf32>
    %260 = arith.negf %259 : vector<8x128xf32>
    %261 = math.exp %260 : vector<8x128xf32>
    %cst_72 = arith.constant 1.000000e+00 : f32
    %262 = vector.broadcast %cst_72 : f32 to vector<8x128xf32>
    %263 = arith.addf %262, %261 : vector<8x128xf32>
    %264 = arith.divf %262, %263 : vector<8x128xf32>
    %265 = vector.extract_strided_slice %264 {offsets = [0, 0], sizes = [8, 32], strides = [1, 1]} : vector<8x128xf32> to vector<8x32xf32>
    %266 = vector.extract_strided_slice %264 {offsets = [0, 32], sizes = [8, 32], strides = [1, 1]} : vector<8x128xf32> to vector<8x32xf32>
    %267 = vector.extract_strided_slice %264 {offsets = [0, 96], sizes = [8, 32], strides = [1, 1]} : vector<8x128xf32> to vector<8x32xf32>
    %268 = vector.extract_strided_slice %259 {offsets = [0, 64], sizes = [8, 32], strides = [1, 1]} : vector<8x128xf32> to vector<8x32xf32>
    %269 = math.tanh %268 : vector<8x32xf32>
    %270 = arith.mulf %266, %228 : vector<8x32xf32>
    %271 = arith.mulf %265, %269 : vector<8x32xf32>
    %272 = arith.addf %270, %271 : vector<8x32xf32>
    %273 = math.tanh %272 : vector<8x32xf32>
    %274 = arith.mulf %267, %273 : vector<8x32xf32>
    %275 = arith.mulf %229, %274 : vector<8x32xf32>
    %c32_73 = arith.constant 32 : index
    %c0_74 = arith.constant 0 : index
    %276 = vector.load %arg13[%c32_73, %c0_74] : memref<96x32xf32, #tpu.memory_space<vmem>>, vector<8x32xf32>
    tpu.vector_store %arg13[%c32_73, %c0_74], %275 {strides = array<i32>} : memref<96x32xf32, #tpu.memory_space<vmem>>, vector<8x32xf32>,
    %277 = arith.mulf %231, %225 : vector<8x32xf32>
    %278 = arith.addf %275, %277 : vector<8x32xf32>
    %279 = arith.mulf %229, %272 : vector<8x32xf32>
    %280 = arith.mulf %231, %228 : vector<8x32xf32>
    %281 = arith.addf %279, %280 : vector<8x32xf32>
    %c40 = arith.constant 40 : index
    %c0_75 = arith.constant 0 : index
    %282 = vector.load %arg1[%c40, %c0_75] : memref<96x32xf32, #tpu.memory_space<vmem>>, vector<8x32xf32>
    %cst_76 = arith.constant 1.000000e+00 : f32
    %283 = vector.broadcast %cst_76 : f32 to vector<8x32xf32>
    %284 = arith.subf %283, %282 : vector<8x32xf32>
    %c40_77 = arith.constant 40 : index
    %c0_78 = arith.constant 0 : index
    %285 = vector.load %arg12[%c40_77, %c0_78] : memref<96x128xf32, #tpu.memory_space<vmem>>, vector<8x128xf32>
    %cst_79 = arith.constant dense<0.000000e+00> : vector<8x128xf32>
    %286 = tpu.matmul %252, %7, %cst_79 {dimension_numbers = #tpu.dot_dimension_numbers<[1], [0], [0], [1], [0, 0, 1, 1], [], []>} : vector<8x32xf32>, vector<32x128xf32>, vector<8x128xf32> -> vector<8x128xf32>
    %287 = arith.addf %285, %286 : vector<8x128xf32>
    %288 = arith.negf %287 : vector<8x128xf32>
    %289 = math.exp %288 : vector<8x128xf32>
    %cst_80 = arith.constant 1.000000e+00 : f32
    %290 = vector.broadcast %cst_80 : f32 to vector<8x128xf32>
    %291 = arith.addf %290, %289 : vector<8x128xf32>
    %292 = arith.divf %290, %291 : vector<8x128xf32>
    %293 = vector.extract_strided_slice %292 {offsets = [0, 0], sizes = [8, 32], strides = [1, 1]} : vector<8x128xf32> to vector<8x32xf32>
    %294 = vector.extract_strided_slice %292 {offsets = [0, 32], sizes = [8, 32], strides = [1, 1]} : vector<8x128xf32> to vector<8x32xf32>
    %295 = vector.extract_strided_slice %292 {offsets = [0, 96], sizes = [8, 32], strides = [1, 1]} : vector<8x128xf32> to vector<8x32xf32>
    %296 = vector.extract_strided_slice %287 {offsets = [0, 64], sizes = [8, 32], strides = [1, 1]} : vector<8x128xf32> to vector<8x32xf32>
    %297 = math.tanh %296 : vector<8x32xf32>
    %298 = arith.mulf %294, %255 : vector<8x32xf32>
    %299 = arith.mulf %293, %297 : vector<8x32xf32>
    %300 = arith.addf %298, %299 : vector<8x32xf32>
    %301 = math.tanh %300 : vector<8x32xf32>
    %302 = arith.mulf %295, %301 : vector<8x32xf32>
    %303 = arith.mulf %282, %302 : vector<8x32xf32>
    %304 = arith.mulf %284, %252 : vector<8x32xf32>
    %305 = arith.addf %303, %304 : vector<8x32xf32>
    %306 = arith.mulf %282, %300 : vector<8x32xf32>
    %307 = arith.mulf %284, %255 : vector<8x32xf32>
    %308 = arith.addf %306, %307 : vector<8x32xf32>
    %cst_81 = arith.constant dense<0.000000e+00> : vector<8x128xf32>
    %309 = tpu.matmul %303, %8, %cst_81 {dimension_numbers = #tpu.dot_dimension_numbers<[1], [0], [0], [1], [0, 0, 1, 1], [], []>} : vector<8x32xf32>, vector<32x128xf32>, vector<8x128xf32> -> vector<8x128xf32>
    %cst_82 = arith.constant dense<0.000000e+00> : vector<8x128xf32>
    %310 = tpu.matmul %278, %9, %cst_82 {dimension_numbers = #tpu.dot_dimension_numbers<[1], [0], [0], [1], [0, 0, 1, 1], [], []>} : vector<8x32xf32>, vector<32x128xf32>, vector<8x128xf32> -> vector<8x128xf32>
    %311 = arith.addf %309, %310 : vector<8x128xf32>
    %312 = arith.addf %311, %12 : vector<8x128xf32>
    %313 = arith.negf %312 : vector<8x128xf32>
    %314 = math.exp %313 : vector<8x128xf32>
    %cst_83 = arith.constant 1.000000e+00 : f32
    %315 = vector.broadcast %cst_83 : f32 to vector<8x128xf32>
    %316 = arith.addf %315, %314 : vector<8x128xf32>
    %317 = arith.divf %315, %316 : vector<8x128xf32>
    %318 = vector.extract_strided_slice %317 {offsets = [0, 0], sizes = [8, 32], strides = [1, 1]} : vector<8x128xf32> to vector<8x32xf32>
    %319 = vector.extract_strided_slice %317 {offsets = [0, 32], sizes = [8, 32], strides = [1, 1]} : vector<8x128xf32> to vector<8x32xf32>
    %320 = vector.extract_strided_slice %317 {offsets = [0, 96], sizes = [8, 32], strides = [1, 1]} : vector<8x128xf32> to vector<8x32xf32>
    %321 = vector.extract_strided_slice %312 {offsets = [0, 64], sizes = [8, 32], strides = [1, 1]} : vector<8x128xf32> to vector<8x32xf32>
    %322 = math.tanh %321 : vector<8x32xf32>
    %323 = arith.mulf %319, %281 : vector<8x32xf32>
    %324 = arith.mulf %318, %322 : vector<8x32xf32>
    %325 = arith.addf %323, %324 : vector<8x32xf32>
    %326 = math.tanh %325 : vector<8x32xf32>
    %327 = arith.mulf %320, %326 : vector<8x32xf32>
    %328 = arith.mulf %282, %327 : vector<8x32xf32>
    %c40_84 = arith.constant 40 : index
    %c0_85 = arith.constant 0 : index
    %329 = vector.load %arg13[%c40_84, %c0_85] : memref<96x32xf32, #tpu.memory_space<vmem>>, vector<8x32xf32>
    tpu.vector_store %arg13[%c40_84, %c0_85], %328 {strides = array<i32>} : memref<96x32xf32, #tpu.memory_space<vmem>>, vector<8x32xf32>,
    %330 = arith.mulf %284, %278 : vector<8x32xf32>
    %331 = arith.addf %328, %330 : vector<8x32xf32>
    %332 = arith.mulf %282, %325 : vector<8x32xf32>
    %333 = arith.mulf %284, %281 : vector<8x32xf32>
    %334 = arith.addf %332, %333 : vector<8x32xf32>
    %c48 = arith.constant 48 : index
    %c0_86 = arith.constant 0 : index
    %335 = vector.load %arg1[%c48, %c0_86] : memref<96x32xf32, #tpu.memory_space<vmem>>, vector<8x32xf32>
    %cst_87 = arith.constant 1.000000e+00 : f32
    %336 = vector.broadcast %cst_87 : f32 to vector<8x32xf32>
    %337 = arith.subf %336, %335 : vector<8x32xf32>
    %c48_88 = arith.constant 48 : index
    %c0_89 = arith.constant 0 : index
    %338 = vector.load %arg12[%c48_88, %c0_89] : memref<96x128xf32, #tpu.memory_space<vmem>>, vector<8x128xf32>
    %cst_90 = arith.constant dense<0.000000e+00> : vector<8x128xf32>
    %339 = tpu.matmul %305, %7, %cst_90 {dimension_numbers = #tpu.dot_dimension_numbers<[1], [0], [0], [1], [0, 0, 1, 1], [], []>} : vector<8x32xf32>, vector<32x128xf32>, vector<8x128xf32> -> vector<8x128xf32>
    %340 = arith.addf %338, %339 : vector<8x128xf32>
    %341 = arith.negf %340 : vector<8x128xf32>
    %342 = math.exp %341 : vector<8x128xf32>
    %cst_91 = arith.constant 1.000000e+00 : f32
    %343 = vector.broadcast %cst_91 : f32 to vector<8x128xf32>
    %344 = arith.addf %343, %342 : vector<8x128xf32>
    %345 = arith.divf %343, %344 : vector<8x128xf32>
    %346 = vector.extract_strided_slice %345 {offsets = [0, 0], sizes = [8, 32], strides = [1, 1]} : vector<8x128xf32> to vector<8x32xf32>
    %347 = vector.extract_strided_slice %345 {offsets = [0, 32], sizes = [8, 32], strides = [1, 1]} : vector<8x128xf32> to vector<8x32xf32>
    %348 = vector.extract_strided_slice %345 {offsets = [0, 96], sizes = [8, 32], strides = [1, 1]} : vector<8x128xf32> to vector<8x32xf32>
    %349 = vector.extract_strided_slice %340 {offsets = [0, 64], sizes = [8, 32], strides = [1, 1]} : vector<8x128xf32> to vector<8x32xf32>
    %350 = math.tanh %349 : vector<8x32xf32>
    %351 = arith.mulf %347, %308 : vector<8x32xf32>
    %352 = arith.mulf %346, %350 : vector<8x32xf32>
    %353 = arith.addf %351, %352 : vector<8x32xf32>
    %354 = math.tanh %353 : vector<8x32xf32>
    %355 = arith.mulf %348, %354 : vector<8x32xf32>
    %356 = arith.mulf %335, %355 : vector<8x32xf32>
    %357 = arith.mulf %337, %305 : vector<8x32xf32>
    %358 = arith.addf %356, %357 : vector<8x32xf32>
    %359 = arith.mulf %335, %353 : vector<8x32xf32>
    %360 = arith.mulf %337, %308 : vector<8x32xf32>
    %361 = arith.addf %359, %360 : vector<8x32xf32>
    %cst_92 = arith.constant dense<0.000000e+00> : vector<8x128xf32>
    %362 = tpu.matmul %356, %8, %cst_92 {dimension_numbers = #tpu.dot_dimension_numbers<[1], [0], [0], [1], [0, 0, 1, 1], [], []>} : vector<8x32xf32>, vector<32x128xf32>, vector<8x128xf32> -> vector<8x128xf32>
    %cst_93 = arith.constant dense<0.000000e+00> : vector<8x128xf32>
    %363 = tpu.matmul %331, %9, %cst_93 {dimension_numbers = #tpu.dot_dimension_numbers<[1], [0], [0], [1], [0, 0, 1, 1], [], []>} : vector<8x32xf32>, vector<32x128xf32>, vector<8x128xf32> -> vector<8x128xf32>
    %364 = arith.addf %362, %363 : vector<8x128xf32>
    %365 = arith.addf %364, %12 : vector<8x128xf32>
    %366 = arith.negf %365 : vector<8x128xf32>
    %367 = math.exp %366 : vector<8x128xf32>
    %cst_94 = arith.constant 1.000000e+00 : f32
    %368 = vector.broadcast %cst_94 : f32 to vector<8x128xf32>
    %369 = arith.addf %368, %367 : vector<8x128xf32>
    %370 = arith.divf %368, %369 : vector<8x128xf32>
    %371 = vector.extract_strided_slice %370 {offsets = [0, 0], sizes = [8, 32], strides = [1, 1]} : vector<8x128xf32> to vector<8x32xf32>
    %372 = vector.extract_strided_slice %370 {offsets = [0, 32], sizes = [8, 32], strides = [1, 1]} : vector<8x128xf32> to vector<8x32xf32>
    %373 = vector.extract_strided_slice %370 {offsets = [0, 96], sizes = [8, 32], strides = [1, 1]} : vector<8x128xf32> to vector<8x32xf32>
    %374 = vector.extract_strided_slice %365 {offsets = [0, 64], sizes = [8, 32], strides = [1, 1]} : vector<8x128xf32> to vector<8x32xf32>
    %375 = math.tanh %374 : vector<8x32xf32>
    %376 = arith.mulf %372, %334 : vector<8x32xf32>
    %377 = arith.mulf %371, %375 : vector<8x32xf32>
    %378 = arith.addf %376, %377 : vector<8x32xf32>
    %379 = math.tanh %378 : vector<8x32xf32>
    %380 = arith.mulf %373, %379 : vector<8x32xf32>
    %381 = arith.mulf %335, %380 : vector<8x32xf32>
    %c48_95 = arith.constant 48 : index
    %c0_96 = arith.constant 0 : index
    %382 = vector.load %arg13[%c48_95, %c0_96] : memref<96x32xf32, #tpu.memory_space<vmem>>, vector<8x32xf32>
    tpu.vector_store %arg13[%c48_95, %c0_96], %381 {strides = array<i32>} : memref<96x32xf32, #tpu.memory_space<vmem>>, vector<8x32xf32>,
    %383 = arith.mulf %337, %331 : vector<8x32xf32>
    %384 = arith.addf %381, %383 : vector<8x32xf32>
    %385 = arith.mulf %335, %378 : vector<8x32xf32>
    %386 = arith.mulf %337, %334 : vector<8x32xf32>
    %387 = arith.addf %385, %386 : vector<8x32xf32>
    %c56 = arith.constant 56 : index
    %c0_97 = arith.constant 0 : index
    %388 = vector.load %arg1[%c56, %c0_97] : memref<96x32xf32, #tpu.memory_space<vmem>>, vector<8x32xf32>
    %cst_98 = arith.constant 1.000000e+00 : f32
    %389 = vector.broadcast %cst_98 : f32 to vector<8x32xf32>
    %390 = arith.subf %389, %388 : vector<8x32xf32>
    %c56_99 = arith.constant 56 : index
    %c0_100 = arith.constant 0 : index
    %391 = vector.load %arg12[%c56_99, %c0_100] : memref<96x128xf32, #tpu.memory_space<vmem>>, vector<8x128xf32>
    %cst_101 = arith.constant dense<0.000000e+00> : vector<8x128xf32>
    %392 = tpu.matmul %358, %7, %cst_101 {dimension_numbers = #tpu.dot_dimension_numbers<[1], [0], [0], [1], [0, 0, 1, 1], [], []>} : vector<8x32xf32>, vector<32x128xf32>, vector<8x128xf32> -> vector<8x128xf32>
    %393 = arith.addf %391, %392 : vector<8x128xf32>
    %394 = arith.negf %393 : vector<8x128xf32>
    %395 = math.exp %394 : vector<8x128xf32>
    %cst_102 = arith.constant 1.000000e+00 : f32
    %396 = vector.broadcast %cst_102 : f32 to vector<8x128xf32>
    %397 = arith.addf %396, %395 : vector<8x128xf32>
    %398 = arith.divf %396, %397 : vector<8x128xf32>
    %399 = vector.extract_strided_slice %398 {offsets = [0, 0], sizes = [8, 32], strides = [1, 1]} : vector<8x128xf32> to vector<8x32xf32>
    %400 = vector.extract_strided_slice %398 {offsets = [0, 32], sizes = [8, 32], strides = [1, 1]} : vector<8x128xf32> to vector<8x32xf32>
    %401 = vector.extract_strided_slice %398 {offsets = [0, 96], sizes = [8, 32], strides = [1, 1]} : vector<8x128xf32> to vector<8x32xf32>
    %402 = vector.extract_strided_slice %393 {offsets = [0, 64], sizes = [8, 32], strides = [1, 1]} : vector<8x128xf32> to vector<8x32xf32>
    %403 = math.tanh %402 : vector<8x32xf32>
    %404 = arith.mulf %400, %361 : vector<8x32xf32>
    %405 = arith.mulf %399, %403 : vector<8x32xf32>
    %406 = arith.addf %404, %405 : vector<8x32xf32>
    %407 = math.tanh %406 : vector<8x32xf32>
    %408 = arith.mulf %401, %407 : vector<8x32xf32>
    %409 = arith.mulf %388, %408 : vector<8x32xf32>
    %410 = arith.mulf %390, %358 : vector<8x32xf32>
    %411 = arith.addf %409, %410 : vector<8x32xf32>
    %412 = arith.mulf %388, %406 : vector<8x32xf32>
    %413 = arith.mulf %390, %361 : vector<8x32xf32>
    %414 = arith.addf %412, %413 : vector<8x32xf32>
    %cst_103 = arith.constant dense<0.000000e+00> : vector<8x128xf32>
    %415 = tpu.matmul %409, %8, %cst_103 {dimension_numbers = #tpu.dot_dimension_numbers<[1], [0], [0], [1], [0, 0, 1, 1], [], []>} : vector<8x32xf32>, vector<32x128xf32>, vector<8x128xf32> -> vector<8x128xf32>
    %cst_104 = arith.constant dense<0.000000e+00> : vector<8x128xf32>
    %416 = tpu.matmul %384, %9, %cst_104 {dimension_numbers = #tpu.dot_dimension_numbers<[1], [0], [0], [1], [0, 0, 1, 1], [], []>} : vector<8x32xf32>, vector<32x128xf32>, vector<8x128xf32> -> vector<8x128xf32>
    %417 = arith.addf %415, %416 : vector<8x128xf32>
    %418 = arith.addf %417, %12 : vector<8x128xf32>
    %419 = arith.negf %418 : vector<8x128xf32>
    %420 = math.exp %419 : vector<8x128xf32>
    %cst_105 = arith.constant 1.000000e+00 : f32
    %421 = vector.broadcast %cst_105 : f32 to vector<8x128xf32>
    %422 = arith.addf %421, %420 : vector<8x128xf32>
    %423 = arith.divf %421, %422 : vector<8x128xf32>
    %424 = vector.extract_strided_slice %423 {offsets = [0, 0], sizes = [8, 32], strides = [1, 1]} : vector<8x128xf32> to vector<8x32xf32>
    %425 = vector.extract_strided_slice %423 {offsets = [0, 32], sizes = [8, 32], strides = [1, 1]} : vector<8x128xf32> to vector<8x32xf32>
    %426 = vector.extract_strided_slice %423 {offsets = [0, 96], sizes = [8, 32], strides = [1, 1]} : vector<8x128xf32> to vector<8x32xf32>
    %427 = vector.extract_strided_slice %418 {offsets = [0, 64], sizes = [8, 32], strides = [1, 1]} : vector<8x128xf32> to vector<8x32xf32>
    %428 = math.tanh %427 : vector<8x32xf32>
    %429 = arith.mulf %425, %387 : vector<8x32xf32>
    %430 = arith.mulf %424, %428 : vector<8x32xf32>
    %431 = arith.addf %429, %430 : vector<8x32xf32>
    %432 = math.tanh %431 : vector<8x32xf32>
    %433 = arith.mulf %426, %432 : vector<8x32xf32>
    %434 = arith.mulf %388, %433 : vector<8x32xf32>
    %c56_106 = arith.constant 56 : index
    %c0_107 = arith.constant 0 : index
    %435 = vector.load %arg13[%c56_106, %c0_107] : memref<96x32xf32, #tpu.memory_space<vmem>>, vector<8x32xf32>
    tpu.vector_store %arg13[%c56_106, %c0_107], %434 {strides = array<i32>} : memref<96x32xf32, #tpu.memory_space<vmem>>, vector<8x32xf32>,
    %436 = arith.mulf %390, %384 : vector<8x32xf32>
    %437 = arith.addf %434, %436 : vector<8x32xf32>
    %438 = arith.mulf %388, %431 : vector<8x32xf32>
    %439 = arith.mulf %390, %387 : vector<8x32xf32>
    %440 = arith.addf %438, %439 : vector<8x32xf32>
    %c64 = arith.constant 64 : index
    %c0_108 = arith.constant 0 : index
    %441 = vector.load %arg1[%c64, %c0_108] : memref<96x32xf32, #tpu.memory_space<vmem>>, vector<8x32xf32>
    %cst_109 = arith.constant 1.000000e+00 : f32
    %442 = vector.broadcast %cst_109 : f32 to vector<8x32xf32>
    %443 = arith.subf %442, %441 : vector<8x32xf32>
    %c64_110 = arith.constant 64 : index
    %c0_111 = arith.constant 0 : index
    %444 = vector.load %arg12[%c64_110, %c0_111] : memref<96x128xf32, #tpu.memory_space<vmem>>, vector<8x128xf32>
    %cst_112 = arith.constant dense<0.000000e+00> : vector<8x128xf32>
    %445 = tpu.matmul %411, %7, %cst_112 {dimension_numbers = #tpu.dot_dimension_numbers<[1], [0], [0], [1], [0, 0, 1, 1], [], []>} : vector<8x32xf32>, vector<32x128xf32>, vector<8x128xf32> -> vector<8x128xf32>
    %446 = arith.addf %444, %445 : vector<8x128xf32>
    %447 = arith.negf %446 : vector<8x128xf32>
    %448 = math.exp %447 : vector<8x128xf32>
    %cst_113 = arith.constant 1.000000e+00 : f32
    %449 = vector.broadcast %cst_113 : f32 to vector<8x128xf32>
    %450 = arith.addf %449, %448 : vector<8x128xf32>
    %451 = arith.divf %449, %450 : vector<8x128xf32>
    %452 = vector.extract_strided_slice %451 {offsets = [0, 0], sizes = [8, 32], strides = [1, 1]} : vector<8x128xf32> to vector<8x32xf32>
    %453 = vector.extract_strided_slice %451 {offsets = [0, 32], sizes = [8, 32], strides = [1, 1]} : vector<8x128xf32> to vector<8x32xf32>
    %454 = vector.extract_strided_slice %451 {offsets = [0, 96], sizes = [8, 32], strides = [1, 1]} : vector<8x128xf32> to vector<8x32xf32>
    %455 = vector.extract_strided_slice %446 {offsets = [0, 64], sizes = [8, 32], strides = [1, 1]} : vector<8x128xf32> to vector<8x32xf32>
    %456 = math.tanh %455 : vector<8x32xf32>
    %457 = arith.mulf %453, %414 : vector<8x32xf32>
    %458 = arith.mulf %452, %456 : vector<8x32xf32>
    %459 = arith.addf %457, %458 : vector<8x32xf32>
    %460 = math.tanh %459 : vector<8x32xf32>
    %461 = arith.mulf %454, %460 : vector<8x32xf32>
    %462 = arith.mulf %441, %461 : vector<8x32xf32>
    %463 = arith.mulf %443, %411 : vector<8x32xf32>
    %464 = arith.addf %462, %463 : vector<8x32xf32>
    %465 = arith.mulf %441, %459 : vector<8x32xf32>
    %466 = arith.mulf %443, %414 : vector<8x32xf32>
    %467 = arith.addf %465, %466 : vector<8x32xf32>
    %cst_114 = arith.constant dense<0.000000e+00> : vector<8x128xf32>
    %468 = tpu.matmul %462, %8, %cst_114 {dimension_numbers = #tpu.dot_dimension_numbers<[1], [0], [0], [1], [0, 0, 1, 1], [], []>} : vector<8x32xf32>, vector<32x128xf32>, vector<8x128xf32> -> vector<8x128xf32>
    %cst_115 = arith.constant dense<0.000000e+00> : vector<8x128xf32>
    %469 = tpu.matmul %437, %9, %cst_115 {dimension_numbers = #tpu.dot_dimension_numbers<[1], [0], [0], [1], [0, 0, 1, 1], [], []>} : vector<8x32xf32>, vector<32x128xf32>, vector<8x128xf32> -> vector<8x128xf32>
    %470 = arith.addf %468, %469 : vector<8x128xf32>
    %471 = arith.addf %470, %12 : vector<8x128xf32>
    %472 = arith.negf %471 : vector<8x128xf32>
    %473 = math.exp %472 : vector<8x128xf32>
    %cst_116 = arith.constant 1.000000e+00 : f32
    %474 = vector.broadcast %cst_116 : f32 to vector<8x128xf32>
    %475 = arith.addf %474, %473 : vector<8x128xf32>
    %476 = arith.divf %474, %475 : vector<8x128xf32>
    %477 = vector.extract_strided_slice %476 {offsets = [0, 0], sizes = [8, 32], strides = [1, 1]} : vector<8x128xf32> to vector<8x32xf32>
    %478 = vector.extract_strided_slice %476 {offsets = [0, 32], sizes = [8, 32], strides = [1, 1]} : vector<8x128xf32> to vector<8x32xf32>
    %479 = vector.extract_strided_slice %476 {offsets = [0, 96], sizes = [8, 32], strides = [1, 1]} : vector<8x128xf32> to vector<8x32xf32>
    %480 = vector.extract_strided_slice %471 {offsets = [0, 64], sizes = [8, 32], strides = [1, 1]} : vector<8x128xf32> to vector<8x32xf32>
    %481 = math.tanh %480 : vector<8x32xf32>
    %482 = arith.mulf %478, %440 : vector<8x32xf32>
    %483 = arith.mulf %477, %481 : vector<8x32xf32>
    %484 = arith.addf %482, %483 : vector<8x32xf32>
    %485 = math.tanh %484 : vector<8x32xf32>
    %486 = arith.mulf %479, %485 : vector<8x32xf32>
    %487 = arith.mulf %441, %486 : vector<8x32xf32>
    %c64_117 = arith.constant 64 : index
    %c0_118 = arith.constant 0 : index
    %488 = vector.load %arg13[%c64_117, %c0_118] : memref<96x32xf32, #tpu.memory_space<vmem>>, vector<8x32xf32>
    tpu.vector_store %arg13[%c64_117, %c0_118], %487 {strides = array<i32>} : memref<96x32xf32, #tpu.memory_space<vmem>>, vector<8x32xf32>,
    %489 = arith.mulf %443, %437 : vector<8x32xf32>
    %490 = arith.addf %487, %489 : vector<8x32xf32>
    %491 = arith.mulf %441, %484 : vector<8x32xf32>
    %492 = arith.mulf %443, %440 : vector<8x32xf32>
    %493 = arith.addf %491, %492 : vector<8x32xf32>
    %c72 = arith.constant 72 : index
    %c0_119 = arith.constant 0 : index
    %494 = vector.load %arg1[%c72, %c0_119] : memref<96x32xf32, #tpu.memory_space<vmem>>, vector<8x32xf32>
    %cst_120 = arith.constant 1.000000e+00 : f32
    %495 = vector.broadcast %cst_120 : f32 to vector<8x32xf32>
    %496 = arith.subf %495, %494 : vector<8x32xf32>
    %c72_121 = arith.constant 72 : index
    %c0_122 = arith.constant 0 : index
    %497 = vector.load %arg12[%c72_121, %c0_122] : memref<96x128xf32, #tpu.memory_space<vmem>>, vector<8x128xf32>
    %cst_123 = arith.constant dense<0.000000e+00> : vector<8x128xf32>
    %498 = tpu.matmul %464, %7, %cst_123 {dimension_numbers = #tpu.dot_dimension_numbers<[1], [0], [0], [1], [0, 0, 1, 1], [], []>} : vector<8x32xf32>, vector<32x128xf32>, vector<8x128xf32> -> vector<8x128xf32>
    %499 = arith.addf %497, %498 : vector<8x128xf32>
    %500 = arith.negf %499 : vector<8x128xf32>
    %501 = math.exp %500 : vector<8x128xf32>
    %cst_124 = arith.constant 1.000000e+00 : f32
    %502 = vector.broadcast %cst_124 : f32 to vector<8x128xf32>
    %503 = arith.addf %502, %501 : vector<8x128xf32>
    %504 = arith.divf %502, %503 : vector<8x128xf32>
    %505 = vector.extract_strided_slice %504 {offsets = [0, 0], sizes = [8, 32], strides = [1, 1]} : vector<8x128xf32> to vector<8x32xf32>
    %506 = vector.extract_strided_slice %504 {offsets = [0, 32], sizes = [8, 32], strides = [1, 1]} : vector<8x128xf32> to vector<8x32xf32>
    %507 = vector.extract_strided_slice %504 {offsets = [0, 96], sizes = [8, 32], strides = [1, 1]} : vector<8x128xf32> to vector<8x32xf32>
    %508 = vector.extract_strided_slice %499 {offsets = [0, 64], sizes = [8, 32], strides = [1, 1]} : vector<8x128xf32> to vector<8x32xf32>
    %509 = math.tanh %508 : vector<8x32xf32>
    %510 = arith.mulf %506, %467 : vector<8x32xf32>
    %511 = arith.mulf %505, %509 : vector<8x32xf32>
    %512 = arith.addf %510, %511 : vector<8x32xf32>
    %513 = math.tanh %512 : vector<8x32xf32>
    %514 = arith.mulf %507, %513 : vector<8x32xf32>
    %515 = arith.mulf %494, %514 : vector<8x32xf32>
    %516 = arith.mulf %496, %464 : vector<8x32xf32>
    %517 = arith.addf %515, %516 : vector<8x32xf32>
    %518 = arith.mulf %494, %512 : vector<8x32xf32>
    %519 = arith.mulf %496, %467 : vector<8x32xf32>
    %520 = arith.addf %518, %519 : vector<8x32xf32>
    %cst_125 = arith.constant dense<0.000000e+00> : vector<8x128xf32>
    %521 = tpu.matmul %515, %8, %cst_125 {dimension_numbers = #tpu.dot_dimension_numbers<[1], [0], [0], [1], [0, 0, 1, 1], [], []>} : vector<8x32xf32>, vector<32x128xf32>, vector<8x128xf32> -> vector<8x128xf32>
    %cst_126 = arith.constant dense<0.000000e+00> : vector<8x128xf32>
    %522 = tpu.matmul %490, %9, %cst_126 {dimension_numbers = #tpu.dot_dimension_numbers<[1], [0], [0], [1], [0, 0, 1, 1], [], []>} : vector<8x32xf32>, vector<32x128xf32>, vector<8x128xf32> -> vector<8x128xf32>
    %523 = arith.addf %521, %522 : vector<8x128xf32>
    %524 = arith.addf %523, %12 : vector<8x128xf32>
    %525 = arith.negf %524 : vector<8x128xf32>
    %526 = math.exp %525 : vector<8x128xf32>
    %cst_127 = arith.constant 1.000000e+00 : f32
    %527 = vector.broadcast %cst_127 : f32 to vector<8x128xf32>
    %528 = arith.addf %527, %526 : vector<8x128xf32>
    %529 = arith.divf %527, %528 : vector<8x128xf32>
    %530 = vector.extract_strided_slice %529 {offsets = [0, 0], sizes = [8, 32], strides = [1, 1]} : vector<8x128xf32> to vector<8x32xf32>
    %531 = vector.extract_strided_slice %529 {offsets = [0, 32], sizes = [8, 32], strides = [1, 1]} : vector<8x128xf32> to vector<8x32xf32>
    %532 = vector.extract_strided_slice %529 {offsets = [0, 96], sizes = [8, 32], strides = [1, 1]} : vector<8x128xf32> to vector<8x32xf32>
    %533 = vector.extract_strided_slice %524 {offsets = [0, 64], sizes = [8, 32], strides = [1, 1]} : vector<8x128xf32> to vector<8x32xf32>
    %534 = math.tanh %533 : vector<8x32xf32>
    %535 = arith.mulf %531, %493 : vector<8x32xf32>
    %536 = arith.mulf %530, %534 : vector<8x32xf32>
    %537 = arith.addf %535, %536 : vector<8x32xf32>
    %538 = math.tanh %537 : vector<8x32xf32>
    %539 = arith.mulf %532, %538 : vector<8x32xf32>
    %540 = arith.mulf %494, %539 : vector<8x32xf32>
    %c72_128 = arith.constant 72 : index
    %c0_129 = arith.constant 0 : index
    %541 = vector.load %arg13[%c72_128, %c0_129] : memref<96x32xf32, #tpu.memory_space<vmem>>, vector<8x32xf32>
    tpu.vector_store %arg13[%c72_128, %c0_129], %540 {strides = array<i32>} : memref<96x32xf32, #tpu.memory_space<vmem>>, vector<8x32xf32>,
    %542 = arith.mulf %496, %490 : vector<8x32xf32>
    %543 = arith.addf %540, %542 : vector<8x32xf32>
    %544 = arith.mulf %494, %537 : vector<8x32xf32>
    %545 = arith.mulf %496, %493 : vector<8x32xf32>
    %546 = arith.addf %544, %545 : vector<8x32xf32>
    %c80 = arith.constant 80 : index
    %c0_130 = arith.constant 0 : index
    %547 = vector.load %arg1[%c80, %c0_130] : memref<96x32xf32, #tpu.memory_space<vmem>>, vector<8x32xf32>
    %cst_131 = arith.constant 1.000000e+00 : f32
    %548 = vector.broadcast %cst_131 : f32 to vector<8x32xf32>
    %549 = arith.subf %548, %547 : vector<8x32xf32>
    %c80_132 = arith.constant 80 : index
    %c0_133 = arith.constant 0 : index
    %550 = vector.load %arg12[%c80_132, %c0_133] : memref<96x128xf32, #tpu.memory_space<vmem>>, vector<8x128xf32>
    %cst_134 = arith.constant dense<0.000000e+00> : vector<8x128xf32>
    %551 = tpu.matmul %517, %7, %cst_134 {dimension_numbers = #tpu.dot_dimension_numbers<[1], [0], [0], [1], [0, 0, 1, 1], [], []>} : vector<8x32xf32>, vector<32x128xf32>, vector<8x128xf32> -> vector<8x128xf32>
    %552 = arith.addf %550, %551 : vector<8x128xf32>
    %553 = arith.negf %552 : vector<8x128xf32>
    %554 = math.exp %553 : vector<8x128xf32>
    %cst_135 = arith.constant 1.000000e+00 : f32
    %555 = vector.broadcast %cst_135 : f32 to vector<8x128xf32>
    %556 = arith.addf %555, %554 : vector<8x128xf32>
    %557 = arith.divf %555, %556 : vector<8x128xf32>
    %558 = vector.extract_strided_slice %557 {offsets = [0, 0], sizes = [8, 32], strides = [1, 1]} : vector<8x128xf32> to vector<8x32xf32>
    %559 = vector.extract_strided_slice %557 {offsets = [0, 32], sizes = [8, 32], strides = [1, 1]} : vector<8x128xf32> to vector<8x32xf32>
    %560 = vector.extract_strided_slice %557 {offsets = [0, 96], sizes = [8, 32], strides = [1, 1]} : vector<8x128xf32> to vector<8x32xf32>
    %561 = vector.extract_strided_slice %552 {offsets = [0, 64], sizes = [8, 32], strides = [1, 1]} : vector<8x128xf32> to vector<8x32xf32>
    %562 = math.tanh %561 : vector<8x32xf32>
    %563 = arith.mulf %559, %520 : vector<8x32xf32>
    %564 = arith.mulf %558, %562 : vector<8x32xf32>
    %565 = arith.addf %563, %564 : vector<8x32xf32>
    %566 = math.tanh %565 : vector<8x32xf32>
    %567 = arith.mulf %560, %566 : vector<8x32xf32>
    %568 = arith.mulf %547, %567 : vector<8x32xf32>
    %569 = arith.mulf %549, %517 : vector<8x32xf32>
    %570 = arith.addf %568, %569 : vector<8x32xf32>
    %571 = arith.mulf %547, %565 : vector<8x32xf32>
    %572 = arith.mulf %549, %520 : vector<8x32xf32>
    %573 = arith.addf %571, %572 : vector<8x32xf32>
    %cst_136 = arith.constant dense<0.000000e+00> : vector<8x128xf32>
    %574 = tpu.matmul %568, %8, %cst_136 {dimension_numbers = #tpu.dot_dimension_numbers<[1], [0], [0], [1], [0, 0, 1, 1], [], []>} : vector<8x32xf32>, vector<32x128xf32>, vector<8x128xf32> -> vector<8x128xf32>
    %cst_137 = arith.constant dense<0.000000e+00> : vector<8x128xf32>
    %575 = tpu.matmul %543, %9, %cst_137 {dimension_numbers = #tpu.dot_dimension_numbers<[1], [0], [0], [1], [0, 0, 1, 1], [], []>} : vector<8x32xf32>, vector<32x128xf32>, vector<8x128xf32> -> vector<8x128xf32>
    %576 = arith.addf %574, %575 : vector<8x128xf32>
    %577 = arith.addf %576, %12 : vector<8x128xf32>
    %578 = arith.negf %577 : vector<8x128xf32>
    %579 = math.exp %578 : vector<8x128xf32>
    %cst_138 = arith.constant 1.000000e+00 : f32
    %580 = vector.broadcast %cst_138 : f32 to vector<8x128xf32>
    %581 = arith.addf %580, %579 : vector<8x128xf32>
    %582 = arith.divf %580, %581 : vector<8x128xf32>
    %583 = vector.extract_strided_slice %582 {offsets = [0, 0], sizes = [8, 32], strides = [1, 1]} : vector<8x128xf32> to vector<8x32xf32>
    %584 = vector.extract_strided_slice %582 {offsets = [0, 32], sizes = [8, 32], strides = [1, 1]} : vector<8x128xf32> to vector<8x32xf32>
    %585 = vector.extract_strided_slice %582 {offsets = [0, 96], sizes = [8, 32], strides = [1, 1]} : vector<8x128xf32> to vector<8x32xf32>
    %586 = vector.extract_strided_slice %577 {offsets = [0, 64], sizes = [8, 32], strides = [1, 1]} : vector<8x128xf32> to vector<8x32xf32>
    %587 = math.tanh %586 : vector<8x32xf32>
    %588 = arith.mulf %584, %546 : vector<8x32xf32>
    %589 = arith.mulf %583, %587 : vector<8x32xf32>
    %590 = arith.addf %588, %589 : vector<8x32xf32>
    %591 = math.tanh %590 : vector<8x32xf32>
    %592 = arith.mulf %585, %591 : vector<8x32xf32>
    %593 = arith.mulf %547, %592 : vector<8x32xf32>
    %c80_139 = arith.constant 80 : index
    %c0_140 = arith.constant 0 : index
    %594 = vector.load %arg13[%c80_139, %c0_140] : memref<96x32xf32, #tpu.memory_space<vmem>>, vector<8x32xf32>
    tpu.vector_store %arg13[%c80_139, %c0_140], %593 {strides = array<i32>} : memref<96x32xf32, #tpu.memory_space<vmem>>, vector<8x32xf32>,
    %595 = arith.mulf %549, %543 : vector<8x32xf32>
    %596 = arith.addf %593, %595 : vector<8x32xf32>
    %597 = arith.mulf %547, %590 : vector<8x32xf32>
    %598 = arith.mulf %549, %546 : vector<8x32xf32>
    %599 = arith.addf %597, %598 : vector<8x32xf32>
    %c88 = arith.constant 88 : index
    %c0_141 = arith.constant 0 : index
    %600 = vector.load %arg1[%c88, %c0_141] : memref<96x32xf32, #tpu.memory_space<vmem>>, vector<8x32xf32>
    %c88_142 = arith.constant 88 : index
    %c0_143 = arith.constant 0 : index
    %601 = vector.load %arg12[%c88_142, %c0_143] : memref<96x128xf32, #tpu.memory_space<vmem>>, vector<8x128xf32>
    %cst_144 = arith.constant dense<0.000000e+00> : vector<8x128xf32>
    %602 = tpu.matmul %570, %7, %cst_144 {dimension_numbers = #tpu.dot_dimension_numbers<[1], [0], [0], [1], [0, 0, 1, 1], [], []>} : vector<8x32xf32>, vector<32x128xf32>, vector<8x128xf32> -> vector<8x128xf32>
    %603 = arith.addf %601, %602 : vector<8x128xf32>
    %604 = arith.negf %603 : vector<8x128xf32>
    %605 = math.exp %604 : vector<8x128xf32>
    %cst_145 = arith.constant 1.000000e+00 : f32
    %606 = vector.broadcast %cst_145 : f32 to vector<8x128xf32>
    %607 = arith.addf %606, %605 : vector<8x128xf32>
    %608 = arith.divf %606, %607 : vector<8x128xf32>
    %609 = vector.extract_strided_slice %608 {offsets = [0, 0], sizes = [8, 32], strides = [1, 1]} : vector<8x128xf32> to vector<8x32xf32>
    %610 = vector.extract_strided_slice %608 {offsets = [0, 32], sizes = [8, 32], strides = [1, 1]} : vector<8x128xf32> to vector<8x32xf32>
    %611 = vector.extract_strided_slice %608 {offsets = [0, 96], sizes = [8, 32], strides = [1, 1]} : vector<8x128xf32> to vector<8x32xf32>
    %612 = vector.extract_strided_slice %603 {offsets = [0, 64], sizes = [8, 32], strides = [1, 1]} : vector<8x128xf32> to vector<8x32xf32>
    %613 = math.tanh %612 : vector<8x32xf32>
    %614 = arith.mulf %610, %573 : vector<8x32xf32>
    %615 = arith.mulf %609, %613 : vector<8x32xf32>
    %616 = arith.addf %614, %615 : vector<8x32xf32>
    %617 = math.tanh %616 : vector<8x32xf32>
    %618 = arith.mulf %611, %617 : vector<8x32xf32>
    %619 = arith.mulf %600, %618 : vector<8x32xf32>
    %cst_146 = arith.constant dense<0.000000e+00> : vector<8x128xf32>
    %620 = tpu.matmul %619, %8, %cst_146 {dimension_numbers = #tpu.dot_dimension_numbers<[1], [0], [0], [1], [0, 0, 1, 1], [], []>} : vector<8x32xf32>, vector<32x128xf32>, vector<8x128xf32> -> vector<8x128xf32>
    %cst_147 = arith.constant dense<0.000000e+00> : vector<8x128xf32>
    %621 = tpu.matmul %596, %9, %cst_147 {dimension_numbers = #tpu.dot_dimension_numbers<[1], [0], [0], [1], [0, 0, 1, 1], [], []>} : vector<8x32xf32>, vector<32x128xf32>, vector<8x128xf32> -> vector<8x128xf32>
    %622 = arith.addf %620, %621 : vector<8x128xf32>
    %623 = arith.addf %622, %12 : vector<8x128xf32>
    %624 = arith.negf %623 : vector<8x128xf32>
    %625 = math.exp %624 : vector<8x128xf32>
    %cst_148 = arith.constant 1.000000e+00 : f32
    %626 = vector.broadcast %cst_148 : f32 to vector<8x128xf32>
    %627 = arith.addf %626, %625 : vector<8x128xf32>
    %628 = arith.divf %626, %627 : vector<8x128xf32>
    %629 = vector.extract_strided_slice %628 {offsets = [0, 0], sizes = [8, 32], strides = [1, 1]} : vector<8x128xf32> to vector<8x32xf32>
    %630 = vector.extract_strided_slice %628 {offsets = [0, 32], sizes = [8, 32], strides = [1, 1]} : vector<8x128xf32> to vector<8x32xf32>
    %631 = vector.extract_strided_slice %628 {offsets = [0, 96], sizes = [8, 32], strides = [1, 1]} : vector<8x128xf32> to vector<8x32xf32>
    %632 = vector.extract_strided_slice %623 {offsets = [0, 64], sizes = [8, 32], strides = [1, 1]} : vector<8x128xf32> to vector<8x32xf32>
    %633 = math.tanh %632 : vector<8x32xf32>
    %634 = arith.mulf %630, %599 : vector<8x32xf32>
    %635 = arith.mulf %629, %633 : vector<8x32xf32>
    %636 = arith.addf %634, %635 : vector<8x32xf32>
    %637 = math.tanh %636 : vector<8x32xf32>
    %638 = arith.mulf %631, %637 : vector<8x32xf32>
    %639 = arith.mulf %600, %638 : vector<8x32xf32>
    %c88_149 = arith.constant 88 : index
    %c0_150 = arith.constant 0 : index
    %640 = vector.load %arg13[%c88_149, %c0_150] : memref<96x32xf32, #tpu.memory_space<vmem>>, vector<8x32xf32>
    tpu.vector_store %arg13[%c88_149, %c0_150], %639 {strides = array<i32>} : memref<96x32xf32, #tpu.memory_space<vmem>>, vector<8x32xf32>,
    %c0_151 = arith.constant 0 : index
    %c0_152 = arith.constant 0 : index
    %641 = vector.load %arg13[%c0_151, %c0_152] : memref<96x32xf32, #tpu.memory_space<vmem>>, vector<96x32xf32>
    %c0_153 = arith.constant 0 : index
    %c0_154 = arith.constant 0 : index
    %642 = vector.load %arg9[%c0_153, %c0_154] : memref<32x27xf32, #tpu.memory_space<vmem>>, vector<32x27xf32>
    %cst_155 = arith.constant dense<0.000000e+00> : vector<96x27xf32>
    %643 = tpu.matmul %641, %642, %cst_155 {dimension_numbers = #tpu.dot_dimension_numbers<[1], [0], [0], [1], [0, 0, 1, 1], [], []>} : vector<96x32xf32>, vector<32x27xf32>, vector<96x27xf32> -> vector<96x27xf32>
    %c0_156 = arith.constant 0 : index
    %c0_157 = arith.constant 0 : index
    %644 = vector.load %arg10[%c0_156, %c0_157] : memref<1x27xf32, #tpu.memory_space<vmem>>, vector<1x27xf32>
    %645 = vector.broadcast %644 : vector<1x27xf32> to vector<96x27xf32>
    %646 = arith.addf %643, %645 : vector<96x27xf32>
    %647 = vector.extract_strided_slice %646 {offsets = [0, 0], sizes = [96, 8], strides = [1, 1]} : vector<96x27xf32> to vector<96x8xf32>
    %cst_158 = arith.constant dense<0xFF800000> : vector<96xf32>
    %648 = vector.multi_reduction <maximumf>, %647, %cst_158 [1] : vector<96x8xf32> to vector<96xf32>
    %649 = vector.shape_cast %648 : vector<96xf32> to vector<96x1xf32>
    %650 = vector.broadcast %649 : vector<96x1xf32> to vector<96x8xf32>
    %651 = arith.subf %647, %650 : vector<96x8xf32>
    %652 = math.exp %651 : vector<96x8xf32>
    %cst_159 = arith.constant dense<0.000000e+00> : vector<96xf32>
    %653 = vector.multi_reduction <add>, %652, %cst_159 [1] : vector<96x8xf32> to vector<96xf32>
    %654 = vector.shape_cast %653 : vector<96xf32> to vector<96x1xf32>
    %655 = tpu.reciprocal %654 {approx = true} : vector<96x1xf32> -> vector<96x1xf32>
    %656 = vector.broadcast %655 : vector<96x1xf32> to vector<96x8xf32>
    %657 = arith.mulf %652, %656 : vector<96x8xf32>
    %658 = vector.extract_strided_slice %646 {offsets = [0, 8], sizes = [96, 8], strides = [1, 1]} : vector<96x27xf32> to vector<96x8xf32>
    %cst_160 = arith.constant dense<0xFF800000> : vector<96xf32>
    %659 = vector.multi_reduction <maximumf>, %658, %cst_160 [1] : vector<96x8xf32> to vector<96xf32>
    %660 = vector.shape_cast %659 : vector<96xf32> to vector<96x1xf32>
    %661 = vector.broadcast %660 : vector<96x1xf32> to vector<96x8xf32>
    %662 = arith.subf %658, %661 : vector<96x8xf32>
    %663 = math.exp %662 : vector<96x8xf32>
    %cst_161 = arith.constant dense<0.000000e+00> : vector<96xf32>
    %664 = vector.multi_reduction <add>, %663, %cst_161 [1] : vector<96x8xf32> to vector<96xf32>
    %665 = vector.shape_cast %664 : vector<96xf32> to vector<96x1xf32>
    %666 = tpu.reciprocal %665 {approx = true} : vector<96x1xf32> -> vector<96x1xf32>
    %667 = vector.broadcast %666 : vector<96x1xf32> to vector<96x8xf32>
    %668 = arith.mulf %663, %667 : vector<96x8xf32>
    %669 = vector.extract_strided_slice %646 {offsets = [0, 16], sizes = [96, 8], strides = [1, 1]} : vector<96x27xf32> to vector<96x8xf32>
    %cst_162 = arith.constant dense<0xFF800000> : vector<96xf32>
    %670 = vector.multi_reduction <maximumf>, %669, %cst_162 [1] : vector<96x8xf32> to vector<96xf32>
    %671 = vector.shape_cast %670 : vector<96xf32> to vector<96x1xf32>
    %672 = vector.broadcast %671 : vector<96x1xf32> to vector<96x8xf32>
    %673 = arith.subf %669, %672 : vector<96x8xf32>
    %674 = math.exp %673 : vector<96x8xf32>
    %cst_163 = arith.constant dense<0.000000e+00> : vector<96xf32>
    %675 = vector.multi_reduction <add>, %674, %cst_163 [1] : vector<96x8xf32> to vector<96xf32>
    %676 = vector.shape_cast %675 : vector<96xf32> to vector<96x1xf32>
    %677 = tpu.reciprocal %676 {approx = true} : vector<96x1xf32> -> vector<96x1xf32>
    %678 = vector.broadcast %677 : vector<96x1xf32> to vector<96x8xf32>
    %679 = arith.mulf %674, %678 : vector<96x8xf32>
    %680 = tpu.concatenate %657, %668, %679 in 1 : vector<96x8xf32>, vector<96x8xf32>, vector<96x8xf32> -> vector<96x24xf32>
    %c0_164 = arith.constant 0 : index
    %c0_165 = arith.constant 0 : index
    %681 = vector.load %arg11[%c0_164, %c0_165] : memref<96x27xf32, #tpu.memory_space<vmem>>, vector<96x24xf32>
    tpu.vector_store %arg11[%c0_164, %c0_165], %680 {strides = array<i32>} : memref<96x27xf32, #tpu.memory_space<vmem>>, vector<96x24xf32>,
    %682 = vector.extract_strided_slice %646 {offsets = [0, 24], sizes = [96, 3], strides = [1, 1]} : vector<96x27xf32> to vector<96x3xf32>
    %683 = arith.negf %682 : vector<96x3xf32>
    %684 = math.exp %683 : vector<96x3xf32>
    %cst_166 = arith.constant 1.000000e+00 : f32
    %685 = vector.broadcast %cst_166 : f32 to vector<96x3xf32>
    %686 = arith.addf %685, %684 : vector<96x3xf32>
    %687 = arith.divf %685, %686 : vector<96x3xf32>
    %c0_167 = arith.constant 0 : index
    %c24_168 = arith.constant 24 : index
    %688 = vector.load %arg11[%c0_167, %c24_168] : memref<96x27xf32, #tpu.memory_space<vmem>>, vector<96x3xf32>
    tpu.vector_store %arg11[%c0_167, %c24_168], %687 {strides = array<i32>} : memref<96x27xf32, #tpu.memory_space<vmem>>, vector<96x3xf32>,
    return
  }
  func.func @transform_0(%arg0: i32) -> (i32, i32) {
    %c0_i32 = arith.constant 0 : i32
    %c0_i32_0 = arith.constant 0 : i32
    %c0_i32_1 = arith.constant 0 : i32
    return %c0_i32, %c0_i32_0 : i32, i32
  }
  func.func @transform_1(%arg0: i32) -> (i32, i32) {
    %c0_i32 = arith.constant 0 : i32
    %c0_i32_0 = arith.constant 0 : i32
    %c0_i32_1 = arith.constant 0 : i32
    return %c0_i32, %c0_i32_0 : i32, i32
  }
  func.func @transform_2(%arg0: i32) -> (i32, i32) {
    %c0_i32 = arith.constant 0 : i32
    %c0_i32_0 = arith.constant 0 : i32
    %c0_i32_1 = arith.constant 0 : i32
    return %c0_i32, %c0_i32_0 : i32, i32
  }
  func.func @transform_3(%arg0: i32) -> (i32, i32) {
    %c0_i32 = arith.constant 0 : i32
    %c0_i32_0 = arith.constant 0 : i32
    %c0_i32_1 = arith.constant 0 : i32
    return %c0_i32, %c0_i32_0 : i32, i32
  }
  func.func @transform_4(%arg0: i32) -> (i32, i32) {
    %c0_i32 = arith.constant 0 : i32
    %c0_i32_0 = arith.constant 0 : i32
    %c0_i32_1 = arith.constant 0 : i32
    return %c0_i32, %c0_i32_0 : i32, i32
  }
  func.func @transform_5(%arg0: i32) -> (i32, i32) {
    %c0_i32 = arith.constant 0 : i32
    %c0_i32_0 = arith.constant 0 : i32
    %c0_i32_1 = arith.constant 0 : i32
    return %c0_i32, %c0_i32_0 : i32, i32
  }
  func.func @transform_6(%arg0: i32) -> (i32, i32) {
    %c0_i32 = arith.constant 0 : i32
    %c0_i32_0 = arith.constant 0 : i32
    %c0_i32_1 = arith.constant 0 : i32
    return %c0_i32, %c0_i32_0 : i32, i32
  }
  func.func @transform_7(%arg0: i32) -> (i32, i32) {
    %c0_i32 = arith.constant 0 : i32
    %c0_i32_0 = arith.constant 0 : i32
    %c0_i32_1 = arith.constant 0 : i32
    return %c0_i32, %c0_i32_0 : i32, i32
  }
  func.func @transform_8(%arg0: i32) -> (i32, i32) {
    %c0_i32 = arith.constant 0 : i32
    %c0_i32_0 = arith.constant 0 : i32
    %c0_i32_1 = arith.constant 0 : i32
    return %c0_i32, %c0_i32_0 : i32, i32
  }
  func.func @transform_9(%arg0: i32) -> (i32, i32) {
    %c0_i32 = arith.constant 0 : i32
    %c0_i32_0 = arith.constant 0 : i32
    %c0_i32_1 = arith.constant 0 : i32
    return %c0_i32, %c0_i32_0 : i32, i32
  }
  func.func @transform_10(%arg0: i32) -> (i32, i32) {
    %c0_i32 = arith.constant 0 : i32
    %c0_i32_0 = arith.constant 0 : i32
    %c0_i32_1 = arith.constant 0 : i32
    return %c0_i32, %c0_i32_0 : i32, i32
  }
}

</mosaic_0001>

<bundles_post_ra>
// kernel: bach_net_forward.1
= control target key start
LH: loop header
LB: loop body
LE: loop exit
PB: predicated region body
PF: predicated region fallthrough
CT: control target
= control target key end

     0   :  { %vm56_vm0 = vcmask 130048   ;;  %v6102_v3 = vmov 0.0|0.0   ;;  %vm6103_vm1 = vmmov 0   ;;  %v6104_v4 = vmov 0.0   ;;  %s6106_s27 = smov 32   ;;  %s6107_s28 = smov 96   ;;  %s7696_s2 = inlined_call_operand.vmem [shape: f32[16,128], index: 2, kind: input, shape index: {}]   ;;  %s7697_s1 = inlined_call_operand.vmem [shape: f32[96,16], index: 1, kind: input, shape index: {}]   ;;  %s7698_s3 = inlined_call_operand.vmem [shape: f32[32,128], index: 3, kind: input, shape index: {}]   ;;  %s7699_s4 = inlined_call_operand.vmem [shape: f32[1,128], index: 4, kind: input, shape index: {}]   ;;  %s7700_s6 = inlined_call_operand.vmem [shape: f32[32,128], index: 6, kind: input, shape index: {}]   ;;  %s7701_s5 = inlined_call_operand.vmem [shape: f32[32,128], index: 5, kind: input, shape index: {}]   ;;  %s7702_s0 = inlined_call_operand.vmem [shape: f32[96,32], index: 0, kind: input, shape index: {}]   ;;  %s7703_s7 = inlined_call_operand.vmem [shape: f32[1,128], index: 7, kind: input, shape index: {}]   ;;  %s7704_s8 = inlined_call_operand.vmem [shape: f32[32,27], index: 8, kind: input, shape index: {}]   ;;  %s7705_s9 = inlined_call_operand.vmem [shape: f32[1,27], index: 9, kind: input, shape index: {}]   ;;  %s7706_s10 = inlined_call_operand.vmem [shape: f32[96,27], index: 10, kind: output, shape index: {}]  }
   0x1   :  { %v47_v0 = vld [vmem:[%s7696_s2] sm:$0xff]  ;;  %v48_v1 = vld [vmem:[%s7696_s2 + $0x8] sm:$0xff]  ;;  %5491 = vmatprep.subr.bf16.mxu1 %v6102_v3  ;;  %5078 = vmatprep.mubr.msk.f32.mxu1 %vm6103_vm1, %v6104_v4  ;;  %v37_v10 = vld [vmem:[%s7697_s1 + $0x10] sm:$0xff]  ;;  %vm252_vm2 = vcmask 261120   ;;  %vm4109_vm3 = vcmask 64512   ;;  %vm4242_vm4 = vcmask 130112  }
   0x2   :  { %v35_v2 = vld [vmem:[%s7697_s1] sm:$0xff]  ;;  %v5481_v5 = vpack.c.bf16 %v48_v1, %v47_v0  ;;  %v231_v7 = vld [vmem:[%s7698_s3 + $0x8] sm:$0xff]  ;;  %v232_v11 = vld [vmem:[%s7698_s3 + $0x10] sm:$0xff]  ;;  %vm4423_vm5 = vcmask 195712   ;;  %vm4628_vm6 = vcmask 195584   ;;  %vm4713_vm7 = vcmask 220352  }
   0x3   :  { %5041 = vmatprep.mubr.msk.f32.mxu0 %vm56_vm0, %v35_v2  ;;  %v230_v6 = vld [vmem:[%s7698_s3] sm:$0xff]  ;;  %v36_v8 = vld [vmem:[%s7697_s1 + $0x8] sm:$0xff]  ;;  %v233_v12 = vld [vmem:[%s7698_s3 + $0x18] sm:$0xff] }
   0x4   :  { %5482 = vmatprep.subr.bf16.mxu0 %v5481_v5  ;;  %v6187_v9 = vpack.c.bf16 %v231_v7, %v230_v6  ;;  %v38_v13 = vld [vmem:[%s7697_s1 + $0x18] sm:$0xff]  ;;  %v6205_v14 = vpack.c.bf16 %v233_v12, %v232_v11  ;;  %v39_v15 = vld [vmem:[%s7697_s1 + $0x20] sm:$0xff]  ;;  %v40_v16 = vld [vmem:[%s7697_s1 + $0x28] sm:$0xff] }
   0x5   :  { %5484 = vmatpush3.bf16.msra.mxu0 %v5481_v5  ;;  %v41_v17 = vld [vmem:[%s7697_s1 + $0x30] sm:$0xff]  ;;  %v42_v18 = vld [vmem:[%s7697_s1 + $0x38] sm:$0xff]  ;;  %v43_v19 = vld [vmem:[%s7697_s1 + $0x40] sm:$0xff] }
   0x6   :  { %5485 = vmatprep.subr.bf16.mxu0 %v6102_v3  ;;  %v44_v20 = vld [vmem:[%s7697_s1 + $0x48] sm:$0xff]  ;;  %v45_v21 = vld [vmem:[%s7697_s1 + $0x50] sm:$0xff]  ;;  %v46_v22 = vld [vmem:[%s7697_s1 + $0x58] sm:$0xff] }
   0x7   :  { %v4730_v23 = vld [vmem:[%s7699_s4] ss:$0 sm:$0xff]  ;;  %s6105_s4 = smov 64   ;;  %v239_v62 = vld [vmem:[%s7700_s6 + $0x8] sm:$0xff]  ;;  %v240_v63 = vld [vmem:[%s7700_s6 + $0x10] sm:$0xff] }
   0x8   :  { %5042 = vmatmul.mubr.msk.f32.vlgmr.msra.gmra.mrb[0].mxu0 %vm56_vm0, %v36_v8  ;;  %v238_v61 = vld [vmem:[%s7700_s6] sm:$0xff]  ;;  %v241_v1 = vld [vmem:[%s7700_s6 + $0x18] sm:$0xff]  ;;  %v235_v6 = vld [vmem:[%s7701_s5 + $0x8] sm:$0xff] }
   0x9   :  { %5487 = vmatpush3.bf16.msra.mxu0 %v6187_v9  ;;  %5044 = vmatprep.mubr.msk.f32.mxu0 %vm56_vm0, %v37_v10  ;;  %v6289_v0 = vpack.c.bf16 %v239_v62, %v238_v61  ;;  %v6295_v2 = vpack.c.bf16 %v241_v1, %v240_v63  ;;  %v234_v5 = vld [vmem:[%s7701_s5] sm:$0xff]  ;;  %v236_v8 = vld [vmem:[%s7701_s5 + $0x10] sm:$0xff]  ;;  %v237_v10 = vld [vmem:[%s7701_s5 + $0x18] sm:$0xff] }
   0xa   :  { %5488 = vmatprep.subr.bf16.mxu0 %v6102_v3  ;;  %v6305_v7 = vpack.c.bf16 %v235_v6, %v234_v5  ;;  %v6317_v12 = vpack.c.bf16 %v237_v10, %v236_v8 }
   0xb   :  { %5493 = vmatpush3.bf16.msra.mxu1 %v6289_v0 }
   0xc   :  { %5045 = vmatmul.mubr.msk.f32.gmra.mrb[2].mxu0 %vm56_vm0, %v38_v13  ;;  %5494 = vmatprep.subr.bf16.mxu1 %v6102_v3 }
   0xd   :  { %5047 = vmatprep.mubr.msk.f32.mxu0 %vm56_vm0, %v39_v15  ;;  %5490 = vmatpush3.bf16.msra.mxu0 %v6205_v14 }
   0xe   :  { %5503 = vmatprep.subr.bf16.mxu0 %v6102_v3 }
   0xf   :  { %5496 = vmatpush3.bf16.msra.mxu1 %v6295_v2 }
  0x10   :  { %5048 = vmatmul.mubr.msk.f32.gmra.mrb[4].mxu0 %vm56_vm0, %v40_v16  ;;  %5497 = vmatprep.subr.bf16.mxu1 %v6102_v3 }
  0x11   :  { %5050 = vmatprep.mubr.msk.f32.mxu0 %vm56_vm0, %v41_v17 }
  0x12   :  { %5079 = vmatmul.mubr.f32.vlgmr.msra.gmra.mrb[0].mxu1 %v6104_v4 }
  0x13   :  { %5499 = vmatpush3.bf16.msra.mxu1 %v6305_v7  ;;  %5089 = vmatprep.mubr.msk.f32.mxu1 %vm6103_vm1, %v6104_v4 }
  0x14   :  { %5051 = vmatmul.mubr.msk.f32.gmra.mrb[6].mxu0 %vm56_vm0, %v42_v18  ;;  %5500 = vmatprep.subr.bf16.mxu1 %v6102_v3  ;;  %v6328_v18 = vld [vmem:[%s7702_s0] sm:$0xff] }
  0x15   :  { %5053 = vmatprep.mubr.msk.f32.mxu0 %vm56_vm0, %v43_v19  ;;  %v250_v19 = vsub.f32 1.0, %v6328_v18 }
  0x17   :  { %5502 = vmatpush3.bf16.msra.mxu1 %v6317_v12 }
  0x18   :  { %5054 = vmatmul.mubr.msk.f32.gmra.mrb[8].mxu0 %vm56_vm0, %v44_v20  ;;  %5509 = vmatprep.subr.bf16.mxu1 %v6102_v3 }
  0x19   :  { %5056 = vmatprep.mubr.msk.f32.mxu0 %vm56_vm0, %v45_v21  ;;  %v6331_v21 = vmul.f32 0.0, %v250_v19  ;;  %v6376_v19 = vld [vmem:[%s7702_s0 + $0x8] sm:$0xff] }
  0x1c   :  { %5057 = vmatmul.mubr.msk.f32.gmra.mrb[10].mxu0 %vm56_vm0, %v46_v22 }
  0x1d   :  { %5067 = vmatprep.mubr.msk.f32.mxu0 %vm6103_vm1, %v6104_v4 }
  0x20   :  { %5068 = vmatmul.mubr.f32.vlgmr.msra.gmra.mrb[12].mxu0 %v6104_v4 }
  0x21   :  { %5505 = vmatpush3.bf16.msra.mxu0 %v6187_v9  ;;  %5100 = vmatprep.mubr.msk.f32.mxu0 %vm6103_vm1, %v6104_v4 }
  0x22   :  { %5506 = vmatprep.subr.bf16.mxu0 %v6102_v3 }
  0x25   :  { %5508 = vmatpush3.bf16.msra.mxu0 %v6205_v14 }
  0x26   :  { %5515 = vmatprep.subr.bf16.mxu0 %v6102_v3 }
  0xdb   :  { %v5043_v24 = vpop.f32.mrb[0].mxu0 }
  0xdc   :  { %v6255_v25 = vadd.f32 %v5043_v24, %v4730_v23  ;;  %v159_v26 = vpop.f32.mrb[1].mxu0  ;;  %v6355_v24 = vld [vmem:[%s7703_s7] ss:$0 sm:$0xff] }
  0xdd   :  { %v160_v47 = vadd.f32 %v4730_v23, %v159_v26 }
  0xdf   :  { %v5046_v27 = vpop.f32.mrb[2].mxu0 }
  0xe0   :  { %v6257_v28 = vadd.f32 %v5046_v27, %v4730_v23  ;;  %v169_v29 = vpop.f32.mrb[3].mxu0 }
  0xe1   :  { %v6259_v30 = vadd.f32 %v4730_v23, %v169_v29 }
  0xe3   :  { %v5049_v31 = vpop.f32.mrb[4].mxu0 }
  0xe4   :  { %v6261_v32 = vadd.f32 %v5049_v31, %v4730_v23  ;;  %v179_v33 = vpop.f32.mrb[5].mxu0 }
  0xe5   :  { %v6263_v34 = vadd.f32 %v4730_v23, %v179_v33  ;;  %v430_v16 = vpop.f32.mrb[0].mxu1 }
  0xe6   :  { %v5080_v17 = vpop.f32.mrb[1].mxu1 }
  0xe7   :  { %v5052_v35 = vpop.f32.mrb[6].mxu0 }
  0xe8   :  { %v6265_v36 = vadd.f32 %v5052_v35, %v4730_v23  ;;  %v189_v37 = vpop.f32.mrb[7].mxu0 }
  0xe9   :  { %v6267_v38 = vadd.f32 %v4730_v23, %v189_v37 }
  0xeb   :  { %v5055_v39 = vpop.f32.mrb[8].mxu0 }
  0xec   :  { %v6269_v40 = vadd.f32 %v5055_v39, %v4730_v23  ;;  %v199_v41 = vpop.f32.mrb[9].mxu0 }
  0xed   :  { %v6271_v42 = vadd.f32 %v4730_v23, %v199_v41 }
  0xef   :  { %v5058_v43 = vpop.f32.mrb[10].mxu0 }
  0xf0   :  { %v6273_v44 = vadd.f32 %v5058_v43, %v4730_v23  ;;  %v209_v45 = vpop.f32.mrb[11].mxu0 }
  0xf1   :  { %v6275_v46 = vadd.f32 %v4730_v23, %v209_v45 }
  0xf3   :  { %v322_v48 = vpop.f32.mrb[12].mxu0 }
  0xf4   :  { %v326_v49 = vadd.f32 %v322_v48, %v160_v47  ;;  %v5069_v50 = vpop.f32.mrb[13].mxu0 }
  0xf6   :  { %5717 = vtanh.f32 %v326_v49  ;;  %v4744_v52 = vmul.f32 -1.442695, %v326_v49 }
  0xf8   :  { %5719 = vpow2.f32 %v4744_v52 }
 0x100   :  { %v5718_v51 = vpop.eup %5717 }
 0x101   :  { %336 = vrot.lane.b32.xlu0 %v5718_v51, %s6105_s4 }
 0x102   :  { %v5720_v53 = vpop.eup %5719 }
 0x103   :  { %v330_v54 = vadd.f32 1.0, %v5720_v53 }
 0x105   :  { %5721 = vrcp.f32 %v330_v54 }
 0x10f   :  { %v5722_v55 = vpop.eup %5721 }
 0x110   :  { %v334_v58 = vmul.f32 0.0, %v5722_v55 }
 0x173   :  { %v337_v56 = vpop.permute.xlu0 %336 }
 0x174   :  { %v339_v57 = vmul.f32 %v5722_v55, %v337_v56 }
 0x176   :  { %341 = vrot.lane.b32.xlu0 %v339_v57, %s6106_s27 }
 0x1e8   :  { %v342_v59 = vpop.permute.xlu0 %341 }
 0x1e9   :  { %v344_v60 = vadd.f32 %v342_v59, %v334_v58 }
 0x1eb   :  { %5723 = vtanh.f32 %v344_v60  ;;  %359 = vrot.lane.b32.xlu0 %v344_v60, %s6107_s28 }
 0x1f5   :  { %v5724_v11 = vpop.eup %5723 }
 0x1f6   :  { %347 = vrot.lane.b32.xlu1 %v5724_v11, %s6105_s4 }
 0x25d   :  { %v360_v39 = vpop.permute.xlu0 %359 }
 0x25e   :  { %v362_v43 = vmul.f32 %v360_v39, %v6328_v18 }
 0x260   :  { %v363_v47 = vadd.f32 %v362_v43, %v6331_v21 }
 0x268   :  { %v348_v13 = vpop.permute.xlu1 %347 }
 0x269   :  { %v350_v15 = vmul.f32 %v5722_v55, %v348_v13 }
 0x26b   :  { %352 = vrot.lane.b32.xlu1 %v350_v15, %s6106_s27 }
 0x2dd   :  { %v353_v20 = vpop.permute.xlu1 %352 }
 0x2de   :  { %v355_v22 = vmul.f32 %v353_v20, %v6328_v18 }
 0x2e0   :  { %v6335_v23 = vadd.f32 %v6331_v21, %v355_v22  ;;  %5090 = vmatmul.mubr.msk.f32.vlgmr.msra.gmra.mrb[2].mxu1 %vm252_vm2, %v355_v22 }
 0x2e1   :  { %5511 = vmatpush3.bf16.msra.mxu1 %v6289_v0  ;;  %5111 = vmatprep.mubr.msk.f32.mxu1 %vm6103_vm1, %v6104_v4 }
 0x2e2   :  { %5101 = vmatmul.mubr.msk.f32.vlgmr.msra.gmra.mrb[14].mxu0 %vm252_vm2, %v6335_v23  ;;  %5512 = vmatprep.subr.bf16.mxu1 %v6102_v3 }
 0x2e3   :  { %5517 = vmatpush3.bf16.msra.mxu0 %v6305_v7  ;;  %5122 = vmatprep.mubr.msk.f32.mxu0 %vm6103_vm1, %v6104_v4 }
 0x2e4   :  { %5518 = vmatprep.subr.bf16.mxu0 %v6102_v3 }
 0x2e5   :  { %5514 = vmatpush3.bf16.msra.mxu1 %v6295_v2 }
 0x2e6   :  { %5521 = vmatprep.subr.bf16.mxu1 %v6102_v3 }
 0x2e7   :  { %5520 = vmatpush3.bf16.msra.mxu0 %v6317_v12 }
 0x2e8   :  { %5527 = vmatprep.subr.bf16.mxu0 %v6102_v3 }
 0x3b3   :  { %v503_v26 = vpop.f32.mrb[2].mxu1 }
 0x3b4   :  { %v504_v27 = vadd.f32 %v503_v26, %v430_v16  ;;  %v5091_v29 = vpop.f32.mrb[3].mxu1 }
 0x3b5   :  { %v617_v31 = vpop.f32.mrb[14].mxu0  ;;  %v6384_v29 = vsub.f32 1.0, %v6376_v19 }
 0x3b6   :  { %v507_v33 = vadd.f32 %v6355_v24, %v504_v27  ;;  %v621_v35 = vadd.f32 %v617_v31, %v6255_v25  ;;  %v5102_v37 = vpop.f32.mrb[15].mxu0 }
 0x3b7   :  { %v662_v37 = vmul.f32 %v6384_v29, %v363_v47 }
 0x3b8   :  { %5725 = vtanh.f32 %v507_v33  ;;  %v4746_v48 = vmul.f32 -1.442695, %v507_v33  ;;  %v4748_v49 = vmul.f32 -1.442695, %v621_v35 }
 0x3b9   :  { %5727 = vtanh.f32 %v621_v35  ;;  %v655_v35 = vmul.f32 %v6384_v29, %v6335_v23 }
 0x3ba   :  { %5729 = vpow2.f32 %v4746_v48 }
 0x3bb   :  { %5731 = vpow2.f32 %v4748_v49 }
 0x3c2   :  { %v5726_v41 = vpop.eup %5725 }
 0x3c3   :  { %v5728_v45 = vpop.eup %5727  ;;  %517 = vrot.lane.b32.xlu1 %v5726_v41, %s6105_s4 }
 0x3c4   :  { %635 = vrot.lane.b32.xlu0 %v5728_v45, %s6105_s4  ;;  %v5730_v25 = vpop.eup %5729 }
 0x3c5   :  { %v511_v50 = vadd.f32 1.0, %v5730_v25  ;;  %v5732_v51 = vpop.eup %5731 }
 0x3c6   :  { %v625_v52 = vadd.f32 1.0, %v5732_v51 }
 0x3c7   :  { %5733 = vrcp.f32 %v511_v50 }
 0x3c8   :  { %630 = vrot.lane.b32.xlu0 %v363_v47, %s6106_s27  ;;  %5735 = vrcp.f32 %v625_v52 }
 0x3d1   :  { %v5734_v53 = vpop.eup %5733 }
 0x3d2   :  { %v5736_v57 = vpop.eup %5735  ;;  %v515_v59 = vmul.f32 0.0, %v5734_v53 }
 0x435   :  { %v518_v54 = vpop.permute.xlu1 %517 }
 0x436   :  { %v520_v55 = vmul.f32 %v5734_v53, %v518_v54  ;;  %v636_v56 = vpop.permute.xlu0 %635 }
 0x437   :  { %v638_v58 = vmul.f32 %v5736_v57, %v636_v56 }
 0x438   :  { %522 = vrot.lane.b32.xlu1 %v520_v55, %s6106_s27 }
 0x43a   :  { %v631_v60 = vpop.permute.xlu0 %630 }
 0x43b   :  { %v633_v63 = vmul.f32 %v5736_v57, %v631_v60 }
 0x43c   :  { %640 = vrot.lane.b32.xlu1 %v638_v58, %s6106_s27 }
 0x4aa   :  { %v523_v61 = vpop.permute.xlu1 %522 }
 0x4ab   :  { %v525_v62 = vadd.f32 %v523_v61, %v515_v59 }
 0x4ad   :  { %5737 = vtanh.f32 %v525_v62 }
 0x4ae   :  { %v641_v1 = vpop.permute.xlu1 %640 }
 0x4af   :  { %v643_v5 = vadd.f32 %v641_v1, %v633_v63 }
 0x4b1   :  { %5739 = vtanh.f32 %v643_v5 }
 0x4b7   :  { %v5738_v6 = vpop.eup %5737 }
 0x4b8   :  { %528 = vrot.lane.b32.xlu0 %v5738_v6, %s6105_s4 }
 0x4bb   :  { %v5740_v8 = vpop.eup %5739 }
 0x4bc   :  { %646 = vrot.lane.b32.xlu1 %v5740_v8, %s6105_s4 }
 0x52a   :  { %v529_v10 = vpop.permute.xlu0 %528 }
 0x52b   :  { %v531_v11 = vmul.f32 %v5734_v53, %v529_v10 }
 0x52d   :  { %533 = vrot.lane.b32.xlu0 %v531_v11, %s6106_s27 }
 0x52e   :  { %v647_v13 = vpop.permute.xlu1 %646 }
 0x52f   :  { %v649_v15 = vmul.f32 %v5736_v57, %v647_v13 }
 0x531   :  { %540 = vrot.lane.b32.xlu0 %v525_v62, %s6107_s28  ;;  %651 = vrot.lane.b32.xlu1 %v649_v15, %s6106_s27 }
 0x535   :  { %658 = vrot.lane.b32.xlu0 %v643_v5, %s6107_s28 }
 0x59f   :  { %v534_v16 = vpop.permute.xlu0 %533 }
 0x5a0   :  { %v536_v17 = vmul.f32 %v534_v16, %v6328_v18 }
 0x5a2   :  { %537 = vst.msk [vmem:[#allocation3] sm:$0xff] %vm252_vm2, %v536_v17  ;;  %v6380_v20 = vadd.f32 %v536_v17, %v6331_v21 }
 0x5a3   :  { %v541_v22 = vpop.permute.xlu0 %540  ;;  %v652_v26 = vpop.permute.xlu1 %651 }
 0x5a4   :  { %v543_v27 = vmul.f32 %v541_v22, %v6328_v18  ;;  %v654_v31 = vmul.f32 %v652_v26, %v6376_v19  ;;  %5112 = vmatmul.mubr.msk.f32.vlgmr.msra.gmra.mrb[4].mxu1 %vm252_vm2, %v6380_v20 }
 0x5a5   :  { %5523 = vmatpush3.bf16.msra.mxu1 %v6187_v9  ;;  %5133 = vmatprep.mubr.msk.f32.mxu1 %vm6103_vm1, %v6104_v4 }
 0x5a6   :  { %v6393_v33 = vadd.f32 %v543_v27, %v6331_v21  ;;  %5123 = vmatmul.mubr.msk.f32.vlgmr.msra.gmra.mrb[16].mxu0 %vm252_vm2, %v654_v31  ;;  %5524 = vmatprep.subr.bf16.mxu1 %v6102_v3  ;;  %v6408_v21 = vadd.f32 %v655_v35, %v654_v31 }
 0x5a7   :  { %v659_v18 = vpop.permute.xlu0 %658  ;;  %5529 = vmatpush3.bf16.msra.mxu0 %v6289_v0  ;;  %5144 = vmatprep.mubr.msk.f32.mxu0 %vm6103_vm1, %v6104_v4 }
 0x5a8   :  { %v661_v39 = vmul.f32 %v659_v18, %v6376_v19  ;;  %819 = vrot.lane.b32.xlu0 %v6393_v33, %s6106_s27  ;;  %5530 = vmatprep.subr.bf16.mxu0 %v6102_v3 }
 0x5a9   :  { %5526 = vmatpush3.bf16.msra.mxu1 %v6205_v14 }
 0x5aa   :  { %v6410_v41 = vadd.f32 %v662_v37, %v661_v39  ;;  %5533 = vmatprep.subr.bf16.mxu1 %v6102_v3  ;;  %v845_v37 = vmul.f32 %v6384_v29, %v6380_v20 }
 0x5ab   :  { %5532 = vmatpush3.bf16.msra.mxu0 %v6295_v2 }
 0x5ac   :  { %5134 = vmatmul.mubr.msk.f32.vlgmr.msra.gmra.mrb[6].mxu1 %vm252_vm2, %v6408_v21  ;;  %939 = vrot.lane.b32.xlu0 %v6410_v41, %s6106_s27 }
 0x5ad   :  { %5535 = vmatpush3.bf16.msra.mxu1 %v6305_v7  ;;  %5539 = vmatprep.subr.bf16.mxu0 %v6102_v3 }
 0x5ae   :  { %5536 = vmatprep.subr.bf16.mxu1 %v6102_v3  ;;  %5155 = vmatprep.mubr.msk.f32.mxu1 %vm6103_vm1, %v6104_v4 }
 0x5b1   :  { %5538 = vmatpush3.bf16.msra.mxu1 %v6317_v12 }
 0x5b2   :  { %5545 = vmatprep.subr.bf16.mxu1 %v6102_v3 }
 0x61a   :  { %v820_v5 = vpop.permute.xlu0 %819 }
 0x61e   :  { %v940_v11 = vpop.permute.xlu0 %939 }
 0x677   :  { %v733_v23 = vpop.f32.mrb[4].mxu1 }
 0x678   :  { %v5113_v43 = vpop.f32.mrb[5].mxu1 }
 0x679   :  { %v806_v45 = vpop.f32.mrb[16].mxu0 }
 0x67a   :  { %v807_v47 = vadd.f32 %v806_v45, %v733_v23  ;;  %v5124_v48 = vpop.f32.mrb[17].mxu0  ;;  %v6443_v23 = vld [vmem:[%s7702_s0 + $0x10] sm:$0xff] }
 0x67c   :  { %v810_v49 = vadd.f32 %v6355_v24, %v807_v47  ;;  %v6449_v47 = vsub.f32 1.0, %v6443_v23 }
 0x67e   :  { %5741 = vtanh.f32 %v810_v49  ;;  %v4751_v54 = vmul.f32 -1.442695, %v810_v49  ;;  %v964_v20 = vmul.f32 %v6449_v47, %v6408_v21 }
 0x67f   :  { %v926_v25 = vpop.f32.mrb[6].mxu1 }
 0x680   :  { %v930_v50 = vadd.f32 %v926_v25, %v6259_v30  ;;  %v5135_v51 = vpop.f32.mrb[7].mxu1 }
 0x682   :  { %5743 = vtanh.f32 %v930_v50  ;;  %v4753_v55 = vmul.f32 -1.442695, %v930_v50 }
 0x683   :  { %5745 = vpow2.f32 %v4751_v54 }
 0x684   :  { %5747 = vpow2.f32 %v4753_v55 }
 0x688   :  { %v5742_v52 = vpop.eup %5741 }
 0x689   :  { %824 = vrot.lane.b32.xlu1 %v5742_v52, %s6105_s4 }
 0x68c   :  { %v5744_v53 = vpop.eup %5743 }
 0x68d   :  { %944 = vrot.lane.b32.xlu1 %v5744_v53, %s6105_s4  ;;  %v5746_v56 = vpop.eup %5745 }
 0x68e   :  { %v814_v57 = vadd.f32 1.0, %v5746_v56  ;;  %v5748_v58 = vpop.eup %5747 }
 0x68f   :  { %v934_v59 = vadd.f32 1.0, %v5748_v58 }
 0x690   :  { %5749 = vrcp.f32 %v814_v57 }
 0x691   :  { %5751 = vrcp.f32 %v934_v59 }
 0x69a   :  { %v5750_v60 = vpop.eup %5749 }
 0x69b   :  { %v5752_v62 = vpop.eup %5751  ;;  %v822_v6 = vmul.f32 %v5750_v60, %v820_v5 }
 0x69c   :  { %v942_v13 = vmul.f32 %v5752_v62, %v940_v11 }
 0x6fb   :  { %v825_v30 = vpop.permute.xlu1 %824 }
 0x6fc   :  { %v827_v61 = vmul.f32 %v5750_v60, %v825_v30  ;;  %v852_v30 = vmul.f32 %v6384_v29, %v6393_v33 }
 0x6fe   :  { %829 = vrot.lane.b32.xlu1 %v827_v61, %s6106_s27 }
 0x6ff   :  { %v945_v63 = vpop.permute.xlu1 %944 }
 0x700   :  { %v947_v1 = vmul.f32 %v5752_v62, %v945_v63 }
 0x702   :  { %949 = vrot.lane.b32.xlu1 %v947_v1, %s6106_s27  ;;  %v971_v1 = vmul.f32 %v6449_v47, %v6410_v41 }
 0x770   :  { %v830_v8 = vpop.permute.xlu1 %829 }
 0x771   :  { %v832_v10 = vadd.f32 %v830_v8, %v822_v6 }
 0x773   :  { %5753 = vtanh.f32 %v832_v10 }
 0x774   :  { %v950_v15 = vpop.permute.xlu1 %949 }
 0x775   :  { %v952_v16 = vadd.f32 %v950_v15, %v942_v13 }
 0x777   :  { %5755 = vtanh.f32 %v952_v16 }
 0x77d   :  { %v5754_v17 = vpop.eup %5753 }
 0x77e   :  { %835 = vrot.lane.b32.xlu0 %v5754_v17, %s6105_s4 }
 0x781   :  { %v5756_v22 = vpop.eup %5755 }
 0x782   :  { %955 = vrot.lane.b32.xlu1 %v5756_v22, %s6105_s4 }
 0x7f0   :  { %v836_v26 = vpop.permute.xlu0 %835 }
 0x7f1   :  { %v838_v27 = vmul.f32 %v5750_v60, %v836_v26 }
 0x7f3   :  { %840 = vrot.lane.b32.xlu0 %v838_v27, %s6106_s27 }
 0x7f4   :  { %v956_v31 = vpop.permute.xlu1 %955 }
 0x7f5   :  { %v958_v18 = vmul.f32 %v5752_v62, %v956_v31 }
 0x7f7   :  { %960 = vrot.lane.b32.xlu1 %v958_v18, %s6106_s27  ;;  %848 = vrot.lane.b32.xlu0 %v832_v10, %s6107_s28 }
 0x7fb   :  { %967 = vrot.lane.b32.xlu1 %v952_v16, %s6107_s28 }
 0x865   :  { %v841_v35 = vpop.permute.xlu0 %840 }
 0x866   :  { %v843_v39 = vmul.f32 %v841_v35, %v6376_v19 }
 0x868   :  { %844 = vst.msk [vmem:[#allocation3 + $0x8] sm:$0xff] %vm252_vm2, %v843_v39  ;;  %v6446_v43 = vadd.f32 %v845_v37, %v843_v39 }
 0x869   :  { %v961_v45 = vpop.permute.xlu1 %960  ;;  %v849_v57 = vpop.permute.xlu0 %848 }
 0x86a   :  { %v963_v48 = vmul.f32 %v961_v45, %v6443_v23  ;;  %5145 = vmatmul.mubr.msk.f32.vlgmr.msra.gmra.mrb[18].mxu0 %vm252_vm2, %v6446_v43  ;;  %v851_v58 = vmul.f32 %v849_v57, %v6376_v19 }
 0x86b   :  { %5541 = vmatpush3.bf16.msra.mxu0 %v6187_v9  ;;  %5166 = vmatprep.mubr.msk.f32.mxu0 %vm6103_vm1, %v6104_v4 }
 0x86c   :  { %5156 = vmatmul.mubr.msk.f32.vlgmr.msra.gmra.mrb[8].mxu1 %vm252_vm2, %v963_v48  ;;  %5542 = vmatprep.subr.bf16.mxu0 %v6102_v3  ;;  %v6466_v49 = vadd.f32 %v964_v20, %v963_v48  ;;  %v853_v61 = vadd.f32 %v852_v30, %v851_v58 }
 0x86d   :  { %5547 = vmatpush3.bf16.msra.mxu1 %v6289_v0  ;;  %5177 = vmatprep.mubr.msk.f32.mxu1 %vm6103_vm1, %v6104_v4  ;;  %v968_v60 = vpop.permute.xlu1 %967 }
 0x86e   :  { %5548 = vmatprep.subr.bf16.mxu1 %v6102_v3  ;;  %v970_v62 = vmul.f32 %v968_v60, %v6443_v23  ;;  %v1161_v57 = vmul.f32 %v6449_v47, %v853_v61 }
 0x86f   :  { %5544 = vmatpush3.bf16.msra.mxu0 %v6205_v14 }
 0x870   :  { %5551 = vmatprep.subr.bf16.mxu0 %v6102_v3 }
 0x871   :  { %5550 = vmatpush3.bf16.msra.mxu1 %v6295_v2 }
 0x872   :  { %5167 = vmatmul.mubr.msk.f32.vlgmr.msra.gmra.mrb[20].mxu0 %vm252_vm2, %v6466_v49  ;;  %5557 = vmatprep.subr.bf16.mxu1 %v6102_v3 }
 0x873   :  { %5553 = vmatpush3.bf16.msra.mxu0 %v6305_v7  ;;  %5188 = vmatprep.mubr.msk.f32.mxu0 %vm6103_vm1, %v6104_v4 }
 0x874   :  { %5554 = vmatprep.subr.bf16.mxu0 %v6102_v3 }
 0x877   :  { %5556 = vmatpush3.bf16.msra.mxu0 %v6317_v12 }
 0x878   :  { %5563 = vmatprep.subr.bf16.mxu0 %v6102_v3 }
 0x93d   :  { %v1042_v21 = vpop.f32.mrb[18].mxu0 }
 0x93e   :  { %v5146_v25 = vpop.f32.mrb[19].mxu0 }
 0x93f   :  { %v1115_v50 = vpop.f32.mrb[8].mxu1 }
 0x940   :  { %v1116_v51 = vadd.f32 %v1115_v50, %v1042_v21  ;;  %v5157_v52 = vpop.f32.mrb[9].mxu1 }
 0x942   :  { %v1119_v53 = vadd.f32 %v6355_v24, %v1116_v51  ;;  %v1154_v51 = vmul.f32 %v6449_v47, %v6446_v43 }
 0x944   :  { %5757 = vtanh.f32 %v1119_v53  ;;  %v4756_v19 = vmul.f32 -1.442695, %v1119_v53  ;;  %v6508_v53 = vld [vmem:[%s7702_s0 + $0x18] sm:$0xff] }
 0x945   :  { %v1235_v54 = vpop.f32.mrb[20].mxu0 }
 0x946   :  { %v1239_v55 = vadd.f32 %v1235_v54, %v6257_v28  ;;  %v5168_v56 = vpop.f32.mrb[21].mxu0  ;;  %v6490_v28 = vadd.f32 %v971_v1, %v970_v62 }
 0x948   :  { %5759 = vtanh.f32 %v1239_v55  ;;  %v4758_v29 = vmul.f32 -1.442695, %v1239_v55 }
 0x949   :  { %5761 = vpow2.f32 %v4756_v19 }
 0x94a   :  { %5763 = vpow2.f32 %v4758_v29 }
 0x94e   :  { %v5758_v59 = vpop.eup %5757 }
 0x94f   :  { %1133 = vrot.lane.b32.xlu0 %v5758_v59, %s6105_s4  ;;  %v6516_v59 = vsub.f32 1.0, %v6508_v53 }
 0x951   :  { %v1273_v47 = vmul.f32 %v6516_v59, %v6466_v49  ;;  %v1280_v30 = vmul.f32 %v6516_v59, %v6490_v28 }
 0x952   :  { %v5760_v63 = vpop.eup %5759 }
 0x953   :  { %1253 = vrot.lane.b32.xlu1 %v5760_v63, %s6105_s4  ;;  %1128 = vrot.lane.b32.xlu0 %v853_v61, %s6106_s27  ;;  %v5762_v33 = vpop.eup %5761 }
 0x954   :  { %v1123_v5 = vadd.f32 1.0, %v5762_v33  ;;  %v5764_v6 = vpop.eup %5763 }
 0x955   :  { %v1243_v8 = vadd.f32 1.0, %v5764_v6 }
 0x956   :  { %5765 = vrcp.f32 %v1123_v5 }
 0x957   :  { %1248 = vrot.lane.b32.xlu0 %v6490_v28, %s6106_s27  ;;  %5767 = vrcp.f32 %v1243_v8 }
 0x960   :  { %v5766_v41 = vpop.eup %5765 }
 0x961   :  { %v5768_v13 = vpop.eup %5767 }
 0x9c1   :  { %v1134_v10 = vpop.permute.xlu0 %1133 }
 0x9c2   :  { %v1136_v11 = vmul.f32 %v5766_v41, %v1134_v10 }
 0x9c4   :  { %1138 = vrot.lane.b32.xlu1 %v1136_v11, %s6106_s27 }
 0x9c5   :  { %v1254_v15 = vpop.permute.xlu1 %1253  ;;  %v1129_v17 = vpop.permute.xlu0 %1128 }
 0x9c6   :  { %v1256_v16 = vmul.f32 %v5768_v13, %v1254_v15  ;;  %v1131_v22 = vmul.f32 %v5766_v41, %v1129_v17 }
 0x9c8   :  { %1258 = vrot.lane.b32.xlu1 %v1256_v16, %s6106_s27 }
 0x9c9   :  { %v1249_v26 = vpop.permute.xlu0 %1248 }
 0x9ca   :  { %v1251_v18 = vmul.f32 %v5768_v13, %v1249_v26 }
 0xa36   :  { %v1139_v27 = vpop.permute.xlu1 %1138 }
 0xa37   :  { %v1141_v31 = vadd.f32 %v1139_v27, %v1131_v22 }
 0xa39   :  { %5769 = vtanh.f32 %v1141_v31 }
 0xa3a   :  { %v1259_v35 = vpop.permute.xlu1 %1258 }
 0xa3b   :  { %v1261_v37 = vadd.f32 %v1259_v35, %v1251_v18 }
 0xa3d   :  { %5771 = vtanh.f32 %v1261_v37 }
 0xa43   :  { %v5770_v39 = vpop.eup %5769 }
 0xa44   :  { %1144 = vrot.lane.b32.xlu0 %v5770_v39, %s6105_s4 }
 0xa47   :  { %v5772_v45 = vpop.eup %5771 }
 0xa48   :  { %1264 = vrot.lane.b32.xlu1 %v5772_v45, %s6105_s4 }
 0xab6   :  { %v1145_v48 = vpop.permute.xlu0 %1144 }
 0xab7   :  { %v1147_v20 = vmul.f32 %v5766_v41, %v1145_v48 }
 0xab9   :  { %1149 = vrot.lane.b32.xlu0 %v1147_v20, %s6106_s27 }
 0xaba   :  { %v1265_v21 = vpop.permute.xlu1 %1264 }
 0xabb   :  { %v1267_v25 = vmul.f32 %v5768_v13, %v1265_v21 }
 0xabd   :  { %1157 = vrot.lane.b32.xlu0 %v1141_v31, %s6107_s28  ;;  %1269 = vrot.lane.b32.xlu1 %v1267_v25, %s6106_s27 }
 0xac1   :  { %1276 = vrot.lane.b32.xlu0 %v1261_v37, %s6107_s28 }
 0xb2b   :  { %v1150_v50 = vpop.permute.xlu0 %1149 }
 0xb2c   :  { %v1152_v52 = vmul.f32 %v1150_v50, %v6443_v23 }
 0xb2e   :  { %1153 = vst.msk [vmem:[#allocation3 + $0x10] sm:$0xff] %vm252_vm2, %v1152_v52  ;;  %v6511_v54 = vadd.f32 %v1154_v51, %v1152_v52 }
 0xb2f   :  { %v1158_v55 = vpop.permute.xlu0 %1157  ;;  %v1270_v56 = vpop.permute.xlu1 %1269 }
 0xb30   :  { %v1160_v58 = vmul.f32 %v1158_v55, %v6443_v23  ;;  %v1272_v43 = vmul.f32 %v1270_v56, %v6508_v53  ;;  %5178 = vmatmul.mubr.msk.f32.vlgmr.msra.gmra.mrb[10].mxu1 %vm252_vm2, %v6511_v54 }
 0xb31   :  { %5559 = vmatpush3.bf16.msra.mxu1 %v6187_v9  ;;  %5199 = vmatprep.mubr.msk.f32.mxu1 %vm6103_vm1, %v6104_v4 }
 0xb32   :  { %v6524_v60 = vadd.f32 %v1161_v57, %v1160_v58  ;;  %5189 = vmatmul.mubr.msk.f32.vlgmr.msra.gmra.mrb[22].mxu0 %vm252_vm2, %v1272_v43  ;;  %5560 = vmatprep.subr.bf16.mxu1 %v6102_v3  ;;  %v6540_v62 = vadd.f32 %v1273_v47, %v1272_v43 }
 0xb33   :  { %v1277_v23 = vpop.permute.xlu0 %1276  ;;  %5565 = vmatpush3.bf16.msra.mxu0 %v6289_v0  ;;  %5210 = vmatprep.mubr.msk.f32.mxu0 %vm6103_vm1, %v6104_v4 }
 0xb34   :  { %v1279_v61 = vmul.f32 %v1277_v23, %v6508_v53  ;;  %1437 = vrot.lane.b32.xlu0 %v6524_v60, %s6106_s27  ;;  %5566 = vmatprep.subr.bf16.mxu0 %v6102_v3  ;;  %v1463_v23 = vmul.f32 %v6516_v59, %v6511_v54 }
 0xb35   :  { %5562 = vmatpush3.bf16.msra.mxu1 %v6205_v14 }
 0xb36   :  { %v6542_v63 = vadd.f32 %v1280_v30, %v1279_v61  ;;  %5569 = vmatprep.subr.bf16.mxu1 %v6102_v3  ;;  %v6575_v30 = vld [vmem:[%s7702_s0 + $0x20] sm:$0xff] }
 0xb37   :  { %5568 = vmatpush3.bf16.msra.mxu0 %v6295_v2 }
 0xb38   :  { %5200 = vmatmul.mubr.msk.f32.vlgmr.msra.gmra.mrb[12].mxu1 %vm252_vm2, %v6540_v62  ;;  %1557 = vrot.lane.b32.xlu0 %v6542_v63, %s6106_s27 }
 0xb39   :  { %5571 = vmatpush3.bf16.msra.mxu1 %v6305_v7  ;;  %5575 = vmatprep.subr.bf16.mxu0 %v6102_v3 }
 0xb3a   :  { %5572 = vmatprep.subr.bf16.mxu1 %v6102_v3  ;;  %5221 = vmatprep.mubr.msk.f32.mxu1 %vm6103_vm1, %v6104_v4 }
 0xb3d   :  { %5574 = vmatpush3.bf16.msra.mxu1 %v6317_v12 }
 0xb3e   :  { %5581 = vmatprep.subr.bf16.mxu1 %v6102_v3 }
 0xba6   :  { %v1438_v37 = vpop.permute.xlu0 %1437 }
 0xbaa   :  { %v1558_v20 = vpop.permute.xlu0 %1557 }
 0xc03   :  { %v1351_v49 = vpop.f32.mrb[10].mxu1 }
 0xc04   :  { %v5179_v1 = vpop.f32.mrb[11].mxu1 }
 0xc05   :  { %v1424_v28 = vpop.f32.mrb[22].mxu0  ;;  %v6581_v1 = vsub.f32 1.0, %v6575_v30 }
 0xc06   :  { %v1425_v19 = vadd.f32 %v1424_v28, %v1351_v49  ;;  %v5190_v29 = vpop.f32.mrb[23].mxu0 }
 0xc07   :  { %v1582_v54 = vmul.f32 %v6581_v1, %v6540_v62 }
 0xc08   :  { %v1428_v33 = vadd.f32 %v6355_v24, %v1425_v19 }
 0xc0a   :  { %5773 = vtanh.f32 %v1428_v33  ;;  %v4761_v11 = vmul.f32 -1.442695, %v1428_v33 }
 0xc0b   :  { %v1544_v5 = vpop.f32.mrb[12].mxu1 }
 0xc0c   :  { %v1548_v6 = vadd.f32 %v1544_v5, %v6263_v34  ;;  %v5201_v8 = vpop.f32.mrb[13].mxu1 }
 0xc0e   :  { %5775 = vtanh.f32 %v1548_v6  ;;  %v4763_v13 = vmul.f32 -1.442695, %v1548_v6 }
 0xc0f   :  { %5777 = vpow2.f32 %v4761_v11 }
 0xc10   :  { %5779 = vpow2.f32 %v4763_v13 }
 0xc14   :  { %v5774_v41 = vpop.eup %5773 }
 0xc15   :  { %1442 = vrot.lane.b32.xlu1 %v5774_v41, %s6105_s4 }
 0xc18   :  { %v5776_v10 = vpop.eup %5775 }
 0xc19   :  { %1562 = vrot.lane.b32.xlu1 %v5776_v10, %s6105_s4  ;;  %v5778_v15 = vpop.eup %5777 }
 0xc1a   :  { %v1432_v16 = vadd.f32 1.0, %v5778_v15  ;;  %v5780_v17 = vpop.eup %5779 }
 0xc1b   :  { %v1552_v22 = vadd.f32 1.0, %v5780_v17 }
 0xc1c   :  { %5781 = vrcp.f32 %v1432_v16 }
 0xc1d   :  { %5783 = vrcp.f32 %v1552_v22  ;;  %v1470_v22 = vmul.f32 %v6516_v59, %v6524_v60 }
 0xc26   :  { %v5782_v26 = vpop.eup %5781 }
 0xc27   :  { %v5784_v31 = vpop.eup %5783  ;;  %v1440_v39 = vmul.f32 %v5782_v26, %v1438_v37 }
 0xc28   :  { %v1560_v21 = vmul.f32 %v5784_v31, %v1558_v20 }
 0xc87   :  { %v1443_v34 = vpop.permute.xlu1 %1442 }
 0xc88   :  { %v1445_v27 = vmul.f32 %v5782_v26, %v1443_v34 }
 0xc8a   :  { %1447 = vrot.lane.b32.xlu1 %v1445_v27, %s6106_s27 }
 0xc8b   :  { %v1563_v18 = vpop.permute.xlu1 %1562 }
 0xc8c   :  { %v1565_v35 = vmul.f32 %v5784_v31, %v1563_v18 }
 0xc8e   :  { %1567 = vrot.lane.b32.xlu1 %v1565_v35, %s6106_s27 }
 0xcfc   :  { %v1448_v45 = vpop.permute.xlu1 %1447 }
 0xcfd   :  { %v1450_v48 = vadd.f32 %v1448_v45, %v1440_v39 }
 0xcff   :  { %5785 = vtanh.f32 %v1450_v48 }
 0xd00   :  { %v1568_v25 = vpop.permute.xlu1 %1567 }
 0xd01   :  { %v1570_v50 = vadd.f32 %v1568_v25, %v1560_v21 }
 0xd03   :  { %5787 = vtanh.f32 %v1570_v50 }
 0xd09   :  { %v5786_v51 = vpop.eup %5785 }
 0xd0a   :  { %1453 = vrot.lane.b32.xlu0 %v5786_v51, %s6105_s4 }
 0xd0d   :  { %v5788_v52 = vpop.eup %5787 }
 0xd0e   :  { %1573 = vrot.lane.b32.xlu1 %v5788_v52, %s6105_s4 }
 0xd7c   :  { %v1454_v55 = vpop.permute.xlu0 %1453 }
 0xd7d   :  { %v1456_v56 = vmul.f32 %v5782_v26, %v1454_v55 }
 0xd7f   :  { %1458 = vrot.lane.b32.xlu0 %v1456_v56, %s6106_s27 }
 0xd80   :  { %v1574_v57 = vpop.permute.xlu1 %1573 }
 0xd81   :  { %v1576_v58 = vmul.f32 %v5784_v31, %v1574_v57  ;;  %v1589_v31 = vmul.f32 %v6581_v1, %v6542_v63 }
 0xd83   :  { %1578 = vrot.lane.b32.xlu1 %v1576_v58, %s6106_s27  ;;  %1466 = vrot.lane.b32.xlu0 %v1450_v48, %s6107_s28 }
 0xd87   :  { %1585 = vrot.lane.b32.xlu1 %v1570_v50, %s6107_s28 }
 0xdf1   :  { %v1459_v43 = vpop.permute.xlu0 %1458 }
 0xdf2   :  { %v1461_v47 = vmul.f32 %v1459_v43, %v6508_v53 }
 0xdf4   :  { %1462 = vst.msk [vmem:[#allocation3 + $0x18] sm:$0xff] %vm252_vm2, %v1461_v47  ;;  %v6578_v61 = vadd.f32 %v1463_v23, %v1461_v47 }
 0xdf5   :  { %v1579_v49 = vpop.permute.xlu1 %1578  ;;  %v1467_v13 = vpop.permute.xlu0 %1466 }
 0xdf6   :  { %v1581_v28 = vmul.f32 %v1579_v49, %v6575_v30  ;;  %5211 = vmatmul.mubr.msk.f32.vlgmr.msra.gmra.mrb[24].mxu0 %vm252_vm2, %v6578_v61  ;;  %v1469_v15 = vmul.f32 %v1467_v13, %v6508_v53 }
 0xdf7   :  { %5577 = vmatpush3.bf16.msra.mxu0 %v6187_v9  ;;  %5232 = vmatprep.mubr.msk.f32.mxu0 %vm6103_vm1, %v6104_v4 }
 0xdf8   :  { %5222 = vmatmul.mubr.msk.f32.vlgmr.msra.gmra.mrb[14].mxu1 %vm252_vm2, %v1581_v28  ;;  %5578 = vmatprep.subr.bf16.mxu0 %v6102_v3  ;;  %v6598_v19 = vadd.f32 %v1582_v54, %v1581_v28  ;;  %v1471_v26 = vadd.f32 %v1470_v22, %v1469_v15 }
 0xdf9   :  { %5583 = vmatpush3.bf16.msra.mxu1 %v6289_v0  ;;  %5243 = vmatprep.mubr.msk.f32.mxu1 %vm6103_vm1, %v6104_v4  ;;  %v1586_v17 = vpop.permute.xlu1 %1585 }
 0xdfa   :  { %5584 = vmatprep.subr.bf16.mxu1 %v6102_v3  ;;  %v1588_v34 = vmul.f32 %v1586_v17, %v6575_v30 }
 0xdfb   :  { %5580 = vmatpush3.bf16.msra.mxu0 %v6205_v14 }
 0xdfc   :  { %5587 = vmatprep.subr.bf16.mxu0 %v6102_v3 }
 0xdfd   :  { %5586 = vmatpush3.bf16.msra.mxu1 %v6295_v2 }
 0xdfe   :  { %5233 = vmatmul.mubr.msk.f32.vlgmr.msra.gmra.mrb[26].mxu0 %vm252_vm2, %v6598_v19  ;;  %5593 = vmatprep.subr.bf16.mxu1 %v6102_v3 }
 0xdff   :  { %5589 = vmatpush3.bf16.msra.mxu0 %v6305_v7  ;;  %5254 = vmatprep.mubr.msk.f32.mxu0 %vm6103_vm1, %v6104_v4 }
 0xe00   :  { %5590 = vmatprep.subr.bf16.mxu0 %v6102_v3 }
 0xe03   :  { %5592 = vmatpush3.bf16.msra.mxu0 %v6317_v12 }
 0xe04   :  { %5599 = vmatprep.subr.bf16.mxu0 %v6102_v3 }
 0xec9   :  { %v1660_v62 = vpop.f32.mrb[24].mxu0 }
 0xeca   :  { %v5212_v29 = vpop.f32.mrb[25].mxu0 }
 0xecb   :  { %v1733_v33 = vpop.f32.mrb[14].mxu1  ;;  %v1772_v29 = vmul.f32 %v6581_v1, %v6578_v61 }
 0xecc   :  { %v1734_v5 = vadd.f32 %v1733_v33, %v1660_v62  ;;  %v5223_v6 = vpop.f32.mrb[15].mxu1 }
 0xece   :  { %v1737_v8 = vadd.f32 %v6355_v24, %v1734_v5  ;;  %v6640_v5 = vld [vmem:[%s7702_s0 + $0x28] sm:$0xff] }
 0xecf   :  { %v6648_v13 = vsub.f32 1.0, %v6640_v5 }
 0xed0   :  { %5789 = vtanh.f32 %v1737_v8  ;;  %v4766_v53 = vmul.f32 -1.442695, %v1737_v8 }
 0xed1   :  { %v1853_v41 = vpop.f32.mrb[26].mxu0 }
 0xed2   :  { %v1857_v10 = vadd.f32 %v1853_v41, %v6261_v32  ;;  %v5234_v11 = vpop.f32.mrb[27].mxu0  ;;  %v6622_v32 = vadd.f32 %v1589_v31, %v1588_v34 }
 0xed4   :  { %5791 = vtanh.f32 %v1857_v10  ;;  %v4768_v59 = vmul.f32 -1.442695, %v1857_v10  ;;  %v1779_v10 = vmul.f32 %v6581_v1, %v1471_v26  ;;  %v1891_v1 = vmul.f32 %v6648_v13, %v6598_v19 }
 0xed5   :  { %5793 = vpow2.f32 %v4766_v53 }
 0xed6   :  { %5795 = vpow2.f32 %v4768_v59 }
 0xeda   :  { %v5790_v16 = vpop.eup %5789 }
 0xedb   :  { %1751 = vrot.lane.b32.xlu0 %v5790_v16, %s6105_s4  ;;  %v1898_v16 = vmul.f32 %v6648_v13, %v6622_v32 }
 0xede   :  { %v5792_v27 = vpop.eup %5791 }
 0xedf   :  { %1871 = vrot.lane.b32.xlu1 %v5792_v27, %s6105_s4  ;;  %1746 = vrot.lane.b32.xlu0 %v1471_v26, %s6106_s27  ;;  %v5794_v60 = vpop.eup %5793 }
 0xee0   :  { %v1741_v18 = vadd.f32 1.0, %v5794_v60  ;;  %v5796_v35 = vpop.eup %5795 }
 0xee1   :  { %v1861_v37 = vadd.f32 1.0, %v5796_v35 }
 0xee2   :  { %5797 = vrcp.f32 %v1741_v18 }
 0xee3   :  { %1866 = vrot.lane.b32.xlu0 %v6622_v32, %s6106_s27  ;;  %5799 = vrcp.f32 %v1861_v37 }
 0xeec   :  { %v5798_v63 = vpop.eup %5797 }
 0xeed   :  { %v5800_v48 = vpop.eup %5799 }
 0xf4d   :  { %v1752_v39 = vpop.permute.xlu0 %1751 }
 0xf4e   :  { %v1754_v45 = vmul.f32 %v5798_v63, %v1752_v39 }
 0xf50   :  { %1756 = vrot.lane.b32.xlu1 %v1754_v45, %s6106_s27 }
 0xf51   :  { %v1872_v20 = vpop.permute.xlu1 %1871  ;;  %v1747_v25 = vpop.permute.xlu0 %1746 }
 0xf52   :  { %v1874_v21 = vmul.f32 %v5800_v48, %v1872_v20  ;;  %v1749_v50 = vmul.f32 %v5798_v63, %v1747_v25 }
 0xf54   :  { %1876 = vrot.lane.b32.xlu1 %v1874_v21, %s6106_s27 }
 0xf55   :  { %v1867_v51 = vpop.permute.xlu0 %1866 }
 0xf56   :  { %v1869_v56 = vmul.f32 %v5800_v48, %v1867_v51 }
 0xfc2   :  { %v1757_v52 = vpop.permute.xlu1 %1756 }
 0xfc3   :  { %v1759_v55 = vadd.f32 %v1757_v52, %v1749_v50 }
 0xfc5   :  { %5801 = vtanh.f32 %v1759_v55 }
 0xfc6   :  { %v1877_v57 = vpop.permute.xlu1 %1876 }
 0xfc7   :  { %v1879_v58 = vadd.f32 %v1877_v57, %v1869_v56 }
 0xfc9   :  { %5803 = vtanh.f32 %v1879_v58 }
 0xfcf   :  { %v5802_v43 = vpop.eup %5801 }
 0xfd0   :  { %1762 = vrot.lane.b32.xlu0 %v5802_v43, %s6105_s4 }
 0xfd3   :  { %v5804_v23 = vpop.eup %5803 }
 0xfd4   :  { %1882 = vrot.lane.b32.xlu1 %v5804_v23, %s6105_s4 }
0x1042   :  { %v1763_v47 = vpop.permute.xlu0 %1762 }
0x1043   :  { %v1765_v49 = vmul.f32 %v5798_v63, %v1763_v47 }
0x1045   :  { %1767 = vrot.lane.b32.xlu0 %v1765_v49, %s6106_s27 }
0x1046   :  { %v1883_v28 = vpop.permute.xlu1 %1882 }
0x1047   :  { %v1885_v54 = vmul.f32 %v5800_v48, %v1883_v28 }
0x1049   :  { %1775 = vrot.lane.b32.xlu0 %v1759_v55, %s6107_s28  ;;  %1887 = vrot.lane.b32.xlu1 %v1885_v54, %s6106_s27 }
0x104d   :  { %1894 = vrot.lane.b32.xlu0 %v1879_v58, %s6107_s28 }
0x10b7   :  { %v1768_v62 = vpop.permute.xlu0 %1767 }
0x10b8   :  { %v1770_v33 = vmul.f32 %v1768_v62, %v6575_v30 }
0x10ba   :  { %1771 = vst.msk [vmem:[#allocation3 + $0x20] sm:$0xff] %vm252_vm2, %v1770_v33  ;;  %v6643_v6 = vadd.f32 %v1772_v29, %v1770_v33 }
0x10bb   :  { %v1776_v8 = vpop.permute.xlu0 %1775  ;;  %v1888_v41 = vpop.permute.xlu1 %1887 }
0x10bc   :  { %v1778_v11 = vmul.f32 %v1776_v8, %v6575_v30  ;;  %v1890_v61 = vmul.f32 %v1888_v41, %v6640_v5  ;;  %5244 = vmatmul.mubr.msk.f32.vlgmr.msra.gmra.mrb[16].mxu1 %vm252_vm2, %v6643_v6 }
0x10bd   :  { %5595 = vmatpush3.bf16.msra.mxu1 %v6187_v9  ;;  %5265 = vmatprep.mubr.msk.f32.mxu1 %vm6103_vm1, %v6104_v4 }
0x10be   :  { %v6656_v15 = vadd.f32 %v1779_v10, %v1778_v11  ;;  %5255 = vmatmul.mubr.msk.f32.vlgmr.msra.gmra.mrb[28].mxu0 %vm252_vm2, %v1890_v61  ;;  %5596 = vmatprep.subr.bf16.mxu1 %v6102_v3  ;;  %v6672_v22 = vadd.f32 %v1891_v1, %v1890_v61  ;;  %v2081_v10 = vmul.f32 %v6648_v13, %v6643_v6  ;;  %v6707_v61 = vld [vmem:[%s7702_s0 + $0x30] sm:$0xff] }
0x10bf   :  { %v1895_v30 = vpop.permute.xlu0 %1894  ;;  %5601 = vmatpush3.bf16.msra.mxu0 %v6289_v0  ;;  %5276 = vmatprep.mubr.msk.f32.mxu0 %vm6103_vm1, %v6104_v4 }
0x10c0   :  { %v1897_v17 = vmul.f32 %v1895_v30, %v6640_v5  ;;  %2055 = vrot.lane.b32.xlu0 %v6656_v15, %s6106_s27  ;;  %5602 = vmatprep.subr.bf16.mxu0 %v6102_v3 }
0x10c1   :  { %5598 = vmatpush3.bf16.msra.mxu1 %v6205_v14 }
0x10c2   :  { %v6674_v26 = vadd.f32 %v1898_v16, %v1897_v17  ;;  %5605 = vmatprep.subr.bf16.mxu1 %v6102_v3  ;;  %v6713_v16 = vsub.f32 1.0, %v6707_v61 }
0x10c3   :  { %5604 = vmatpush3.bf16.msra.mxu0 %v6295_v2 }
0x10c4   :  { %5266 = vmatmul.mubr.msk.f32.vlgmr.msra.gmra.mrb[18].mxu1 %vm252_vm2, %v6672_v22  ;;  %2175 = vrot.lane.b32.xlu0 %v6674_v26, %s6106_s27  ;;  %v2200_v6 = vmul.f32 %v6713_v16, %v6672_v22 }
0x10c5   :  { %5607 = vmatpush3.bf16.msra.mxu1 %v6305_v7  ;;  %5611 = vmatprep.subr.bf16.mxu0 %v6102_v3 }
0x10c6   :  { %5608 = vmatprep.subr.bf16.mxu1 %v6102_v3  ;;  %5287 = vmatprep.mubr.msk.f32.mxu1 %vm6103_vm1, %v6104_v4 }
0x10c9   :  { %5610 = vmatpush3.bf16.msra.mxu1 %v6317_v12 }
0x10ca   :  { %5617 = vmatprep.subr.bf16.mxu1 %v6102_v3 }
0x1132   :  { %v2056_v55 = vpop.permute.xlu0 %2055 }
0x1136   :  { %v2176_v43 = vpop.permute.xlu0 %2175 }
0x118f   :  { %v1969_v19 = vpop.f32.mrb[16].mxu1 }
0x1190   :  { %v5245_v34 = vpop.f32.mrb[17].mxu1 }
0x1191   :  { %v2042_v27 = vpop.f32.mrb[28].mxu0 }
0x1192   :  { %v2043_v31 = vadd.f32 %v2042_v27, %v1969_v19  ;;  %v5256_v32 = vpop.f32.mrb[29].mxu0 }
0x1194   :  { %v2046_v53 = vadd.f32 %v6355_v24, %v2043_v31 }
0x1196   :  { %5805 = vtanh.f32 %v2046_v53  ;;  %v4771_v63 = vmul.f32 -1.442695, %v2046_v53  ;;  %v6746_v53 = vld [vmem:[%s7703_s7] ss:$0 sm:$0xff] }
0x1197   :  { %v2162_v59 = vpop.f32.mrb[18].mxu1 }
0x1198   :  { %v2166_v60 = vadd.f32 %v2162_v59, %v6267_v38  ;;  %v5267_v18 = vpop.f32.mrb[19].mxu1 }
0x119a   :  { %5807 = vtanh.f32 %v2166_v60  ;;  %v4773_v39 = vmul.f32 -1.442695, %v2166_v60 }
0x119b   :  { %5809 = vpow2.f32 %v4771_v63 }
0x119c   :  { %5811 = vpow2.f32 %v4773_v39 }
0x11a0   :  { %v5806_v35 = vpop.eup %5805 }
0x11a1   :  { %2060 = vrot.lane.b32.xlu1 %v5806_v35, %s6105_s4 }
0x11a4   :  { %v5808_v37 = vpop.eup %5807 }
0x11a5   :  { %2180 = vrot.lane.b32.xlu1 %v5808_v37, %s6105_s4  ;;  %v5810_v45 = vpop.eup %5809 }
0x11a6   :  { %v2050_v48 = vadd.f32 1.0, %v5810_v45  ;;  %v5812_v20 = vpop.eup %5811 }
0x11a7   :  { %v2170_v24 = vadd.f32 1.0, %v5812_v20 }
0x11a8   :  { %5813 = vrcp.f32 %v2050_v48  ;;  %v2088_v48 = vmul.f32 %v6648_v13, %v6656_v15 }
0x11a9   :  { %5815 = vrcp.f32 %v2170_v24 }
0x11b2   :  { %v5814_v21 = vpop.eup %5813 }
0x11b3   :  { %v5816_v50 = vpop.eup %5815  ;;  %v2058_v56 = vmul.f32 %v5814_v21, %v2056_v55 }
0x11b4   :  { %v2178_v23 = vmul.f32 %v5816_v50, %v2176_v43 }
0x1213   :  { %v2061_v38 = vpop.permute.xlu1 %2060 }
0x1214   :  { %v2063_v25 = vmul.f32 %v5814_v21, %v2061_v38  ;;  %v2207_v38 = vmul.f32 %v6713_v16, %v6674_v26 }
0x1216   :  { %2065 = vrot.lane.b32.xlu1 %v2063_v25, %s6106_s27 }
0x1217   :  { %v2181_v51 = vpop.permute.xlu1 %2180 }
0x1218   :  { %v2183_v52 = vmul.f32 %v5816_v50, %v2181_v51 }
0x121a   :  { %2185 = vrot.lane.b32.xlu1 %v2183_v52, %s6106_s27 }
0x1288   :  { %v2066_v57 = vpop.permute.xlu1 %2065 }
0x1289   :  { %v2068_v58 = vadd.f32 %v2066_v57, %v2058_v56 }
0x128b   :  { %5817 = vtanh.f32 %v2068_v58 }
0x128c   :  { %v2186_v47 = vpop.permute.xlu1 %2185 }
0x128d   :  { %v2188_v49 = vadd.f32 %v2186_v47, %v2178_v23 }
0x128f   :  { %5819 = vtanh.f32 %v2188_v49 }
0x1295   :  { %v5818_v28 = vpop.eup %5817 }
0x1296   :  { %2071 = vrot.lane.b32.xlu0 %v5818_v28, %s6105_s4 }
0x1299   :  { %v5820_v54 = vpop.eup %5819 }
0x129a   :  { %2191 = vrot.lane.b32.xlu1 %v5820_v54, %s6105_s4 }
0x1308   :  { %v2072_v62 = vpop.permute.xlu0 %2071 }
0x1309   :  { %v2074_v29 = vmul.f32 %v5814_v21, %v2072_v62 }
0x130b   :  { %2076 = vrot.lane.b32.xlu0 %v2074_v29, %s6106_s27 }
0x130c   :  { %v2192_v33 = vpop.permute.xlu1 %2191 }
0x130d   :  { %v2194_v8 = vmul.f32 %v5816_v50, %v2192_v33 }
0x130f   :  { %2196 = vrot.lane.b32.xlu1 %v2194_v8, %s6106_s27  ;;  %2084 = vrot.lane.b32.xlu0 %v2068_v58, %s6107_s28 }
0x1313   :  { %2203 = vrot.lane.b32.xlu1 %v2188_v49, %s6107_s28 }
0x137d   :  { %v2077_v41 = vpop.permute.xlu0 %2076 }
0x137e   :  { %v2079_v11 = vmul.f32 %v2077_v41, %v6640_v5 }
0x1380   :  { %2080 = vst.msk [vmem:[#allocation3 + $0x28] sm:$0xff] %vm252_vm2, %v2079_v11  ;;  %v6710_v30 = vadd.f32 %v2081_v10, %v2079_v11 }
0x1381   :  { %v2197_v1 = vpop.permute.xlu1 %2196  ;;  %v2085_v37 = vpop.permute.xlu0 %2084 }
0x1382   :  { %v2199_v17 = vmul.f32 %v2197_v1, %v6707_v61  ;;  %5277 = vmatmul.mubr.msk.f32.vlgmr.msra.gmra.mrb[30].mxu0 %vm252_vm2, %v6710_v30  ;;  %v2087_v63 = vmul.f32 %v2085_v37, %v6640_v5 }
0x1383   :  { %5613 = vmatpush3.bf16.msra.mxu0 %v6187_v9  ;;  %5298 = vmatprep.mubr.msk.f32.mxu0 %vm6103_vm1, %v6104_v4 }
0x1384   :  { %5288 = vmatmul.mubr.msk.f32.vlgmr.msra.gmra.mrb[20].mxu1 %vm252_vm2, %v2199_v17  ;;  %5614 = vmatprep.subr.bf16.mxu0 %v6102_v3  ;;  %v6730_v19 = vadd.f32 %v2200_v6, %v2199_v17  ;;  %v2089_v20 = vadd.f32 %v2088_v48, %v2087_v63  ;;  %v2390_v6 = vmul.f32 %v6713_v16, %v6710_v30 }
0x1385   :  { %5619 = vmatpush3.bf16.msra.mxu1 %v6289_v0  ;;  %5309 = vmatprep.mubr.msk.f32.mxu1 %vm6103_vm1, %v6104_v4  ;;  %v2204_v45 = vpop.permute.xlu1 %2203 }
0x1386   :  { %5620 = vmatprep.subr.bf16.mxu1 %v6102_v3  ;;  %v2206_v24 = vmul.f32 %v2204_v45, %v6707_v61 }
0x1387   :  { %5616 = vmatpush3.bf16.msra.mxu0 %v6205_v14 }
0x1388   :  { %5623 = vmatprep.subr.bf16.mxu0 %v6102_v3 }
0x1389   :  { %5622 = vmatpush3.bf16.msra.mxu1 %v6295_v2 }
0x138a   :  { %5299 = vmatmul.mubr.msk.f32.vlgmr.msra.gmra.mrb[32].mxu0 %vm252_vm2, %v6730_v19  ;;  %5629 = vmatprep.subr.bf16.mxu1 %v6102_v3 }
0x138b   :  { %5625 = vmatpush3.bf16.msra.mxu0 %v6305_v7  ;;  %5320 = vmatprep.mubr.msk.f32.mxu0 %vm6103_vm1, %v6104_v4 }
0x138c   :  { %5626 = vmatprep.subr.bf16.mxu0 %v6102_v3 }
0x138f   :  { %5628 = vmatpush3.bf16.msra.mxu0 %v6317_v12 }
0x1390   :  { %5635 = vmatprep.subr.bf16.mxu0 %v6102_v3 }
0x1455   :  { %v2278_v22 = vpop.f32.mrb[30].mxu0 }
0x1456   :  { %v5278_v34 = vpop.f32.mrb[31].mxu0 }
0x1457   :  { %v2351_v27 = vpop.f32.mrb[20].mxu1  ;;  %v6777_v34 = vld [vmem:[%s7702_s0 + $0x38] sm:$0xff] }
0x1458   :  { %v2352_v31 = vadd.f32 %v2351_v27, %v2278_v22  ;;  %v5289_v32 = vpop.f32.mrb[21].mxu1 }
0x145a   :  { %v2355_v59 = vadd.f32 %v6746_v53, %v2352_v31 }
0x145c   :  { %5821 = vtanh.f32 %v2355_v59  ;;  %v4776_v5 = vmul.f32 -1.442695, %v2355_v59  ;;  %v2397_v59 = vmul.f32 %v6713_v16, %v2089_v20 }
0x145d   :  { %v2471_v60 = vpop.f32.mrb[32].mxu0 }
0x145e   :  { %v2475_v18 = vadd.f32 %v2471_v60, %v6265_v36  ;;  %v5300_v35 = vpop.f32.mrb[33].mxu0  ;;  %v6759_v36 = vadd.f32 %v2207_v38, %v2206_v24 }
0x1460   :  { %5823 = vtanh.f32 %v2475_v18  ;;  %v4778_v13 = vmul.f32 -1.442695, %v2475_v18  ;;  %v6785_v18 = vsub.f32 1.0, %v6777_v34 }
0x1461   :  { %5825 = vpow2.f32 %v4776_v5 }
0x1462   :  { %5827 = vpow2.f32 %v4778_v13  ;;  %v2509_v16 = vmul.f32 %v6785_v18, %v6730_v19  ;;  %v2516_v37 = vmul.f32 %v6785_v18, %v6759_v36 }
0x1466   :  { %v5822_v39 = vpop.eup %5821 }
0x1467   :  { %2369 = vrot.lane.b32.xlu0 %v5822_v39, %s6105_s4 }
0x146a   :  { %v5824_v21 = vpop.eup %5823 }
0x146b   :  { %2489 = vrot.lane.b32.xlu1 %v5824_v21, %s6105_s4  ;;  %2364 = vrot.lane.b32.xlu0 %v2089_v20, %s6106_s27  ;;  %v5826_v15 = vpop.eup %5825 }
0x146c   :  { %v2359_v25 = vadd.f32 1.0, %v5826_v15  ;;  %v5828_v50 = vpop.eup %5827 }
0x146d   :  { %v2479_v51 = vadd.f32 1.0, %v5828_v50 }
0x146e   :  { %5829 = vrcp.f32 %v2359_v25 }
0x146f   :  { %2484 = vrot.lane.b32.xlu0 %v6759_v36, %s6106_s27  ;;  %5831 = vrcp.f32 %v2479_v51 }
0x1478   :  { %v5830_v26 = vpop.eup %5829 }
0x1479   :  { %v5832_v56 = vpop.eup %5831 }
0x14d9   :  { %v2370_v52 = vpop.permute.xlu0 %2369 }
0x14da   :  { %v2372_v55 = vmul.f32 %v5830_v26, %v2370_v52 }
0x14dc   :  { %2374 = vrot.lane.b32.xlu1 %v2372_v55, %s6106_s27 }
0x14dd   :  { %v2490_v57 = vpop.permute.xlu1 %2489  ;;  %v2365_v43 = vpop.permute.xlu0 %2364 }
0x14de   :  { %v2492_v58 = vmul.f32 %v5832_v56, %v2490_v57  ;;  %v2367_v23 = vmul.f32 %v5830_v26, %v2365_v43 }
0x14e0   :  { %2494 = vrot.lane.b32.xlu1 %v2492_v58, %s6106_s27 }
0x14e1   :  { %v2485_v47 = vpop.permute.xlu0 %2484 }
0x14e2   :  { %v2487_v54 = vmul.f32 %v5832_v56, %v2485_v47 }
0x154e   :  { %v2375_v49 = vpop.permute.xlu1 %2374 }
0x154f   :  { %v2377_v28 = vadd.f32 %v2375_v49, %v2367_v23 }
0x1551   :  { %5833 = vtanh.f32 %v2377_v28 }
0x1552   :  { %v2495_v62 = vpop.permute.xlu1 %2494 }
0x1553   :  { %v2497_v29 = vadd.f32 %v2495_v62, %v2487_v54 }
0x1555   :  { %5835 = vtanh.f32 %v2497_v29 }
0x155b   :  { %v5834_v33 = vpop.eup %5833 }
0x155c   :  { %2380 = vrot.lane.b32.xlu0 %v5834_v33, %s6105_s4 }
0x155f   :  { %v5836_v8 = vpop.eup %5835 }
0x1560   :  { %2500 = vrot.lane.b32.xlu1 %v5836_v8, %s6105_s4 }
0x15ce   :  { %v2381_v41 = vpop.permute.xlu0 %2380 }
0x15cf   :  { %v2383_v10 = vmul.f32 %v5830_v26, %v2381_v41 }
0x15d1   :  { %2385 = vrot.lane.b32.xlu0 %v2383_v10, %s6106_s27 }
0x15d2   :  { %v2501_v11 = vpop.permute.xlu1 %2500 }
0x15d3   :  { %v2503_v1 = vmul.f32 %v5832_v56, %v2501_v11 }
0x15d5   :  { %2393 = vrot.lane.b32.xlu0 %v2377_v28, %s6107_s28  ;;  %2505 = vrot.lane.b32.xlu1 %v2503_v1, %s6106_s27 }
0x15d9   :  { %2512 = vrot.lane.b32.xlu0 %v2497_v29, %s6107_s28 }
0x1643   :  { %v2386_v17 = vpop.permute.xlu0 %2385 }
0x1644   :  { %v2388_v22 = vmul.f32 %v2386_v17, %v6707_v61 }
0x1646   :  { %2389 = vst.msk [vmem:[#allocation3 + $0x30] sm:$0xff] %vm252_vm2, %v2388_v22  ;;  %v6780_v27 = vadd.f32 %v2390_v6, %v2388_v22 }
0x1647   :  { %v2394_v31 = vpop.permute.xlu0 %2393  ;;  %v2506_v32 = vpop.permute.xlu1 %2505 }
0x1648   :  { %v2396_v60 = vmul.f32 %v2394_v31, %v6707_v61  ;;  %v2508_v30 = vmul.f32 %v2506_v32, %v6777_v34  ;;  %5310 = vmatmul.mubr.msk.f32.vlgmr.msra.gmra.mrb[22].mxu1 %vm252_vm2, %v6780_v27  ;;  %v2699_v32 = vmul.f32 %v6785_v18, %v6780_v27 }
0x1649   :  { %5631 = vmatpush3.bf16.msra.mxu1 %v6187_v9  ;;  %5331 = vmatprep.mubr.msk.f32.mxu1 %vm6103_vm1, %v6104_v4 }
0x164a   :  { %v6793_v35 = vadd.f32 %v2397_v59, %v2396_v60  ;;  %5321 = vmatmul.mubr.msk.f32.vlgmr.msra.gmra.mrb[34].mxu0 %vm252_vm2, %v2508_v30  ;;  %5632 = vmatprep.subr.bf16.mxu1 %v6102_v3  ;;  %v6809_v39 = vadd.f32 %v2509_v16, %v2508_v30  ;;  %v6844_v60 = vld [vmem:[%s7702_s0 + $0x40] sm:$0xff] }
0x164b   :  { %v2513_v61 = vpop.permute.xlu0 %2512  ;;  %5637 = vmatpush3.bf16.msra.mxu0 %v6289_v0  ;;  %5342 = vmatprep.mubr.msk.f32.mxu0 %vm6103_vm1, %v6104_v4  ;;  %v6850_v16 = vsub.f32 1.0, %v6844_v60 }
0x164c   :  { %v2515_v63 = vmul.f32 %v2513_v61, %v6777_v34  ;;  %2673 = vrot.lane.b32.xlu0 %v6793_v35, %s6106_s27  ;;  %5638 = vmatprep.subr.bf16.mxu0 %v6102_v3 }
0x164d   :  { %5634 = vmatpush3.bf16.msra.mxu1 %v6205_v14  ;;  %v2818_v27 = vmul.f32 %v6850_v16, %v6809_v39 }
0x164e   :  { %v6811_v45 = vadd.f32 %v2516_v37, %v2515_v63  ;;  %5641 = vmatprep.subr.bf16.mxu1 %v6102_v3 }
0x164f   :  { %5640 = vmatpush3.bf16.msra.mxu0 %v6295_v2 }
0x1650   :  { %5332 = vmatmul.mubr.msk.f32.vlgmr.msra.gmra.mrb[24].mxu1 %vm252_vm2, %v6809_v39  ;;  %2793 = vrot.lane.b32.xlu0 %v6811_v45, %s6106_s27 }
0x1651   :  { %5643 = vmatpush3.bf16.msra.mxu1 %v6305_v7  ;;  %5647 = vmatprep.subr.bf16.mxu0 %v6102_v3 }
0x1652   :  { %5644 = vmatprep.subr.bf16.mxu1 %v6102_v3  ;;  %5353 = vmatprep.mubr.msk.f32.mxu1 %vm6103_vm1, %v6104_v4 }
0x1655   :  { %5646 = vmatpush3.bf16.msra.mxu1 %v6317_v12 }
0x1656   :  { %5653 = vmatprep.subr.bf16.mxu1 %v6102_v3 }
0x16be   :  { %v2674_v49 = vpop.permute.xlu0 %2673 }
0x16c2   :  { %v2794_v29 = vpop.permute.xlu0 %2793 }
0x171b   :  { %v2587_v19 = vpop.f32.mrb[22].mxu1 }
0x171c   :  { %v5311_v48 = vpop.f32.mrb[23].mxu1 }
0x171d   :  { %v2660_v20 = vpop.f32.mrb[34].mxu0 }
0x171e   :  { %v2661_v24 = vadd.f32 %v2660_v20, %v2587_v19  ;;  %v5322_v21 = vpop.f32.mrb[35].mxu0 }
0x1720   :  { %v2664_v38 = vadd.f32 %v6746_v53, %v2661_v24 }
0x1722   :  { %5837 = vtanh.f32 %v2664_v38  ;;  %v4781_v50 = vmul.f32 -1.442695, %v2664_v38 }
0x1723   :  { %v2780_v36 = vpop.f32.mrb[24].mxu1 }
0x1724   :  { %v2784_v5 = vadd.f32 %v2780_v36, %v6271_v42  ;;  %v5333_v13 = vpop.f32.mrb[25].mxu1 }
0x1726   :  { %5839 = vtanh.f32 %v2784_v5  ;;  %v4783_v51 = vmul.f32 -1.442695, %v2784_v5 }
0x1727   :  { %5841 = vpow2.f32 %v4781_v50 }
0x1728   :  { %5843 = vpow2.f32 %v4783_v51  ;;  %v2706_v51 = vmul.f32 %v6785_v18, %v6793_v35 }
0x172c   :  { %v5838_v15 = vpop.eup %5837 }
0x172d   :  { %2678 = vrot.lane.b32.xlu1 %v5838_v15, %s6105_s4 }
0x1730   :  { %v5840_v25 = vpop.eup %5839 }
0x1731   :  { %2798 = vrot.lane.b32.xlu1 %v5840_v25, %s6105_s4  ;;  %v5842_v26 = vpop.eup %5841 }
0x1732   :  { %v2668_v52 = vadd.f32 1.0, %v5842_v26  ;;  %v5844_v55 = vpop.eup %5843 }
0x1733   :  { %v2788_v56 = vadd.f32 1.0, %v5844_v55 }
0x1734   :  { %5845 = vrcp.f32 %v2668_v52 }
0x1735   :  { %5847 = vrcp.f32 %v2788_v56  ;;  %v2825_v56 = vmul.f32 %v6850_v16, %v6811_v45 }
0x173e   :  { %v5846_v57 = vpop.eup %5845 }
0x173f   :  { %v5848_v43 = vpop.eup %5847  ;;  %v2676_v28 = vmul.f32 %v5846_v57, %v2674_v49 }
0x1740   :  { %v2796_v33 = vmul.f32 %v5848_v43, %v2794_v29 }
0x179f   :  { %v2679_v42 = vpop.permute.xlu1 %2678 }
0x17a0   :  { %v2681_v58 = vmul.f32 %v5846_v57, %v2679_v42 }
0x17a2   :  { %2683 = vrot.lane.b32.xlu1 %v2681_v58, %s6106_s27 }
0x17a3   :  { %v2799_v23 = vpop.permute.xlu1 %2798 }
0x17a4   :  { %v2801_v47 = vmul.f32 %v5848_v43, %v2799_v23 }
0x17a6   :  { %2803 = vrot.lane.b32.xlu1 %v2801_v47, %s6106_s27 }
0x1814   :  { %v2684_v54 = vpop.permute.xlu1 %2683 }
0x1815   :  { %v2686_v62 = vadd.f32 %v2684_v54, %v2676_v28 }
0x1817   :  { %5849 = vtanh.f32 %v2686_v62 }
0x1818   :  { %v2804_v8 = vpop.permute.xlu1 %2803 }
0x1819   :  { %v2806_v41 = vadd.f32 %v2804_v8, %v2796_v33 }
0x181b   :  { %5851 = vtanh.f32 %v2806_v41 }
0x1821   :  { %v5850_v10 = vpop.eup %5849 }
0x1822   :  { %2689 = vrot.lane.b32.xlu0 %v5850_v10, %s6105_s4 }
0x1825   :  { %v5852_v11 = vpop.eup %5851 }
0x1826   :  { %2809 = vrot.lane.b32.xlu1 %v5852_v11, %s6105_s4 }
0x1894   :  { %v2690_v1 = vpop.permute.xlu0 %2689 }
0x1895   :  { %v2692_v17 = vmul.f32 %v5846_v57, %v2690_v1 }
0x1897   :  { %2694 = vrot.lane.b32.xlu0 %v2692_v17, %s6106_s27 }
0x1898   :  { %v2810_v6 = vpop.permute.xlu1 %2809 }
0x1899   :  { %v2812_v22 = vmul.f32 %v5848_v43, %v2810_v6 }
0x189b   :  { %2814 = vrot.lane.b32.xlu1 %v2812_v22, %s6106_s27  ;;  %2702 = vrot.lane.b32.xlu0 %v2686_v62, %s6107_s28 }
0x189f   :  { %2821 = vrot.lane.b32.xlu1 %v2806_v41, %s6107_s28 }
0x1909   :  { %v2695_v31 = vpop.permute.xlu0 %2694 }
0x190a   :  { %v2697_v59 = vmul.f32 %v2695_v31, %v6777_v34 }
0x190c   :  { %2698 = vst.msk [vmem:[#allocation3 + $0x38] sm:$0xff] %vm252_vm2, %v2697_v59  ;;  %v6847_v30 = vadd.f32 %v2699_v32, %v2697_v59 }
0x190d   :  { %v2815_v61 = vpop.permute.xlu1 %2814  ;;  %v2703_v13 = vpop.permute.xlu0 %2702 }
0x190e   :  { %v2817_v37 = vmul.f32 %v2815_v61, %v6844_v60  ;;  %5343 = vmatmul.mubr.msk.f32.vlgmr.msra.gmra.mrb[36].mxu0 %vm252_vm2, %v6847_v30  ;;  %v2705_v15 = vmul.f32 %v2703_v13, %v6777_v34  ;;  %v3008_v61 = vmul.f32 %v6850_v16, %v6847_v30 }
0x190f   :  { %5649 = vmatpush3.bf16.msra.mxu0 %v6187_v9  ;;  %5364 = vmatprep.mubr.msk.f32.mxu0 %vm6103_vm1, %v6104_v4 }
0x1910   :  { %5354 = vmatmul.mubr.msk.f32.vlgmr.msra.gmra.mrb[26].mxu1 %vm252_vm2, %v2817_v37  ;;  %5650 = vmatprep.subr.bf16.mxu0 %v6102_v3  ;;  %v6867_v63 = vadd.f32 %v2818_v27, %v2817_v37  ;;  %v2707_v26 = vadd.f32 %v2706_v51, %v2705_v15  ;;  %v6909_v27 = vld [vmem:[%s7702_s0 + $0x48] sm:$0xff] }
0x1911   :  { %5655 = vmatpush3.bf16.msra.mxu1 %v6289_v0  ;;  %5375 = vmatprep.mubr.msk.f32.mxu1 %vm6103_vm1, %v6104_v4  ;;  %v2822_v50 = vpop.permute.xlu1 %2821 }
0x1912   :  { %5656 = vmatprep.subr.bf16.mxu1 %v6102_v3  ;;  %v2824_v52 = vmul.f32 %v2822_v50, %v6844_v60 }
0x1913   :  { %5652 = vmatpush3.bf16.msra.mxu0 %v6205_v14 }
0x1914   :  { %5659 = vmatprep.subr.bf16.mxu0 %v6102_v3 }
0x1915   :  { %5658 = vmatpush3.bf16.msra.mxu1 %v6295_v2 }
0x1916   :  { %5365 = vmatmul.mubr.msk.f32.vlgmr.msra.gmra.mrb[38].mxu0 %vm252_vm2, %v6867_v63  ;;  %5665 = vmatprep.subr.bf16.mxu1 %v6102_v3 }
0x1917   :  { %5661 = vmatpush3.bf16.msra.mxu0 %v6305_v7  ;;  %5386 = vmatprep.mubr.msk.f32.mxu0 %vm6103_vm1, %v6104_v4 }
0x1918   :  { %5662 = vmatprep.subr.bf16.mxu0 %v6102_v3 }
0x191b   :  { %5664 = vmatpush3.bf16.msra.mxu0 %v6317_v12 }
0x191c   :  { %5671 = vmatprep.subr.bf16.mxu0 %v6102_v3 }
0x19e1   :  { %v2896_v39 = vpop.f32.mrb[36].mxu0 }
0x19e2   :  { %v5344_v19 = vpop.f32.mrb[37].mxu0 }
0x19e3   :  { %v2969_v48 = vpop.f32.mrb[26].mxu1 }
0x19e4   :  { %v2970_v20 = vadd.f32 %v2969_v48, %v2896_v39  ;;  %v5355_v24 = vpop.f32.mrb[27].mxu1 }
0x19e6   :  { %v2973_v21 = vadd.f32 %v6746_v53, %v2970_v20  ;;  %v3015_v20 = vmul.f32 %v6850_v16, %v2707_v26 }
0x19e8   :  { %5853 = vtanh.f32 %v2973_v21  ;;  %v4786_v34 = vmul.f32 -1.442695, %v2973_v21  ;;  %v6917_v21 = vsub.f32 1.0, %v6909_v27 }
0x19e9   :  { %v3089_v38 = vpop.f32.mrb[38].mxu0 }
0x19ea   :  { %v3093_v36 = vadd.f32 %v3089_v38, %v6269_v40  ;;  %v5366_v5 = vpop.f32.mrb[39].mxu0  ;;  %v6891_v40 = vadd.f32 %v2825_v56, %v2824_v52  ;;  %v3127_v16 = vmul.f32 %v6917_v21, %v6867_v63 }
0x19ec   :  { %5855 = vtanh.f32 %v3093_v36  ;;  %v4788_v18 = vmul.f32 -1.442695, %v3093_v36  ;;  %v3134_v36 = vmul.f32 %v6917_v21, %v6891_v40 }
0x19ed   :  { %5857 = vpow2.f32 %v4786_v34 }
0x19ee   :  { %5859 = vpow2.f32 %v4788_v18 }
0x19f2   :  { %v5854_v25 = vpop.eup %5853 }
0x19f3   :  { %2987 = vrot.lane.b32.xlu0 %v5854_v25, %s6105_s4 }
0x19f6   :  { %v5856_v55 = vpop.eup %5855 }
0x19f7   :  { %3107 = vrot.lane.b32.xlu1 %v5856_v55, %s6105_s4  ;;  %2982 = vrot.lane.b32.xlu0 %v2707_v26, %s6106_s27  ;;  %v5858_v35 = vpop.eup %5857 }
0x19f8   :  { %v2977_v57 = vadd.f32 1.0, %v5858_v35  ;;  %v5860_v42 = vpop.eup %5859 }
0x19f9   :  { %v3097_v58 = vadd.f32 1.0, %v5860_v42 }
0x19fa   :  { %5861 = vrcp.f32 %v2977_v57 }
0x19fb   :  { %3102 = vrot.lane.b32.xlu0 %v6891_v40, %s6106_s27  ;;  %5863 = vrcp.f32 %v3097_v58 }
0x1a04   :  { %v5862_v45 = vpop.eup %5861 }
0x1a05   :  { %v5864_v47 = vpop.eup %5863 }
0x1a65   :  { %v2988_v43 = vpop.permute.xlu0 %2987 }
0x1a66   :  { %v2990_v23 = vmul.f32 %v5862_v45, %v2988_v43 }
0x1a68   :  { %2992 = vrot.lane.b32.xlu1 %v2990_v23, %s6106_s27 }
0x1a69   :  { %v3108_v49 = vpop.permute.xlu1 %3107  ;;  %v2983_v54 = vpop.permute.xlu0 %2982 }
0x1a6a   :  { %v3110_v28 = vmul.f32 %v5864_v47, %v3108_v49  ;;  %v2985_v62 = vmul.f32 %v5862_v45, %v2983_v54 }
0x1a6c   :  { %3112 = vrot.lane.b32.xlu1 %v3110_v28, %s6106_s27 }
0x1a6d   :  { %v3103_v29 = vpop.permute.xlu0 %3102 }
0x1a6e   :  { %v3105_v41 = vmul.f32 %v5864_v47, %v3103_v29 }
0x1ada   :  { %v2993_v33 = vpop.permute.xlu1 %2992 }
0x1adb   :  { %v2995_v8 = vadd.f32 %v2993_v33, %v2985_v62 }
0x1add   :  { %5865 = vtanh.f32 %v2995_v8 }
0x1ade   :  { %v3113_v10 = vpop.permute.xlu1 %3112 }
0x1adf   :  { %v3115_v11 = vadd.f32 %v3113_v10, %v3105_v41 }
0x1ae1   :  { %5867 = vtanh.f32 %v3115_v11 }
0x1ae7   :  { %v5866_v1 = vpop.eup %5865 }
0x1ae8   :  { %2998 = vrot.lane.b32.xlu0 %v5866_v1, %s6105_s4 }
0x1aeb   :  { %v5868_v17 = vpop.eup %5867 }
0x1aec   :  { %3118 = vrot.lane.b32.xlu1 %v5868_v17, %s6105_s4 }
0x1b5a   :  { %v2999_v6 = vpop.permute.xlu0 %2998 }
0x1b5b   :  { %v3001_v22 = vmul.f32 %v5862_v45, %v2999_v6 }
0x1b5d   :  { %3003 = vrot.lane.b32.xlu0 %v3001_v22, %s6106_s27 }
0x1b5e   :  { %v3119_v31 = vpop.permute.xlu1 %3118 }
0x1b5f   :  { %v3121_v32 = vmul.f32 %v5864_v47, %v3119_v31 }
0x1b61   :  { %3011 = vrot.lane.b32.xlu0 %v2995_v8, %s6107_s28  ;;  %3123 = vrot.lane.b32.xlu1 %v3121_v32, %s6106_s27 }
0x1b65   :  { %3130 = vrot.lane.b32.xlu0 %v3115_v11, %s6107_s28 }
0x1bcf   :  { %v3004_v59 = vpop.permute.xlu0 %3003 }
0x1bd0   :  { %v3006_v37 = vmul.f32 %v3004_v59, %v6844_v60 }
0x1bd2   :  { %3007 = vst.msk [vmem:[#allocation3 + $0x40] sm:$0xff] %vm252_vm2, %v3006_v37  ;;  %v6912_v39 = vadd.f32 %v3008_v61, %v3006_v37 }
0x1bd3   :  { %v3012_v19 = vpop.permute.xlu0 %3011  ;;  %v3124_v48 = vpop.permute.xlu1 %3123 }
0x1bd4   :  { %v3014_v24 = vmul.f32 %v3012_v19, %v6844_v60  ;;  %v3126_v30 = vmul.f32 %v3124_v48, %v6909_v27  ;;  %5376 = vmatmul.mubr.msk.f32.vlgmr.msra.gmra.mrb[28].mxu1 %vm252_vm2, %v6912_v39  ;;  %v3317_v37 = vmul.f32 %v6917_v21, %v6912_v39  ;;  %v6976_v48 = vld [vmem:[%s7702_s0 + $0x50] sm:$0xff] }
0x1bd5   :  { %5667 = vmatpush3.bf16.msra.mxu1 %v6187_v9  ;;  %5397 = vmatprep.mubr.msk.f32.mxu1 %vm6103_vm1, %v6104_v4 }
0x1bd6   :  { %v6925_v38 = vadd.f32 %v3015_v20, %v3014_v24  ;;  %5387 = vmatmul.mubr.msk.f32.vlgmr.msra.gmra.mrb[40].mxu0 %vm252_vm2, %v3126_v30  ;;  %5668 = vmatprep.subr.bf16.mxu1 %v6102_v3  ;;  %v6941_v13 = vadd.f32 %v3127_v16, %v3126_v30  ;;  %v6982_v30 = vsub.f32 1.0, %v6976_v48 }
0x1bd7   :  { %v3131_v60 = vpop.permute.xlu0 %3130  ;;  %5673 = vmatpush3.bf16.msra.mxu0 %v6289_v0  ;;  %5408 = vmatprep.mubr.msk.f32.mxu0 %vm6103_vm1, %v6104_v4 }
0x1bd8   :  { %v3133_v5 = vmul.f32 %v3131_v60, %v6909_v27  ;;  %3291 = vrot.lane.b32.xlu0 %v6925_v38, %s6106_s27  ;;  %5674 = vmatprep.subr.bf16.mxu0 %v6102_v3  ;;  %v3436_v39 = vmul.f32 %v6982_v30, %v6941_v13 }
0x1bd9   :  { %5670 = vmatpush3.bf16.msra.mxu1 %v6205_v14 }
0x1bda   :  { %v6943_v15 = vadd.f32 %v3134_v36, %v3133_v5  ;;  %5677 = vmatprep.subr.bf16.mxu1 %v6102_v3 }
0x1bdb   :  { %5676 = vmatpush3.bf16.msra.mxu0 %v6295_v2 }
0x1bdc   :  { %5398 = vmatmul.mubr.msk.f32.vlgmr.msra.gmra.mrb[30].mxu1 %vm252_vm2, %v6941_v13  ;;  %3411 = vrot.lane.b32.xlu0 %v6943_v15, %s6106_s27 }
0x1bdd   :  { %5679 = vmatpush3.bf16.msra.mxu1 %v6305_v7  ;;  %5683 = vmatprep.subr.bf16.mxu0 %v6102_v3 }
0x1bde   :  { %5680 = vmatprep.subr.bf16.mxu1 %v6102_v3  ;;  %5419 = vmatprep.mubr.msk.f32.mxu1 %vm6103_vm1, %v6104_v4 }
0x1be1   :  { %5682 = vmatpush3.bf16.msra.mxu1 %v6317_v12 }
0x1be2   :  { %5689 = vmatprep.subr.bf16.mxu1 %v6102_v3 }
0x1c4a   :  { %v3292_v62 = vpop.permute.xlu0 %3291 }
0x1c4e   :  { %v3412_v41 = vpop.permute.xlu0 %3411 }
0x1ca7   :  { %v3205_v63 = vpop.f32.mrb[28].mxu1 }
0x1ca8   :  { %v5377_v25 = vpop.f32.mrb[29].mxu1 }
0x1ca9   :  { %v3278_v50 = vpop.f32.mrb[40].mxu0 }
0x1caa   :  { %v3279_v51 = vadd.f32 %v3278_v50, %v3205_v63  ;;  %v5388_v26 = vpop.f32.mrb[41].mxu0 }
0x1cac   :  { %v3282_v52 = vadd.f32 %v6746_v53, %v3279_v51 }
0x1cae   :  { %5869 = vtanh.f32 %v3282_v52  ;;  %v4791_v35 = vmul.f32 -1.442695, %v3282_v52 }
0x1caf   :  { %v3398_v55 = vpop.f32.mrb[30].mxu1 }
0x1cb0   :  { %v3402_v56 = vadd.f32 %v3398_v55, %v6275_v46  ;;  %v5399_v40 = vpop.f32.mrb[31].mxu1 }
0x1cb2   :  { %5871 = vtanh.f32 %v3402_v56  ;;  %v4793_v57 = vmul.f32 -1.442695, %v3402_v56 }
0x1cb3   :  { %5873 = vpow2.f32 %v4791_v35 }
0x1cb4   :  { %5875 = vpow2.f32 %v4793_v57 }
0x1cb8   :  { %v5870_v34 = vpop.eup %5869 }
0x1cb9   :  { %3296 = vrot.lane.b32.xlu1 %v5870_v34, %s6105_s4 }
0x1cbc   :  { %v5872_v18 = vpop.eup %5871 }
0x1cbd   :  { %3416 = vrot.lane.b32.xlu1 %v5872_v18, %s6105_s4  ;;  %v5874_v42 = vpop.eup %5873 }
0x1cbe   :  { %v3286_v58 = vadd.f32 1.0, %v5874_v42  ;;  %v5876_v45 = vpop.eup %5875 }
0x1cbf   :  { %v3406_v43 = vadd.f32 1.0, %v5876_v45 }
0x1cc0   :  { %5877 = vrcp.f32 %v3286_v58 }
0x1cc1   :  { %5879 = vrcp.f32 %v3406_v43 }
0x1cca   :  { %v5878_v23 = vpop.eup %5877 }
0x1ccb   :  { %v5880_v49 = vpop.eup %5879  ;;  %v3294_v29 = vmul.f32 %v5878_v23, %v3292_v62 }
0x1ccc   :  { %v3414_v10 = vmul.f32 %v5880_v49, %v3412_v41 }
0x1d2b   :  { %v3297_v46 = vpop.permute.xlu1 %3296 }
0x1d2c   :  { %v3299_v47 = vmul.f32 %v5878_v23, %v3297_v46 }
0x1d2e   :  { %3301 = vrot.lane.b32.xlu1 %v3299_v47, %s6106_s27 }
0x1d2f   :  { %v3417_v28 = vpop.permute.xlu1 %3416 }
0x1d30   :  { %v3419_v54 = vmul.f32 %v5880_v49, %v3417_v28 }
0x1d32   :  { %3421 = vrot.lane.b32.xlu1 %v3419_v54, %s6106_s27 }
0x1da0   :  { %v3302_v33 = vpop.permute.xlu1 %3301 }
0x1da1   :  { %v3304_v8 = vadd.f32 %v3302_v33, %v3294_v29  ;;  %v3937_v33 = vld [vmem:[%s7704_s8] sm:$0xff] }
0x1da3   :  { %5881 = vtanh.f32 %v3304_v8 }
0x1da4   :  { %v3422_v11 = vpop.permute.xlu1 %3421 }
0x1da5   :  { %v3424_v1 = vadd.f32 %v3422_v11, %v3414_v10 }
0x1da7   :  { %5883 = vtanh.f32 %v3424_v1 }
0x1dad   :  { %v5882_v17 = vpop.eup %5881 }
0x1dae   :  { %3307 = vrot.lane.b32.xlu0 %v5882_v17, %s6105_s4 }
0x1db1   :  { %v5884_v6 = vpop.eup %5883 }
0x1db2   :  { %3427 = vrot.lane.b32.xlu1 %v5884_v6, %s6105_s4 }
0x1e20   :  { %v3308_v22 = vpop.permute.xlu0 %3307 }
0x1e21   :  { %v3310_v31 = vmul.f32 %v5878_v23, %v3308_v22  ;;  %v3939_v22 = vld [vmem:[%s7704_s8 + $0x10] sm:$0xff] }
0x1e23   :  { %3312 = vrot.lane.b32.xlu0 %v3310_v31, %s6106_s27  ;;  %v3940_v31 = vld [vmem:[%s7704_s8 + $0x18] sm:$0xff] }
0x1e24   :  { %v3428_v32 = vpop.permute.xlu1 %3427 }
0x1e25   :  { %v3430_v59 = vmul.f32 %v5880_v49, %v3428_v32 }
0x1e27   :  { %3432 = vrot.lane.b32.xlu1 %v3430_v59, %s6106_s27  ;;  %3320 = vrot.lane.b32.xlu0 %v3304_v8, %s6107_s28  ;;  %v3938_v8 = vld [vmem:[%s7704_s8 + $0x8] sm:$0xff] }
0x1e28   :  { %v5701_v41 = vpack.c.bf16 %v3938_v8, %v3937_v33 }
0x1e2b   :  { %3439 = vrot.lane.b32.xlu1 %v3424_v1, %s6107_s28 }
0x1e95   :  { %v3313_v61 = vpop.permute.xlu0 %3312 }
0x1e96   :  { %v3315_v19 = vmul.f32 %v3313_v61, %v6909_v27  ;;  %v7047_v61 = vld [vmem:[%s7702_s0 + $0x58] sm:$0xff] }
0x1e98   :  { %3316 = vst.msk [vmem:[#allocation3 + $0x48] sm:$0xff] %vm252_vm2, %v3315_v19  ;;  %v6979_v20 = vadd.f32 %v3317_v37, %v3315_v19  ;;  %v5705_v19 = vpack.c.bf16 %v3940_v31, %v3939_v22 }
0x1e99   :  { %v3433_v24 = vpop.permute.xlu1 %3432 }
0x1e9a   :  { %v3435_v60 = vmul.f32 %v3433_v24, %v6976_v48  ;;  %5409 = vmatmul.mubr.msk.f32.vlgmr.msra.gmra.mrb[42].mxu0 %vm252_vm2, %v6979_v20  ;;  %v3626_v32 = vmul.f32 %v6982_v30, %v6979_v20 }
0x1e9b   :  { %5685 = vmatpush3.bf16.msra.mxu0 %v6187_v9  ;;  %5430 = vmatprep.mubr.msk.f32.mxu0 %vm6103_vm1, %v6104_v4 }
0x1e9c   :  { %5420 = vmatmul.mubr.msk.f32.vlgmr.msra.gmra.mrb[32].mxu1 %vm252_vm2, %v3435_v60  ;;  %5686 = vmatprep.subr.bf16.mxu0 %v6102_v3  ;;  %v3437_v9 = vadd.f32 %v3436_v39, %v3435_v60 }
0x1e9d   :  { %5691 = vmatpush3.bf16.msra.mxu1 %v6289_v0  ;;  %5441 = vmatprep.mubr.msk.f32.mxu1 %vm6103_vm1, %v6104_v4 }
0x1e9e   :  { %5692 = vmatprep.subr.bf16.mxu1 %v6102_v3 }
0x1e9f   :  { %5688 = vmatpush3.bf16.msra.mxu0 %v6205_v14 }
0x1ea0   :  { %5695 = vmatprep.subr.bf16.mxu0 %v6102_v3 }
0x1ea1   :  { %5694 = vmatpush3.bf16.msra.mxu1 %v6295_v2 }
0x1ea2   :  { %5431 = vmatmul.mubr.msk.f32.vlgmr.msra.gmra.mrb[44].mxu0 %vm252_vm2, %v3437_v9  ;;  %5702 = vmatprep.subr.bf16.mxu1 %v5701_v41 }
0x1ea3   :  { %5697 = vmatpush3.bf16.msra.mxu0 %v6305_v7  ;;  %5452 = vmatprep.mubr.msk.f32.mxu0 %vm6103_vm1, %v6104_v4  ;;  %v3321_v7 = vpop.permute.xlu0 %3320 }
0x1ea4   :  { %5698 = vmatprep.subr.bf16.mxu0 %v6102_v3  ;;  %v3323_v4 = vmul.f32 %v3321_v7, %v6909_v27  ;;  %v3440_v3 = vpop.permute.xlu1 %3439 }
0x1ea5   :  { %v3442_v26 = vmul.f32 %v3440_v3, %v6976_v48 }
0x1ea7   :  { %5700 = vmatpush3.bf16.msra.mxu0 %v6317_v12  ;;  %v3324_v12 = vmul.f32 %v6917_v21, %v6925_v38 }
0x1ea9   :  { %v7013_v51 = vadd.f32 %v3324_v12, %v3323_v4 }
0x1eab   :  { %v3633_v39 = vmul.f32 %v6982_v30, %v7013_v51 }
0x1f6d   :  { %v3514_v0 = vpop.f32.mrb[42].mxu0 }
0x1f6e   :  { %v5410_v16 = vpop.f32.mrb[43].mxu0 }
0x1f6f   :  { %v3587_v36 = vpop.f32.mrb[32].mxu1 }
0x1f70   :  { %v3588_v14 = vadd.f32 %v3587_v36, %v3514_v0  ;;  %v5421_v5 = vpop.f32.mrb[33].mxu1  ;;  %v3925_v0 = vld [vmem:[#allocation3] sm:$0xff]  ;;  %v3926_v36 = vld [vmem:[#allocation3 + $0x8] sm:$0xff] }
0x1f71   :  { %v3930_v5 = vld [vmem:[#allocation3 + $0x28] sm:$0xff] }
0x1f72   :  { %v3591_v13 = vadd.f32 %v6746_v53, %v3588_v14  ;;  %v3929_v14 = vld [vmem:[#allocation3 + $0x20] sm:$0xff] }
0x1f74   :  { %5885 = vtanh.f32 %v3591_v13  ;;  %v4796_v55 = vmul.f32 -1.442695, %v3591_v13  ;;  %v3931_v13 = vld [vmem:[#allocation3 + $0x30] sm:$0xff] }
0x1f75   :  { %v3706_v2 = vpop.f32.mrb[44].mxu0 }
0x1f76   :  { %v3710_v63 = vadd.f32 %v3706_v2, %v6273_v44  ;;  %v5432_v25 = vpop.f32.mrb[45].mxu0  ;;  %v3443_v44 = vmul.f32 %v6982_v30, %v6943_v15  ;;  %v3927_v30 = vld [vmem:[#allocation3 + $0x10] sm:$0xff]  ;;  %v3932_v2 = vld [vmem:[#allocation3 + $0x38] sm:$0xff] }
0x1f77   :  { %v3934_v25 = vld [vmem:[#allocation3 + $0x48] sm:$0xff] }
0x1f78   :  { %5887 = vtanh.f32 %v3710_v63  ;;  %v3444_v27 = vadd.f32 %v3443_v44, %v3442_v26  ;;  %v4798_v21 = vmul.f32 -1.442695, %v3710_v63  ;;  %v3933_v63 = vld [vmem:[#allocation3 + $0x40] sm:$0xff] }
0x1f79   :  { %5889 = vpow2.f32 %v4796_v55 }
0x1f7a   :  { %5891 = vpow2.f32 %v4798_v21 }
0x1f7e   :  { %v5886_v50 = vpop.eup %5885 }
0x1f7f   :  { %3605 = vrot.lane.b32.xlu0 %v5886_v50, %s6105_s4 }
0x1f82   :  { %v5888_v52 = vpop.eup %5887 }
0x1f83   :  { %3724 = vrot.lane.b32.xlu1 %v5888_v52, %s6105_s4  ;;  %3600 = vrot.lane.b32.xlu0 %v7013_v51, %s6106_s27  ;;  %v5890_v38 = vpop.eup %5889 }
0x1f84   :  { %v3595_v56 = vadd.f32 1.0, %v5890_v38  ;;  %v5892_v40 = vpop.eup %5891 }
0x1f85   :  { %v3714_v34 = vadd.f32 1.0, %v5892_v40 }
0x1f86   :  { %5893 = vrcp.f32 %v3595_v56 }
0x1f87   :  { %3719 = vrot.lane.b32.xlu0 %v3444_v27, %s6106_s27  ;;  %5895 = vrcp.f32 %v3714_v34 }
0x1f90   :  { %v5894_v18 = vpop.eup %5893 }
0x1f91   :  { %v5896_v57 = vpop.eup %5895 }
0x1ff1   :  { %v3606_v15 = vpop.permute.xlu0 %3605 }
0x1ff2   :  { %v3608_v35 = vmul.f32 %v5894_v18, %v3606_v15 }
0x1ff4   :  { %3610 = vrot.lane.b32.xlu1 %v3608_v35, %s6106_s27 }
0x1ff5   :  { %v3725_v42 = vpop.permute.xlu1 %3724  ;;  %v3601_v45 = vpop.permute.xlu0 %3600 }
0x1ff6   :  { %v3727_v58 = vmul.f32 %v5896_v57, %v3725_v42  ;;  %v3603_v43 = vmul.f32 %v5894_v18, %v3601_v45 }
0x1ff8   :  { %3729 = vrot.lane.b32.xlu1 %v3727_v58, %s6106_s27 }
0x1ff9   :  { %v3720_v23 = vpop.permute.xlu0 %3719 }
0x1ffa   :  { %v3722_v49 = vmul.f32 %v5896_v57, %v3720_v23 }
0x2066   :  { %v3611_v46 = vpop.permute.xlu1 %3610 }
0x2067   :  { %v3613_v47 = vadd.f32 %v3611_v46, %v3603_v43 }
0x2069   :  { %5897 = vtanh.f32 %v3613_v47 }
0x206a   :  { %v3730_v28 = vpop.permute.xlu1 %3729 }
0x206b   :  { %v3732_v54 = vadd.f32 %v3730_v28, %v3722_v49  ;;  %v7083_v28 = vld [vmem:[%s7705_s9] ss:$0 sm:$0xff]  ;;  %s6108_s9 = smov 120  }
0x206d   :  { %5899 = vtanh.f32 %v3732_v54 }
0x2073   :  { %v5898_v62 = vpop.eup %5897 }
0x2074   :  { %3616 = vrot.lane.b32.xlu0 %v5898_v62, %s6105_s4 }
0x2077   :  { %v5900_v29 = vpop.eup %5899 }
0x2078   :  { %3735 = vrot.lane.b32.xlu1 %v5900_v29, %s6105_s4 }
0x20e6   :  { %v3617_v10 = vpop.permute.xlu0 %3616 }
0x20e7   :  { %v3619_v11 = vmul.f32 %v5894_v18, %v3617_v10 }
0x20e9   :  { %3621 = vrot.lane.b32.xlu0 %v3619_v11, %s6106_s27 }
0x20ea   :  { %v3736_v1 = vpop.permute.xlu1 %3735 }
0x20eb   :  { %v3738_v17 = vmul.f32 %v5896_v57, %v3736_v1 }
0x20ed   :  { %3629 = vrot.lane.b32.xlu0 %v3613_v47, %s6107_s28  ;;  %3740 = vrot.lane.b32.xlu1 %v3738_v17, %s6106_s27 }
0x215b   :  { %v3622_v6 = vpop.permute.xlu0 %3621 }
0x215c   :  { %v3624_v59 = vmul.f32 %v3622_v6, %v6976_v48 }
0x215e   :  { %3625 = vst.msk [vmem:[#allocation3 + $0x50] sm:$0xff] %vm252_vm2, %v3624_v59  ;;  %v3627_v37 = vadd.f32 %v3626_v32, %v3624_v59 }
0x215f   :  { %v3630_v24 = vpop.permute.xlu0 %3629  ;;  %v3741_v60 = vpop.permute.xlu1 %3740 }
0x2160   :  { %v3632_v9 = vmul.f32 %v3630_v24, %v6976_v48  ;;  %v3743_v20 = vmul.f32 %v3741_v60, %v7047_v61  ;;  %5442 = vmatmul.mubr.msk.f32.vlgmr.msra.gmra.mrb[34].mxu1 %vm252_vm2, %v3627_v37  ;;  %v3928_v48 = vld [vmem:[#allocation3 + $0x18] sm:$0xff] }
0x2161   :  { %5704 = vmatpush3.bf16.msra.mxu1 %v5701_v41  ;;  %5463 = vmatprep.mubr.msk.f32.mxu1 %vm252_vm2, %v3925_v0 }
0x2162   :  { %v3634_v16 = vadd.f32 %v3633_v39, %v3632_v9  ;;  %5453 = vmatmul.mubr.msk.f32.vlgmr.msra.gmra.mrb[46].mxu0 %vm252_vm2, %v3743_v20  ;;  %5706 = vmatprep.subr.bf16.mxu1 %v5705_v19 }
0x2164   :  { %3899 = vrot.lane.b32.xlu0 %v3634_v16, %s6106_s27 }
0x2165   :  { %5708 = vmatpush3.bf16.msra.mxu1 %v5705_v19  ;;  %v3935_v7 = vld [vmem:[#allocation3 + $0x50] sm:$0xff] }
0x2168   :  { %5464 = vmatmul.mubr.msk.f32.vlgmr.msra.gmra.mrb[36].mxu1 %vm252_vm2, %v3926_v36 }
0x2169   :  { %5466 = vmatprep.mubr.msk.f32.mxu1 %vm252_vm2, %v3927_v30 }
0x216c   :  { %5467 = vmatmul.mubr.msk.f32.gmra.mrb[38].mxu1 %vm252_vm2, %v3928_v48 }
0x216d   :  { %5469 = vmatprep.mubr.msk.f32.mxu1 %vm252_vm2, %v3929_v14 }
0x2170   :  { %5470 = vmatmul.mubr.msk.f32.gmra.mrb[40].mxu1 %vm252_vm2, %v3930_v5 }
0x2171   :  { %5472 = vmatprep.mubr.msk.f32.mxu1 %vm252_vm2, %v3931_v13 }
0x2174   :  { %5473 = vmatmul.mubr.msk.f32.gmra.mrb[42].mxu1 %vm252_vm2, %v3932_v2 }
0x2175   :  { %5475 = vmatprep.mubr.msk.f32.mxu1 %vm252_vm2, %v3933_v63 }
0x2178   :  { %5476 = vmatmul.mubr.msk.f32.gmra.mrb[44].mxu1 %vm252_vm2, %v3934_v25 }
0x2179   :  { %5478 = vmatprep.mubr.msk.f32.mxu1 %vm252_vm2, %v3935_v7 }
0x21d6   :  { %v3900_v43 = vpop.permute.xlu0 %3899 }
0x2233   :  { %v3813_v4 = vpop.f32.mrb[34].mxu1 }
0x2234   :  { %v5443_v50 = vpop.f32.mrb[35].mxu1 }
0x2235   :  { %v3886_v3 = vpop.f32.mrb[46].mxu0 }
0x2236   :  { %v3887_v12 = vadd.f32 %v3886_v3, %v3813_v4  ;;  %v5454_v51 = vpop.f32.mrb[47].mxu0 }
0x2238   :  { %v3890_v26 = vadd.f32 %v6746_v53, %v3887_v12 }
0x223a   :  { %5901 = vtanh.f32 %v3890_v26  ;;  %v4801_v35 = vmul.f32 -1.442695, %v3890_v26 }
0x223b   :  { %v5465_v52 = vpop.f32.mrb[36].mxu1 }
0x223c   :  { %v4050_v44 = vpop.f32.mrb[37].mxu1  ;;  %5903 = vpow2.f32 %v4801_v35  ;;  %v7091_v29 = vadd.f32 %v5465_v52, %v7083_v28 }
0x223d   :  { %v7086_v54 = vadd.f32 %v7083_v28, %v4050_v44 }
0x223e   :  { %v4246_v41 = vsel %vm4242_vm4, %v7091_v29, -inf  ;;  %v4427_v32 = vsel %vm4423_vm5, %v7091_v29, -inf  ;;  %v4113_v30 = vsel %vm4109_vm3, %v7091_v29, -inf }
0x223f   :  { %v5468_v27 = vpop.f32.mrb[38].mxu1  ;;  %v4110_v62 = vsel %vm4109_vm3, %v7086_v54, -inf  ;;  %v4243_v33 = vsel %vm4242_vm4, %v7086_v54, -inf  ;;  %v4424_v7 = vsel %vm4423_vm5, %v7086_v54, -inf }
0x2240   :  { %v7069_v55 = vpop.f32.mrb[39].mxu1  ;;  %v7096_v8 = vadd.f32 %v5468_v27, %v7083_v28 }
0x2241   :  { %v7138_v36 = vadd.f32 %v7083_v28, %v7069_v55 }
0x2242   :  { %v4252_v11 = vsel %vm4242_vm4, %v7096_v8, -inf  ;;  %v4433_v59 = vsel %vm4423_vm5, %v7096_v8, -inf  ;;  %v4119_v60 = vsel %vm4109_vm3, %v7096_v8, -inf }
0x2243   :  { %v5471_v21 = vpop.f32.mrb[40].mxu1  ;;  %v4249_v14 = vsel %vm4242_vm4, %v7138_v36, -inf  ;;  %v4430_v4 = vsel %vm4423_vm5, %v7138_v36, -inf  ;;  %v4116_v44 = vsel %vm4109_vm3, %v7138_v36, -inf }
0x2244   :  { %v5902_v38 = vpop.eup %5901  ;;  %v7071_v56 = vpop.f32.mrb[41].mxu1  ;;  %v7101_v10 = vadd.f32 %v5471_v21, %v7083_v28 }
0x2245   :  { %3904 = vrot.lane.b32.xlu1 %v5902_v38, %s6105_s4  ;;  %v7144_v48 = vadd.f32 %v7083_v28, %v7071_v56 }
0x2246   :  { %v5904_v53 = vpop.eup %5903  ;;  %v4258_v17 = vsel %vm4242_vm4, %v7101_v10, -inf  ;;  %v4439_v37 = vsel %vm4423_vm5, %v7101_v10, -inf  ;;  %v4125_v39 = vsel %vm4109_vm3, %v7101_v10, -inf }
0x2247   :  { %v5474_v40 = vpop.f32.mrb[42].mxu1  ;;  %v3894_v57 = vadd.f32 1.0, %v5904_v53  ;;  %v4255_v13 = vsel %vm4242_vm4, %v7144_v48, -inf  ;;  %v4436_v50 = vsel %vm4423_vm5, %v7144_v48, -inf  ;;  %v4122_v27 = vsel %vm4109_vm3, %v7144_v48, -inf }
0x2248   :  { %v7074_v34 = vpop.f32.mrb[43].mxu1  ;;  %v7106_v1 = vadd.f32 %v5474_v40, %v7083_v28 }
0x2249   :  { %5905 = vrcp.f32 %v3894_v57  ;;  %v7150_v5 = vadd.f32 %v7083_v28, %v7074_v34 }
0x224a   :  { %v4264_v22 = vsel %vm4242_vm4, %v7106_v1, -inf  ;;  %v4445_v19 = vsel %vm4423_vm5, %v7106_v1, -inf  ;;  %v4131_v9 = vsel %vm4109_vm3, %v7106_v1, -inf }
0x224b   :  { %v5477_v18 = vpop.f32.mrb[44].mxu1  ;;  %v4261_v63 = vsel %vm4242_vm4, %v7150_v5, -inf  ;;  %v4442_v12 = vsel %vm4423_vm5, %v7150_v5, -inf  ;;  %v4128_v55 = vsel %vm4109_vm3, %v7150_v5, -inf }
0x224c   :  { %v7076_v15 = vpop.f32.mrb[45].mxu1  ;;  %v7111_v6 = vadd.f32 %v5477_v18, %v7083_v28 }
0x224d   :  { %v7156_v2 = vadd.f32 %v7083_v28, %v7076_v15 }
0x224e   :  { %v4270_v31 = vsel %vm4242_vm4, %v7111_v6, -inf  ;;  %v4451_v24 = vsel %vm4423_vm5, %v7111_v6, -inf  ;;  %v4137_v20 = vsel %vm4109_vm3, %v7111_v6, -inf }
0x224f   :  { %v4267_v25 = vsel %vm4242_vm4, %v7156_v2, -inf  ;;  %v4448_v26 = vsel %vm4423_vm5, %v7156_v2, -inf  ;;  %v4134_v21 = vsel %vm4109_vm3, %v7156_v2, -inf }
0x2253   :  { %v5906_v42 = vpop.eup %5905 }
0x2254   :  { %v3902_v23 = vmul.f32 %v5906_v42, %v3900_v43 }
0x22b7   :  { %v3905_v58 = vpop.permute.xlu1 %3904 }
0x22b8   :  { %v3907_v45 = vmul.f32 %v5906_v42, %v3905_v58 }
0x22ba   :  { %3909 = vrot.lane.b32.xlu1 %v3907_v45, %s6106_s27 }
0x232c   :  { %v3910_v46 = vpop.permute.xlu1 %3909 }
0x232d   :  { %v3912_v47 = vadd.f32 %v3910_v46, %v3902_v23 }
0x232f   :  { %5907 = vtanh.f32 %v3912_v47 }
0x2339   :  { %v5908_v49 = vpop.eup %5907 }
0x233a   :  { %3915 = vrot.lane.b32.xlu0 %v5908_v49, %s6105_s4  ;;  %s6109_s4 = smov 112  }
0x2359   :  { %4111 = vmax.xlane.f32.xlu0 %v4110_v62 }
0x235d   :  { %4244 = vmax.xlane.f32.xlu0 %v4243_v33 }
0x2361   :  { %4247 = vmax.xlane.f32.xlu0 %v4246_v41 }
0x2365   :  { %4253 = vmax.xlane.f32.xlu0 %v4252_v11 }
0x2369   :  { %4259 = vmax.xlane.f32.xlu0 %v4258_v17 }
0x236d   :  { %4265 = vmax.xlane.f32.xlu0 %v4264_v22 }
0x2371   :  { %4271 = vmax.xlane.f32.xlu0 %v4270_v31 }
0x2375   :  { %4428 = vmax.xlane.f32.xlu0 %v4427_v32 }
0x2379   :  { %4434 = vmax.xlane.f32.xlu0 %v4433_v59 }
0x237d   :  { %4440 = vmax.xlane.f32.xlu0 %v4439_v37 }
0x2381   :  { %4446 = vmax.xlane.f32.xlu0 %v4445_v19 }
0x2385   :  { %4452 = vmax.xlane.f32.xlu0 %v4451_v24 }
0x2389   :  { %4120 = vmax.xlane.f32.xlu0 %v4119_v60 }
0x238d   :  { %4126 = vmax.xlane.f32.xlu0 %v4125_v39 }
0x2391   :  { %4132 = vmax.xlane.f32.xlu0 %v4131_v9 }
0x2395   :  { %4138 = vmax.xlane.f32.xlu0 %v4137_v20 }
0x23ac   :  { %v3916_v0 = vpop.permute.xlu0 %3915 }
0x23ad   :  { %v3918_v16 = vmul.f32 %v5906_v42, %v3916_v0 }
0x23af   :  { %3920 = vrot.lane.b32.xlu1 %v3918_v16, %s6106_s27 }
0x23d3   :  { %4114 = vmax.xlane.f32.xlu1 %v4113_v30 }
0x23d7   :  { %4250 = vmax.xlane.f32.xlu1 %v4249_v14 }
0x23db   :  { %4256 = vmax.xlane.f32.xlu1 %v4255_v13 }
0x23df   :  { %4262 = vmax.xlane.f32.xlu1 %v4261_v63 }
0x23e3   :  { %4268 = vmax.xlane.f32.xlu1 %v4267_v25 }
0x23e6   :  { %v4112_v3 = vpop.xlane.xlu0 %4111 }
0x23e7   :  { %4425 = vmax.xlane.f32.xlu1 %v4424_v7  ;;  %v4146_v51 = vsub.f32 %v7086_v54, %v4112_v3 }
0x23e9   :  { %v4158_v52 = vmul.f32 1.442695, %v4146_v51 }
0x23ea   :  { %v7185_v40 = vpop.xlane.xlu0 %4244 }
0x23eb   :  { %4431 = vmax.xlane.f32.xlu1 %v4430_v4  ;;  %5909 = vpow2.f32 %v4158_v52 }
0x23ee   :  { %v4248_v34 = vpop.xlane.xlu0 %4247 }
0x23ef   :  { %4437 = vmax.xlane.f32.xlu1 %v4436_v50 }
0x23f2   :  { %v7187_v18 = vpop.xlane.xlu0 %4253 }
0x23f3   :  { %4443 = vmax.xlane.f32.xlu1 %v4442_v12 }
0x23f5   :  { %v7181_v38 = vpop.eup %5909 }
0x23f6   :  { %v4182_v56 = vsel %vm4109_vm3, %v7181_v38, 0.0  ;;  %v7191_v53 = vpop.xlane.xlu0 %4259 }
0x23f7   :  { %4449 = vmax.xlane.f32.xlu1 %v4448_v26 }
0x23fa   :  { %v7193_v42 = vpop.xlane.xlu0 %4265 }
0x23fb   :  { %4117 = vmax.xlane.f32.xlu1 %v4116_v44  ;;  %v4280_v44 = vsub.f32 %v7091_v29, %v4248_v34 }
0x23fe   :  { %v7196_v58 = vpop.xlane.xlu0 %4271 }
0x23ff   :  { %4123 = vmax.xlane.f32.xlu1 %v4122_v27 }
0x2402   :  { %v7198_v45 = vpop.xlane.xlu0 %4428 }
0x2403   :  { %4129 = vmax.xlane.f32.xlu1 %v4128_v55  ;;  %v4293_v55 = vmul.f32 1.442695, %v4280_v44 }
0x2406   :  { %v7200_v43 = vpop.xlane.xlu0 %4434 }
0x2407   :  { %4135 = vmax.xlane.f32.xlu1 %v4134_v21 }
0x240a   :  { %v7202_v23 = vpop.xlane.xlu0 %4440 }
0x240b   :  { %4183 = vadd.xlane.f32.xlu1 %v4182_v56 }
0x240e   :  { %v7204_v46 = vpop.xlane.xlu0 %4446 }
0x2421   :  { %v3921_v15 = vpop.permute.xlu1 %3920 }
0x2422   :  { %v3923_v35 = vmul.f32 %v3921_v15, %v7047_v61  ;;  %v7206_v61 = vpop.xlane.xlu0 %4452 }
0x2424   :  { %3924 = vst.msk [vmem:[#allocation3 + $0x58] sm:$0xff] %vm252_vm2, %v3923_v35 }
0x2426   :  { %v4121_v47 = vpop.xlane.xlu0 %4120 }
0x2427   :  { %v4149_v62 = vsub.f32 %v7096_v8, %v4121_v47 }
0x2429   :  { %v4164_v17 = vmul.f32 1.442695, %v4149_v62 }
0x242a   :  { %v4127_v49 = vpop.xlane.xlu0 %4126 }
0x242b   :  { %v3936_v57 = vld [vmem:[#allocation3 + $0x58] sm:$0xff]  ;;  %v4151_v22 = vsub.f32 %v7101_v10, %v4127_v49 }
0x242c   :  { %5479 = vmatmul.mubr.msk.f32.gmra.mrb[46].mxu1 %vm252_vm2, %v3936_v57 }
0x242d   :  { %v4168_v59 = vmul.f32 1.442695, %v4151_v22 }
0x242e   :  { %v4133_v11 = vpop.xlane.xlu0 %4132 }
0x242f   :  { %v4153_v37 = vsub.f32 %v7106_v1, %v4133_v11 }
0x2431   :  { %v4172_v60 = vmul.f32 1.442695, %v4153_v37 }
0x2432   :  { %v4139_v19 = vpop.xlane.xlu0 %4138 }
0x2433   :  { %v4155_v39 = vsub.f32 %v7111_v6, %v4139_v19 }
0x2435   :  { %v4176_v0 = vmul.f32 1.442695, %v4155_v39 }
0x2460   :  { %v4115_v33 = vpop.xlane.xlu1 %4114 }
0x2461   :  { %v4147_v41 = vsub.f32 %v7091_v29, %v4115_v33 }
0x2463   :  { %v4160_v31 = vmul.f32 1.442695, %v4147_v41 }
0x2464   :  { %v7211_v32 = vpop.xlane.xlu1 %4250 }
0x2465   :  { %5911 = vpow2.f32 %v4160_v31 }
0x2466   :  { %5913 = vpow2.f32 %v4164_v17 }
0x2467   :  { %5915 = vpow2.f32 %v4168_v59 }
0x2468   :  { %v4257_v24 = vpop.xlane.xlu1 %4256  ;;  %5917 = vpow2.f32 %v4172_v60 }
0x2469   :  { %5919 = vpow2.f32 %v4176_v0  ;;  %v4283_v21 = vsub.f32 %v7144_v48, %v4257_v24 }
0x246a   :  { %5921 = vpow2.f32 %v4293_v55 }
0x246b   :  { %v4299_v57 = vmul.f32 1.442695, %v4283_v21 }
0x246c   :  { %v4263_v9 = vpop.xlane.xlu1 %4262 }
0x246d   :  { %v4285_v47 = vsub.f32 %v7150_v5, %v4263_v9 }
0x246f   :  { %v7215_v20 = vpop.eup %5911  ;;  %v4303_v34 = vmul.f32 1.442695, %v4285_v47 }
0x2470   :  { %v4269_v16 = vpop.xlane.xlu1 %4268  ;;  %v4185_v30 = vsel %vm4109_vm3, %v7215_v20, 0.0  ;;  %v7219_v14 = vpop.eup %5913 }
0x2471   :  { %4186 = vadd.xlane.f32.xlu0 %v4185_v30  ;;  %v4191_v63 = vsel %vm4109_vm3, %v7219_v14, 0.0  ;;  %v7223_v25 = vpop.eup %5915  ;;  %v4287_v41 = vsub.f32 %v7156_v2, %v4269_v16 }
0x2472   :  { %v4197_v4 = vsel %vm4109_vm3, %v7223_v25, 0.0  ;;  %v7227_v50 = vpop.eup %5917 }
0x2473   :  { %7724 = vst [vmem:[#allocation4_spill] sm:$0xff] %v7227_v50  ;;  %v4203_v12 = vsel %vm4109_vm3, %v7227_v50, 0.0  ;;  %v7231_v51 = vpop.eup %5919  ;;  %v4307_v31 = vmul.f32 1.442695, %v4287_v41 }
0x2474   :  { %v4426_v13 = vpop.xlane.xlu1 %4425  ;;  %7725 = vst [vmem:[#allocation5_spill] sm:$0xff] %v7231_v51  ;;  %v4209_v52 = vsel %vm4109_vm3, %v7231_v51, 0.0  ;;  %v7246_v24 = vpop.eup %5921 }
0x2475   :  { %4192 = vadd.xlane.f32.xlu0 %v4191_v63  ;;  %v4460_v59 = vsub.f32 %v7086_v54, %v4426_v13 }
0x2477   :  { %v4472_v9 = vmul.f32 1.442695, %v4460_v59 }
0x2478   :  { %v4432_v7 = vpop.xlane.xlu1 %4431 }
0x2479   :  { %4198 = vadd.xlane.f32.xlu0 %v4197_v4  ;;  %v4462_v0 = vsub.f32 %v7138_v36, %v4432_v7 }
0x247b   :  { %v4476_v63 = vmul.f32 1.442695, %v4462_v0 }
0x247c   :  { %v4438_v3 = vpop.xlane.xlu1 %4437 }
0x247d   :  { %4204 = vadd.xlane.f32.xlu0 %v4203_v12  ;;  %v4464_v4 = vsub.f32 %v7144_v48, %v4438_v3 }
0x247f   :  { %v4480_v44 = vmul.f32 1.442695, %v4464_v4 }
0x2480   :  { %v4444_v26 = vpop.xlane.xlu1 %4443 }
0x2481   :  { %4210 = vadd.xlane.f32.xlu0 %v4209_v52  ;;  %v4466_v55 = vsub.f32 %v7150_v5, %v4444_v26 }
0x2484   :  { %v7236_v27 = vpop.xlane.xlu1 %4449 }
0x2488   :  { %v4118_v56 = vpop.xlane.xlu1 %4117 }
0x2489   :  { %v4148_v15 = vsub.f32 %v7138_v36, %v4118_v56 }
0x248b   :  { %v4162_v35 = vmul.f32 1.442695, %v4148_v15  ;;  %v4279_v15 = vsub.f32 %v7086_v54, %v7185_v40 }
0x248c   :  { %v4124_v49 = vpop.xlane.xlu1 %4123 }
0x248d   :  { %5923 = vpow2.f32 %v4162_v35  ;;  %v4150_v62 = vsub.f32 %v7144_v48, %v4124_v49  ;;  %v4484_v35 = vmul.f32 1.442695, %v4466_v55  ;;  %v4291_v47 = vmul.f32 1.442695, %v4279_v15 }
0x248e   :  { %5925 = vpow2.f32 %v4299_v57  ;;  %v4281_v49 = vsub.f32 %v7138_v36, %v7211_v32  ;;  %v4284_v32 = vsub.f32 %v7101_v10, %v7191_v53 }
0x248f   :  { %v4166_v33 = vmul.f32 1.442695, %v4150_v62  ;;  %v4282_v62 = vsub.f32 %v7096_v8, %v7187_v18  ;;  %v4286_v18 = vsub.f32 %v7106_v1, %v7193_v42 }
0x2490   :  { %v4130_v11 = vpop.xlane.xlu1 %4129 }
0x2491   :  { %5927 = vpow2.f32 %v4166_v33  ;;  %v4152_v17 = vsub.f32 %v7150_v5, %v4130_v11  ;;  %v4295_v33 = vmul.f32 1.442695, %v4281_v49  ;;  %v4297_v41 = vmul.f32 1.442695, %v4282_v62 }
0x2492   :  { %5929 = vpow2.f32 %v4303_v34  ;;  %v4305_v53 = vmul.f32 1.442695, %v4286_v18  ;;  %v4469_v62 = vsub.f32 %v7111_v6, %v7206_v61 }
0x2493   :  { %v4170_v22 = vmul.f32 1.442695, %v4152_v17  ;;  %v4301_v17 = vmul.f32 1.442695, %v4284_v32  ;;  %v4468_v32 = vsub.f32 %v7156_v2, %v7236_v27 }
0x2494   :  { %v4136_v37 = vpop.xlane.xlu1 %4135 }
0x2495   :  { %5931 = vpow2.f32 %v4170_v22  ;;  %v4154_v19 = vsub.f32 %v7156_v2, %v4136_v37  ;;  %v4461_v37 = vsub.f32 %v7091_v29, %v7198_v45  ;;  %v4465_v45 = vsub.f32 %v7101_v10, %v7202_v23 }
0x2496   :  { %5933 = vpow2.f32 %v4307_v31  ;;  %v4288_v31 = vsub.f32 %v7111_v6, %v7196_v58  ;;  %v4463_v58 = vsub.f32 %v7096_v8, %v7200_v43  ;;  %v4467_v43 = vsub.f32 %v7106_v1, %v7204_v46 }
0x2497   :  { %v7248_v60 = vpop.eup %5923  ;;  %v4174_v39 = vmul.f32 1.442695, %v4154_v19  ;;  %4329 = vrot.lane.b32.xlu0 %v7246_v24, %s6108_s9 }
0x2498   :  { %7726 = vst [vmem:[#allocation6_spill] sm:$0xff] %v7248_v60  ;;  %v4188_v16 = vsel %vm4109_vm3, %v7248_v60, 0.0  ;;  %v7255_v30 = vpop.eup %5925  ;;  %v4309_v42 = vmul.f32 1.442695, %v4288_v31  ;;  %v4478_v0 = vmul.f32 1.442695, %v4463_v58 }
0x2499   :  { %5935 = vpow2.f32 %v4174_v39  ;;  %4189 = vadd.xlane.f32.xlu1 %v4188_v16  ;;  %7727 = vst [vmem:[#allocation7_spill] sm:$0xff] %v7255_v30  ;;  %v4474_v39 = vmul.f32 1.442695, %v4461_v37 }
0x249a   :  { %5937 = vpow2.f32 %v4472_v9 }
0x249b   :  { %v7257_v13 = vpop.eup %5927  ;;  %4335 = vrot.lane.b32.xlu0 %v7255_v30, %s6108_s9  ;;  %5939 = vpow2.f32 %v4476_v63  ;;  %v4482_v63 = vmul.f32 1.442695, %v4465_v45 }
0x249c   :  { %7728 = vst [vmem:[#allocation8_spill] sm:$0xff] %v7257_v13  ;;  %v4194_v12 = vsel %vm4109_vm3, %v7257_v13, 0.0  ;;  %v7264_v7 = vpop.eup %5929  ;;  %5941 = vpow2.f32 %v4480_v44 }
0x249d   :  { %4195 = vadd.xlane.f32.xlu1 %v4194_v12  ;;  %7729 = vst [vmem:[#allocation9_spill] sm:$0xff] %v7264_v7  ;;  %5943 = vpow2.f32 %v4484_v35  ;;  %v4486_v12 = vmul.f32 1.442695, %v4467_v43 }
0x249e   :  { %5945 = vpow2.f32 %v4291_v47 }
0x249f   :  { %v7266_v52 = vpop.eup %5931  ;;  %4339 = vrot.lane.b32.xlu0 %v7264_v7, %s6108_s9  ;;  %5947 = vpow2.f32 %v4295_v33 }
0x24a0   :  { %7730 = vst [vmem:[#allocation10_spill] sm:$0xff] %v7266_v52  ;;  %v4200_v21 = vsel %vm4109_vm3, %v7266_v52, 0.0  ;;  %v7273_v3 = vpop.eup %5933  ;;  %5949 = vpow2.f32 %v4297_v41 }
0x24a1   :  { %4201 = vadd.xlane.f32.xlu1 %v4200_v21  ;;  %7731 = vst [vmem:[#allocation11_spill] sm:$0xff] %v7273_v3  ;;  %5951 = vpow2.f32 %v4301_v17  ;;  %v4488_v17 = vmul.f32 1.442695, %v4468_v32 }
0x24a2   :  { %5953 = vpow2.f32 %v4305_v53  ;;  %v7383_v53 = vpop.xlane.xlu1 %4183 }
0x24a3   :  { %v7275_v56 = vpop.eup %5935  ;;  %4343 = vrot.lane.b32.xlu0 %v7273_v3, %s6108_s9  ;;  %5955 = vpow2.f32 %v4309_v42 }
0x24a4   :  { %7732 = vst [vmem:[#allocation12_spill] sm:$0xff] %v7275_v56  ;;  %v4206_v57 = vsel %vm4109_vm3, %v7275_v56, 0.0  ;;  %v7283_v26 = vpop.eup %5937  ;;  %5957 = vpow2.f32 %v4474_v39 }
0x24a5   :  { %4207 = vadd.xlane.f32.xlu1 %v4206_v57  ;;  %v7289_v40 = vpop.eup %5939  ;;  %5959 = vpow2.f32 %v4478_v0 }
0x24a6   :  { %7733 = vst [vmem:[#allocation13_spill] sm:$0xff] %v7289_v40  ;;  %v7295_v34 = vpop.eup %5941  ;;  %5961 = vpow2.f32 %v4482_v63 }
0x24a7   :  { %4508 = vrot.lane.b32.xlu0 %v7283_v26, %s6109_s4  ;;  %7734 = vst [vmem:[#allocation14_spill] sm:$0xff] %v7295_v34  ;;  %v7301_v11 = vpop.eup %5943  ;;  %5963 = vpow2.f32 %v4486_v12 }
0x24a8   :  { %7735 = vst [vmem:[#allocation15_spill] sm:$0xff] %v7301_v11  ;;  %v7307_v22 = vpop.eup %5945 }
0x24a9   :  { %v7313_v59 = vpop.eup %5947 }
0x24aa   :  { %v7319_v19 = vpop.eup %5949 }
0x24ab   :  { %4512 = vrot.lane.b32.xlu0 %v7289_v40, %s6109_s4  ;;  %v7325_v9 = vpop.eup %5951 }
0x24ac   :  { %v7331_v16 = vpop.eup %5953 }
0x24ad   :  { %v7337_v4 = vpop.eup %5955 }
0x24ae   :  { %7736 = vst [vmem:[#allocation16_spill] sm:$0xff] %v7337_v4  ;;  %v7341_v44 = vpop.eup %5957 }
0x24af   :  { %4516 = vrot.lane.b32.xlu0 %v7295_v34, %s6109_s4  ;;  %v7345_v23 = vpop.eup %5959 }
0x24b0   :  { %v7349_v55 = vpop.eup %5961 }
0x24b1   :  { %v7353_v46 = vpop.eup %5963 }
0x24b2   :  { %7737 = vst [vmem:[#allocation17_spill] sm:$0xff] %v7353_v46 }
0x24b3   :  { %4520 = vrot.lane.b32.xlu0 %v7301_v11, %s6109_s4 }
0x24b6   :  { %4327 = vrot.lane.b32.xlu1 %v7307_v22, %s6108_s9 }
0x24ba   :  { %4331 = vrot.lane.b32.xlu1 %v7313_v59, %s6108_s9 }
0x24be   :  { %4333 = vrot.lane.b32.xlu1 %v7319_v19, %s6108_s9 }
0x24c2   :  { %4337 = vrot.lane.b32.xlu1 %v7325_v9, %s6108_s9 }
0x24c6   :  { %4341 = vrot.lane.b32.xlu1 %v7331_v16, %s6108_s9 }
0x24ca   :  { %4345 = vrot.lane.b32.xlu1 %v7337_v4, %s6108_s9 }
0x24ce   :  { %4510 = vrot.lane.b32.xlu1 %v7341_v44, %s6109_s4 }
0x24d2   :  { %4514 = vrot.lane.b32.xlu1 %v7345_v23, %s6109_s4 }
0x24d6   :  { %4518 = vrot.lane.b32.xlu1 %v7349_v55, %s6109_s4 }
0x24da   :  { %4522 = vrot.lane.b32.xlu1 %v7353_v46, %s6109_s4 }
0x24fe   :  { %v7385_v31 = vpop.xlane.xlu0 %4186 }
0x24ff   :  { %v5480_v21 = vpop.f32.mrb[46].mxu1 }
0x2500   :  { %v7358_v15 = vadd.f32 %v5480_v21, %v7083_v28  ;;  %v4100_v35 = vpop.f32.mrb[47].mxu1 }
0x2501   :  { %v7361_v57 = vadd.f32 %v7083_v28, %v4100_v35  ;;  %v4490_v28 = vmul.f32 1.442695, %v4469_v62 }
0x2502   :  { %v4276_v47 = vsel %vm4242_vm4, %v7358_v15, -inf  ;;  %v4457_v33 = vsel %vm4423_vm5, %v7358_v15, -inf  ;;  %v7389_v27 = vpop.xlane.xlu0 %4192  ;;  %v4143_v12 = vsel %vm4109_vm3, %v7358_v15, -inf }
0x2503   :  { %4277 = vmax.xlane.f32.xlu0 %v4276_v47  ;;  %v4273_v49 = vsel %vm4242_vm4, %v7361_v57, -inf  ;;  %v4454_v41 = vsel %vm4423_vm5, %v7361_v57, -inf  ;;  %5965 = vpow2.f32 %v4490_v28  ;;  %v4140_v21 = vsel %vm4109_vm3, %v7361_v57, -inf }
0x2504   :  { %4274 = vmax.xlane.f32.xlu1 %v4273_v49  ;;  %5967 = vpow2.f32 %v4488_v17 }
0x2506   :  { %v7393_v39 = vpop.xlane.xlu0 %4198 }
0x2507   :  { %4458 = vmax.xlane.f32.xlu0 %v4457_v33 }
0x2508   :  { %4455 = vmax.xlane.f32.xlu1 %v4454_v41 }
0x250a   :  { %v7399_v45 = vpop.xlane.xlu0 %4204 }
0x250d   :  { %v7375_v18 = vpop.eup %5965 }
0x250e   :  { %7738 = vst [vmem:[#allocation18_spill] sm:$0xff] %v7375_v18  ;;  %v7379_v61 = vpop.eup %5967  ;;  %v7401_v43 = vpop.xlane.xlu0 %4210 }
0x250f   :  { %7739 = vst [vmem:[#allocation19_spill] sm:$0xff] %v7379_v61 }
0x2512   :  { %v4330_v49 = vpop.permute.xlu0 %4329 }
0x2513   :  { %v4366_v62 = vsel %vm4109_vm3, %v4330_v49, 0.0 }
0x2516   :  { %v4336_v28 = vpop.permute.xlu0 %4335 }
0x2519   :  { %4526 = vrot.lane.b32.xlu1 %v7375_v18, %s6109_s4 }
0x251a   :  { %v4340_v17 = vpop.permute.xlu0 %4339 }
0x251d   :  { %4524 = vrot.lane.b32.xlu0 %v7379_v61, %s6109_s4 }
0x251e   :  { %v4344_v61 = vpop.permute.xlu0 %4343 }
0x2522   :  { %v7410_v3 = vpop.permute.xlu0 %4508 }
0x2526   :  { %v7387_v42 = vpop.xlane.xlu1 %4189  ;;  %v7412_v11 = vpop.permute.xlu0 %4512 }
0x252a   :  { %v7391_v37 = vpop.xlane.xlu1 %4195 }
0x252e   :  { %v7395_v58 = vpop.xlane.xlu1 %4201 }
0x2532   :  { %v7397_v0 = vpop.xlane.xlu1 %4207 }
0x2536   :  { %v4328_v63 = vpop.permute.xlu1 %4327 }
0x2537   :  { %v4363_v47 = vsel %vm4109_vm3, %v4328_v63, 0.0 }
0x253a   :  { %v4332_v35 = vpop.permute.xlu1 %4331 }
0x253c   :  { %4144 = vmax.xlane.f32.xlu0 %v4143_v12 }
0x253d   :  { %4141 = vmax.xlane.f32.xlu1 %v4140_v21 }
0x253e   :  { %v4334_v33 = vpop.permute.xlu1 %4333 }
0x253f   :  { %v4372_v41 = vsel %vm4109_vm3, %v4334_v33, 0.0 }
0x2540   :  { %4364 = vadd.xlane.f32.xlu0 %v4363_v47  ;;  %v7414_v47 = vpop.permute.xlu0 %4516 }
0x2542   :  { %v4338_v32 = vpop.permute.xlu1 %4337 }
0x2544   :  { %4367 = vadd.xlane.f32.xlu0 %v4366_v62  ;;  %v7416_v52 = vpop.permute.xlu0 %4520 }
0x2546   :  { %v4342_v12 = vpop.permute.xlu1 %4341 }
0x2548   :  { %4373 = vadd.xlane.f32.xlu0 %v4372_v41 }
0x254a   :  { %v4346_v56 = vpop.permute.xlu1 %4345 }
0x254e   :  { %v4511_v21 = vpop.permute.xlu1 %4510 }
0x2552   :  { %v4515_v63 = vpop.permute.xlu1 %4514 }
0x2556   :  { %v4519_v49 = vpop.permute.xlu1 %4518 }
0x255a   :  { %v7418_v62 = vpop.permute.xlu1 %4522 }
0x2590   :  { %v4278_v33 = vpop.xlane.xlu0 %4277 }
0x2591   :  { %v4290_v41 = vsub.f32 %v7358_v15, %v4278_v33  ;;  %v4275_v18 = vpop.xlane.xlu1 %4274 }
0x2592   :  { %v4289_v7 = vsub.f32 %v7361_v57, %v4275_v18  ;;  %v4375_v18 = vsel %vm4109_vm3, %v4336_v28, 0.0  ;;  %v4387_v28 = vsel %vm4109_vm3, %v4344_v61, 0.0 }
0x2593   :  { %v4313_v34 = vmul.f32 1.442695, %v4290_v41  ;;  %v4390_v41 = vsel %vm4109_vm3, %v4346_v56, 0.0  ;;  %v4553_v56 = vsel %vm4109_vm3, %v4515_v63, 0.0  ;;  %v4550_v63 = vsel %vm4109_vm3, %v7412_v11, 0.0 }
0x2594   :  { %v4311_v51 = vmul.f32 1.442695, %v4289_v7  ;;  %v4459_v13 = vpop.xlane.xlu0 %4458 }
0x2595   :  { %5969 = vpow2.f32 %v4313_v34  ;;  %v4471_v4 = vsub.f32 %v7358_v15, %v4459_v13  ;;  %v4456_v46 = vpop.xlane.xlu1 %4455  ;;  %v4384_v34 = vsel %vm4109_vm3, %v4342_v12, 0.0 }
0x2596   :  { %5971 = vpow2.f32 %v4311_v51  ;;  %v4470_v30 = vsub.f32 %v7361_v57, %v4456_v46 }
0x2597   :  { %v4494_v40 = vmul.f32 1.442695, %v4471_v4 }
0x2598   :  { %v4492_v50 = vmul.f32 1.442695, %v4470_v30  ;;  %v4525_v51 = vpop.permute.xlu0 %4524 }
0x2599   :  { %5973 = vpow2.f32 %v4494_v40  ;;  %v4527_v30 = vpop.permute.xlu1 %4526  ;;  %v4369_v40 = vsel %vm4109_vm3, %v4332_v35, 0.0  ;;  %v4547_v35 = vsel %vm4109_vm3, %v4511_v21, 0.0  ;;  %v4559_v21 = vsel %vm4109_vm3, %v4519_v49, 0.0 }
0x259a   :  { %5975 = vpow2.f32 %v4492_v50  ;;  %v4378_v50 = vsel %vm4109_vm3, %v4338_v32, 0.0 }
0x259b   :  { %5977 = vrcp.f32 %v7385_v31  ;;  %v4544_v31 = vsel %vm4109_vm3, %v7410_v3, 0.0 }
0x259f   :  { %v7424_v60 = vpop.eup %5969 }
0x25a0   :  { %v7426_v33 = vpop.eup %5971  ;;  %4349 = vrot.lane.b32.xlu1 %v7424_v60, %s6108_s9 }
0x25a1   :  { %4347 = vrot.lane.b32.xlu0 %v7426_v33, %s6108_s9 }
0x25a3   :  { %v7432_v7 = vpop.eup %5973 }
0x25a4   :  { %v7434_v13 = vpop.eup %5975  ;;  %4530 = vrot.lane.b32.xlu1 %v7432_v7, %s6109_s4 }
0x25a5   :  { %7740 = vst [vmem:[#allocation20_spill] sm:$0xff] %v7434_v13  ;;  %4528 = vrot.lane.b32.xlu0 %v7434_v13, %s6109_s4 }
0x25c4   :  { %4379 = vadd.xlane.f32.xlu0 %v4378_v50  ;;  %v4381_v50 = vsel %vm4109_vm3, %v4340_v17, 0.0 }
0x25c8   :  { %4385 = vadd.xlane.f32.xlu0 %v4384_v34  ;;  %4370 = vadd.xlane.f32.xlu1 %v4369_v40 }
0x25c9   :  { %v4145_v4 = vpop.xlane.xlu0 %4144 }
0x25ca   :  { %v4142_v46 = vpop.xlane.xlu1 %4141  ;;  %v4157_v17 = vsub.f32 %v7358_v15, %v4145_v4 }
0x25cb   :  { %v4156_v13 = vsub.f32 %v7361_v57, %v4142_v46 }
0x25cc   :  { %4391 = vadd.xlane.f32.xlu0 %v4390_v41  ;;  %4376 = vadd.xlane.f32.xlu1 %v4375_v18  ;;  %v4180_v61 = vmul.f32 1.442695, %v4157_v17  ;;  %v4556_v41 = vsel %vm4109_vm3, %v7414_v47, 0.0 }
0x25cd   :  { %v7446_v32 = vpop.xlane.xlu0 %4364  ;;  %v4178_v12 = vmul.f32 1.442695, %v4156_v13  ;;  %v5978_v13 = vpop.eup %5977 }
0x25ce   :  { %v4231_v4 = vmul.f32 %v5978_v13, %v7215_v20  ;;  %v4815_v13 = vmul.f32 -1.442695, %v7086_v54 }
0x25d0   :  { %4548 = vadd.xlane.f32.xlu0 %v4547_v35  ;;  %4382 = vadd.xlane.f32.xlu1 %v4381_v50  ;;  %v4571_v50 = vsel %vm4109_vm3, %v4527_v30, 0.0  ;;  %v4568_v30 = vsel %vm4109_vm3, %v4525_v51, 0.0 }
0x25d1   :  { %v4368_v40 = vpop.xlane.xlu0 %4367 }
0x25d2   :  { %5979 = vrcp.f32 %v4368_v40 }
0x25d3   :  { %5981 = vrcp.f32 %v7389_v27  ;;  %v4565_v27 = vsel %vm4109_vm3, %v7418_v62, 0.0 }
0x25d4   :  { %4554 = vadd.xlane.f32.xlu0 %v4553_v56  ;;  %4388 = vadd.xlane.f32.xlu1 %v4387_v28  ;;  %5983 = vpow2.f32 %v4178_v12 }
0x25d5   :  { %v4374_v34 = vpop.xlane.xlu0 %4373 }
0x25d6   :  { %5985 = vrcp.f32 %v4374_v34 }
0x25d7   :  { %5987 = vpow2.f32 %v4180_v61  ;;  %v4818_v61 = vmul.f32 -1.442695, %v7096_v8 }
0x25d8   :  { %4560 = vadd.xlane.f32.xlu0 %v4559_v21  ;;  %4545 = vadd.xlane.f32.xlu1 %v4544_v31  ;;  %v4816_v21 = vmul.f32 -1.442695, %v7091_v29 }
0x25da   :  { %5989 = vpow2.f32 %v4816_v21 }
0x25db   :  { %5991 = vpow2.f32 %v4815_v13 }
0x25dc   :  { %v5980_v46 = vpop.eup %5979  ;;  %4566 = vadd.xlane.f32.xlu0 %v4565_v27  ;;  %4551 = vadd.xlane.f32.xlu1 %v4550_v63  ;;  %v4817_v63 = vmul.f32 -1.442695, %v7138_v36  ;;  %v4820_v27 = vmul.f32 -1.442695, %v7101_v10  ;;  %5993 = vpow2.f32 %v4818_v61  ;;  %v4824_v36 = vmul.f32 -1.442695, %v7111_v6 }
0x25dd   :  { %v4412_v18 = vmul.f32 %v5980_v46, %v7246_v24  ;;  %v5982_v3 = vpop.eup %5981  ;;  %v4562_v24 = vsel %vm4109_vm3, %v7416_v52, 0.0  ;;  %v4819_v46 = vmul.f32 -1.442695, %v7144_v48 }
0x25de   :  { %v7464_v49 = vpop.eup %5983  ;;  %v4233_v35 = vmul.f32 %v5982_v3, %v7219_v14  ;;  %5995 = vpow2.f32 %v4817_v63 }
0x25df   :  { %v7470_v11 = vsel %vm4109_vm3, %v4231_v4, %v4412_v18  ;;  %v4212_v47 = vsel %vm4109_vm3, %v7464_v49, 0.0  ;;  %v4822_v4 = vmul.f32 -1.442695, %v7106_v1  ;;  %5997 = vpow2.f32 %v4820_v27 }
0x25e0   :  { %v5986_v62 = vpop.eup %5985  ;;  %4572 = vadd.xlane.f32.xlu0 %v4571_v50  ;;  %4557 = vadd.xlane.f32.xlu1 %v4556_v41  ;;  %5999 = vpow2.f32 %v4819_v46  ;;  %v4821_v50 = vmul.f32 -1.442695, %v7150_v5 }
0x25e1   :  { %v4414_v20 = vmul.f32 %v5986_v62, %v7319_v19  ;;  %v7482_v40 = vpop.eup %5987  ;;  %6001 = vpow2.f32 %v4822_v4 }
0x25e2   :  { %v4215_v14 = vsel %vm4109_vm3, %v7482_v40, 0.0 }
0x25e3   :  { %v7477_v12 = vsel %vm4109_vm3, %v4233_v35, %v4414_v20 }
0x25e4   :  { %4213 = vadd.xlane.f32.xlu0 %v4212_v47  ;;  %4563 = vadd.xlane.f32.xlu1 %v4562_v24  ;;  %v5990_v29 = vpop.eup %5989  ;;  %v4823_v24 = vmul.f32 -1.442695, %v7156_v2 }
0x25e5   :  { %v5992_v18 = vpop.eup %5991  ;;  %v4678_v54 = vadd.f32 1.0, %v5990_v29 }
0x25e6   :  { %v5994_v3 = vpop.eup %5993  ;;  %v4677_v41 = vadd.f32 1.0, %v5992_v18 }
0x25e7   :  { %6003 = vrcp.f32 %v4678_v54  ;;  %v4680_v62 = vadd.f32 1.0, %v5994_v3 }
0x25e8   :  { %4569 = vadd.xlane.f32.xlu1 %v4568_v30  ;;  %v5996_v8 = vpop.eup %5995  ;;  %6005 = vrcp.f32 %v4677_v41 }
0x25e9   :  { %v5998_v10 = vpop.eup %5997  ;;  %v4679_v35 = vadd.f32 1.0, %v5996_v8  ;;  %6007 = vpow2.f32 %v4821_v50 }
0x25ea   :  { %v6000_v48 = vpop.eup %5999  ;;  %v4682_v47 = vadd.f32 1.0, %v5998_v10  ;;  %6009 = vpow2.f32 %v4824_v36 }
0x25eb   :  { %v6002_v20 = vpop.eup %6001  ;;  %6011 = vrcp.f32 %v4680_v62  ;;  %v4681_v30 = vadd.f32 1.0, %v6000_v48 }
0x25ec   :  { %4216 = vadd.xlane.f32.xlu1 %v4215_v14  ;;  %6013 = vrcp.f32 %v4679_v35  ;;  %v4684_v14 = vadd.f32 1.0, %v6002_v20 }
0x25ed   :  { %6015 = vpow2.f32 %v4823_v24 }
0x25ee   :  { %6017 = vrcp.f32 %v4682_v47 }
0x25ef   :  { %6019 = vrcp.f32 %v4681_v30 }
0x25f0   :  { %6021 = vrcp.f32 %v4684_v14 }
0x25f1   :  { %6023 = vrcp.f32 %v7383_v53 }
0x25f2   :  { %6025 = vrcp.f32 %v7393_v39 }
0x25f3   :  { %6027 = vrcp.f32 %v7399_v45 }
0x25f4   :  { %6029 = vrcp.f32 %v7401_v43 }
0x25f5   :  { %6031 = vrcp.f32 %v7387_v42 }
0x2612   :  { %v4350_v19 = vpop.permute.xlu1 %4349 }
0x2613   :  { %v4396_v52 = vsel %vm4109_vm3, %v4350_v19, 0.0  ;;  %v4348_v28 = vpop.permute.xlu0 %4347 }
0x2614   :  { %v4393_v56 = vsel %vm4109_vm3, %v4348_v28, 0.0  ;;  %4397 = vadd.xlane.f32.xlu0 %v4396_v52  ;;  %v6004_v28 = vpop.eup %6003 }
0x2615   :  { %4394 = vadd.xlane.f32.xlu1 %v4393_v56  ;;  %v7501_v56 = vpop.eup %6005 }
0x2616   :  { %v4531_v34 = vpop.permute.xlu1 %4530  ;;  %v7504_v2 = vpop.eup %6007 }
0x2617   :  { %v4577_v17 = vsel %vm4109_vm3, %v4531_v34, 0.0  ;;  %v4529_v31 = vpop.permute.xlu0 %4528  ;;  %v6010_v34 = vpop.eup %6009  ;;  %v4683_v14 = vadd.f32 1.0, %v7504_v2 }
0x2618   :  { %v4574_v51 = vsel %vm4109_vm3, %v4529_v31, 0.0  ;;  %4578 = vadd.xlane.f32.xlu0 %v4577_v17  ;;  %v4686_v36 = vadd.f32 1.0, %v6010_v34 }
0x2619   :  { %4575 = vadd.xlane.f32.xlu1 %v4574_v51  ;;  %v7508_v51 = vpop.eup %6011 }
0x261a   :  { %v7511_v21 = vpop.eup %6013 }
0x261b   :  { %v7513_v53 = vpop.eup %6015 }
0x261c   :  { %v7516_v39 = vpop.eup %6017 }
0x261d   :  { %v7519_v43 = vpop.eup %6019 }
0x261e   :  { %v7521_v61 = vpop.eup %6021 }
0x261f   :  { %v6024_v42 = vpop.eup %6023 }
0x2620   :  { %v6026_v63 = vpop.eup %6025  ;;  %v4230_v47 = vmul.f32 %v6024_v42, %v7181_v38 }
0x2621   :  { %v7523_v4 = vpop.eup %6027 }
0x2651   :  { %v4380_v1 = vpop.xlane.xlu0 %4379 }
0x2655   :  { %v4371_v5 = vpop.xlane.xlu1 %4370  ;;  %v4386_v19 = vpop.xlane.xlu0 %4385 }
0x2659   :  { %v4377_v6 = vpop.xlane.xlu1 %4376  ;;  %v4392_v52 = vpop.xlane.xlu0 %4391 }
0x265d   :  { %v4383_v17 = vpop.xlane.xlu1 %4382  ;;  %v4549_v31 = vpop.xlane.xlu0 %4548 }
0x265e   :  { %6033 = vrcp.f32 %v4549_v31  ;;  %v7742_v31 = vld [vmem:[#allocation4_spill] sm:$0xff] }
0x265f   :  { %6035 = vrcp.f32 %v7391_v37  ;;  %v7525_v37 = vpop.eup %6029 }
0x2660   :  { %6037 = vrcp.f32 %v7446_v32  ;;  %v6032_v32 = vpop.eup %6031 }
0x2661   :  { %v4389_v45 = vpop.xlane.xlu1 %4388  ;;  %v4555_v13 = vpop.xlane.xlu0 %4554  ;;  %6039 = vrcp.f32 %v4380_v1 }
0x2662   :  { %6041 = vrcp.f32 %v4555_v13 }
0x2663   :  { %6043 = vrcp.f32 %v4371_v5  ;;  %v4235_v5 = vmul.f32 %v6026_v63, %v7223_v25  ;;  %v7744_v63 = vld [vmem:[#allocation7_spill] sm:$0xff] }
0x2664   :  { %6045 = vrcp.f32 %v4386_v19 }
0x2665   :  { %v4546_v27 = vpop.xlane.xlu1 %4545  ;;  %v4561_v46 = vpop.xlane.xlu0 %4560 }
0x2666   :  { %6047 = vrcp.f32 %v4546_v27 }
0x2667   :  { %6049 = vrcp.f32 %v4561_v46 }
0x2668   :  { %6051 = vrcp.f32 %v4377_v6  ;;  %v6034_v29 = vpop.eup %6033 }
0x2669   :  { %6053 = vrcp.f32 %v4392_v52  ;;  %v4552_v18 = vpop.xlane.xlu1 %4551  ;;  %v4567_v54 = vpop.xlane.xlu0 %4566  ;;  %v4593_v41 = vmul.f32 %v6034_v29, %v7341_v44  ;;  %v7746_v29 = vld [vmem:[#allocation16_spill] sm:$0xff] }
0x266a   :  { %v7527_v3 = vpop.eup %6035  ;;  %6055 = vrcp.f32 %v4552_v18 }
0x266b   :  { %v6038_v8 = vpop.eup %6037  ;;  %6057 = vrcp.f32 %v4567_v54  ;;  %v4617_v10 = vsel %vm56_vm0, %v7470_v11, %v4593_v41 }
0x266c   :  { %v6040_v50 = vpop.eup %6039  ;;  %6059 = vrcp.f32 %v7395_v58  ;;  %4630 = vst.msk [vmem:[%s7706_s10 + $0x8] sm:$0xff] %vm4628_vm6, %v4617_v10  ;;  %v4411_v1 = vmul.f32 %v6038_v8, %v7307_v22  ;;  %v7747_v8 = vld [vmem:[#allocation8_spill] sm:$0xff]  ;;  %v7748_v10 = vld [vmem:[#allocation5_spill] sm:$0xff] }
0x266d   :  { %v6042_v62 = vpop.eup %6041  ;;  %6061 = vrcp.f32 %v4383_v17  ;;  %v4558_v48 = vpop.xlane.xlu1 %4557  ;;  %4715 = vst.msk [vmem:[%s7706_s10 + $0x8] sm:$0xff] %vm4713_vm7, %v6004_v28  ;;  %v4416_v20 = vmul.f32 %v6040_v50, %v7325_v9  ;;  %v4234_v50 = vmul.f32 %v7527_v3, %v7747_v8  ;;  %v7749_v3 = vld [vmem:[#allocation14_spill] sm:$0xff] }
0x266e   :  { %v4573_v44 = vpop.xlane.xlu0 %4572  ;;  %v6044_v35 = vpop.eup %6043  ;;  %v4595_v58 = vmul.f32 %v6042_v62, %v7345_v23  ;;  %6063 = vrcp.f32 %v4558_v48  ;;  %v4604_v38 = vsel %vm4109_vm3, %v4230_v47, %v4411_v1  ;;  %v4239_v62 = vmul.f32 %v7525_v37, %v7748_v10  ;;  %v7750_v1 = vld [vmem:[#allocation9_spill] sm:$0xff] }
0x266f   :  { %v6046_v11 = vpop.eup %6045  ;;  %6065 = vrcp.f32 %v4573_v44  ;;  %v4413_v6 = vmul.f32 %v6044_v35, %v7313_v59  ;;  %v7741_v59 = vld [vmem:[#allocation6_spill] sm:$0xff] }
0x2670   :  { %v6048_v24 = vpop.eup %6047  ;;  %6067 = vrcp.f32 %v4686_v36  ;;  %v4619_v30 = vsel %vm56_vm0, %v7477_v12, %v4595_v58  ;;  %v4418_v52 = vmul.f32 %v6046_v11, %v7331_v16  ;;  %v4232_v34 = vmul.f32 %v6032_v32, %v7741_v59  ;;  %v7743_v16 = vld [vmem:[#allocation13_spill] sm:$0xff] }
0x2671   :  { %v6050_v22 = vpop.eup %6049  ;;  %6069 = vrcp.f32 %v4389_v45  ;;  %4632 = vst.msk [vmem:[%s7706_s10 + $0x18] sm:$0xff] %vm4628_vm6, %v4619_v30  ;;  %v4592_v9 = vmul.f32 %v6048_v24, %v7283_v26  ;;  %v4564_v23 = vpop.xlane.xlu1 %4563  ;;  %v4609_v26 = vsel %vm4109_vm3, %v4235_v5, %v4416_v20  ;;  %v7752_v30 = vld [vmem:[#allocation10_spill] sm:$0xff] }
0x2672   :  { %v6052_v19 = vpop.eup %6051  ;;  %4717 = vst.msk [vmem:[%s7706_s10 + $0x18] sm:$0xff] %vm4713_vm7, %v7508_v51  ;;  %v4597_v25 = vmul.f32 %v6050_v22, %v7349_v55  ;;  %6071 = vrcp.f32 %v4564_v23  ;;  %v4237_v51 = vmul.f32 %v7523_v4, %v7742_v31 }
0x2673   :  { %v6054_v12 = vpop.eup %6053  ;;  %6073 = vrcp.f32 %v7397_v0  ;;  %v4616_v28 = vsel %vm56_vm0, %v4604_v38, %v4592_v9  ;;  %v4685_v0 = vadd.f32 1.0, %v7513_v53  ;;  %v4606_v53 = vsel %vm4109_vm3, %v4232_v34, %v4413_v6 }
0x2674   :  { %v6056_v2 = vpop.eup %6055  ;;  %4629 = vst.msk [vmem:[%s7706_s10] sm:$0xff] %vm4628_vm6, %v4616_v28  ;;  %v4621_v55 = vsel %vm56_vm0, %v4609_v26, %v4597_v25  ;;  %6075 = vrcp.f32 %v4683_v14  ;;  %v4415_v27 = vmul.f32 %v6052_v19, %v7744_v63  ;;  %v4611_v32 = vsel %vm4109_vm3, %v4237_v51, %v4418_v52  ;;  %v7754_v19 = vld [vmem:[#allocation11_spill] sm:$0xff] }
0x2675   :  { %v6058_v17 = vpop.eup %6057  ;;  %4714 = vst.msk [vmem:[%s7706_s10] sm:$0xff] %vm4713_vm7, %v7501_v56  ;;  %v4594_v45 = vmul.f32 %v6056_v2, %v7743_v16  ;;  %v4570_v13 = vpop.xlane.xlu1 %4569  ;;  %v7745_v56 = vld [vmem:[#allocation17_spill] sm:$0xff]  ;;  %v4420_v18 = vmul.f32 %v6054_v12, %v7746_v29  ;;  %v7755_v12 = vld [vmem:[#allocation12_spill] sm:$0xff]  ;;  %v7756_v52 = vld [vmem:[#allocation19_spill] sm:$0xff] }
0x2676   :  { %4634 = vst.msk [vmem:[%s7706_s10 + $0x28] sm:$0xff] %vm4628_vm6, %v4621_v55  ;;  %v6060_v42 = vpop.eup %6059  ;;  %v4599_v46 = vmul.f32 %v6058_v17, %v7745_v56  ;;  %6077 = vrcp.f32 %v4570_v13  ;;  %v4608_v35 = vsel %vm4109_vm3, %v4234_v50, %v4415_v27  ;;  %v4826_v55 = vmul.f32 -1.442695, %v7358_v15 }
0x2677   :  { %4719 = vst.msk [vmem:[%s7706_s10 + $0x28] sm:$0xff] %vm4713_vm7, %v7516_v39  ;;  %v6062_v4 = vpop.eup %6061  ;;  %v4618_v54 = vsel %vm56_vm0, %v4606_v53, %v4594_v45  ;;  %6079 = vrcp.f32 %v4685_v0  ;;  %v4613_v20 = vsel %vm4109_vm3, %v4239_v62, %v4420_v18  ;;  %v4236_v22 = vmul.f32 %v6060_v42, %v7752_v30  ;;  %v4214_v0 = vpop.xlane.xlu0 %4213 }
0x2678   :  { %v6064_v41 = vpop.eup %6063  ;;  %4631 = vst.msk [vmem:[%s7706_s10 + $0x10] sm:$0xff] %vm4628_vm6, %v4618_v54  ;;  %v4623_v39 = vsel %vm56_vm0, %v4611_v32, %v4599_v46  ;;  %v4417_v58 = vmul.f32 %v6062_v4, %v7750_v1  ;;  %v4825_v17 = vmul.f32 -1.442695, %v7361_v57  ;;  %6081 = vpow2.f32 %v4826_v55 }
0x2679   :  { %v6066_v36 = vpop.eup %6065  ;;  %4716 = vst.msk [vmem:[%s7706_s10 + $0x10] sm:$0xff] %vm4713_vm7, %v7511_v21  ;;  %v4596_v48 = vmul.f32 %v6064_v41, %v7749_v3  ;;  %v7751_v21 = vld [vmem:[#allocation18_spill] sm:$0xff]  ;;  %v4217_v31 = vpop.xlane.xlu1 %4216 }
0x267a   :  { %4636 = vst.msk [vmem:[%s7706_s10 + $0x38] sm:$0xff] %vm4628_vm6, %v4623_v39  ;;  %v6068_v44 = vpop.eup %6067  ;;  %v4601_v37 = vmul.f32 %v6066_v36, %v7751_v21  ;;  %v4610_v23 = vsel %vm4109_vm3, %v4236_v22, %v4417_v58  ;;  %6083 = vpow2.f32 %v4825_v17  ;;  %v7757_v39 = vld [vmem:[#allocation20_spill] sm:$0xff] }
0x267b   :  { %4721 = vst.msk [vmem:[%s7706_s10 + $0x38] sm:$0xff] %vm4713_vm7, %v7521_v61  ;;  %v6070_v11 = vpop.eup %6069  ;;  %v4620_v24 = vsel %vm56_vm0, %v4608_v35, %v4596_v48  ;;  %v7753_v61 = vld [vmem:[#allocation15_spill] sm:$0xff]  ;;  %6085 = vrcp.f32 %v4217_v31 }
0x267c   :  { %v6072_v47 = vpop.eup %6071  ;;  %4633 = vst.msk [vmem:[%s7706_s10 + $0x20] sm:$0xff] %vm4628_vm6, %v4620_v24  ;;  %v4625_v14 = vsel %vm56_vm0, %v4613_v20, %v4601_v37  ;;  %v4419_v38 = vmul.f32 %v6070_v11, %v7754_v19 }
0x267d   :  { %v6074_v5 = vpop.eup %6073  ;;  %4718 = vst.msk [vmem:[%s7706_s10 + $0x20] sm:$0xff] %vm4713_vm7, %v7519_v43  ;;  %v4598_v9 = vmul.f32 %v6072_v47, %v7753_v61 }
0x267e   :  { %4638 = vst.msk [vmem:[%s7706_s10 + $0x48] sm:$0xff] %vm4628_vm6, %v4625_v14  ;;  %v6076_v6 = vpop.eup %6075  ;;  %v4238_v26 = vmul.f32 %v6074_v5, %v7755_v12 }
0x267f   :  { %4723 = vst.msk [vmem:[%s7706_s10 + $0x48] sm:$0xff] %vm4713_vm7, %v6068_v44  ;;  %v4622_v25 = vsel %vm56_vm0, %v4610_v23, %v4598_v9 }
0x2680   :  { %v6078_v43 = vpop.eup %6077  ;;  %4635 = vst.msk [vmem:[%s7706_s10 + $0x30] sm:$0xff] %vm4628_vm6, %v4622_v25  ;;  %v4612_v2 = vsel %vm4109_vm3, %v4238_v26, %v4419_v38 }
0x2681   :  { %4720 = vst.msk [vmem:[%s7706_s10 + $0x30] sm:$0xff] %vm4713_vm7, %v6076_v6  ;;  %v4600_v28 = vmul.f32 %v6078_v43, %v7756_v52  ;;  %v6080_v34 = vpop.eup %6079 }
0x2682   :  { %v6082_v45 = vpop.eup %6081 }
0x2683   :  { %v4624_v59 = vsel %vm56_vm0, %v4612_v2, %v4600_v28  ;;  %v4688_v53 = vadd.f32 1.0, %v6082_v45 }
0x2684   :  { %4637 = vst.msk [vmem:[%s7706_s10 + $0x40] sm:$0xff] %vm4628_vm6, %v4624_v59  ;;  %v6084_v13 = vpop.eup %6083 }
0x2685   :  { %4722 = vst.msk [vmem:[%s7706_s10 + $0x40] sm:$0xff] %vm4713_vm7, %v6080_v34  ;;  %v4687_v27 = vadd.f32 1.0, %v6084_v13  ;;  %v6086_v15 = vpop.eup %6085 }
0x2686   :  { %v4241_v18 = vmul.f32 %v6086_v15, %v7482_v40 }
0x26a1   :  { %v4398_v51 = vpop.xlane.xlu0 %4397 }
0x26a2   :  { %6087 = vrcp.f32 %v4398_v51  ;;  %v4395_v16 = vpop.xlane.xlu1 %4394 }
0x26a3   :  { %6089 = vrcp.f32 %v4395_v16 }
0x26a4   :  { %6091 = vrcp.f32 %v4214_v0 }
0x26a5   :  { %v4579_v42 = vpop.xlane.xlu0 %4578 }
0x26a6   :  { %6093 = vrcp.f32 %v4579_v42  ;;  %v4576_v63 = vpop.xlane.xlu1 %4575 }
0x26a7   :  { %6095 = vrcp.f32 %v4576_v63 }
0x26a8   :  { %6097 = vrcp.f32 %v4688_v53 }
0x26a9   :  { %6099 = vrcp.f32 %v4687_v27 }
0x26ac   :  { %v6088_v57 = vpop.eup %6087 }
0x26ad   :  { %v6090_v56 = vpop.eup %6089  ;;  %v4422_v4 = vmul.f32 %v6088_v57, %v7424_v60 }
0x26ae   :  { %v6092_v46 = vpop.eup %6091  ;;  %v4421_v32 = vmul.f32 %v6090_v56, %v7426_v33 }
0x26af   :  { %v4240_v41 = vmul.f32 %v6092_v46, %v7464_v49  ;;  %v4615_v50 = vsel %vm4109_vm3, %v4241_v18, %v4422_v4 }
0x26b0   :  { %v6094_v29 = vpop.eup %6093 }
0x26b1   :  { %v6096_v54 = vpop.eup %6095  ;;  %v4603_v8 = vmul.f32 %v6094_v29, %v7432_v7  ;;  %v4614_v10 = vsel %vm4109_vm3, %v4240_v41, %v4421_v32 }
0x26b2   :  { %v4602_v36 = vmul.f32 %v6096_v54, %v7757_v39  ;;  %v6098_v3 = vpop.eup %6097 }
0x26b3   :  { %v4627_v62 = vsel %vm56_vm0, %v4615_v50, %v4603_v8  ;;  %v6100_v33 = vpop.eup %6099 }
0x26b4   :  { %4640 = vst.msk [vmem:[%s7706_s10 + $0x58] sm:$0xff] %vm4628_vm6, %v4627_v62  ;;  %v4626_v60 = vsel %vm56_vm0, %v4614_v10, %v4602_v36 }
0x26b5   :  { %4725 = vst.msk [vmem:[%s7706_s10 + $0x58] sm:$0xff] %vm4713_vm7, %v6098_v3 }
0x26b6   :  { %4639 = vst.msk [vmem:[%s7706_s10 + $0x50] sm:$0xff] %vm4628_vm6, %v4626_v60 }
0x26b7   :  { %4724 = vst.msk [vmem:[%s7706_s10 + $0x50] sm:$0xff] %vm4713_vm7, %v6100_v33 }

</bundles_post_ra>
